<compile_context>
chip_gen: v7x
topology: tpu7x:2x2x1
jax: 0.10.0
libtpu: 0.0.40
codegen_flags: <defaults>
</compile_context>

<pallas_src>
import functools
import math

import jax
import jax.numpy as jnp
from jax.experimental import pallas as pl
from jax.experimental.pallas import tpu as pltpu

# bf16 matmul operands / activations (f32 accumulation). Set to jnp.float32 to
# track the f32 PyTorch reference more closely at the cost of 2x HBM traffic.
MATMUL_DTYPE = jnp.bfloat16
_IN_BYTES = jnp.dtype(MATMUL_DTYPE).itemsize

# Scoped-VMEM limit for every pallas_call: safe on v5e/v6e (128 MiB physical)
# and v7x (64 MiB physical); lifts v5e's 16 MiB default scoped limit.
_VMEM_LIMIT = 64 * 1024 * 1024
# Budget the tile pickers aim for (headroom below the limit for compiler scratch).
_VMEM_BUDGET = 20 * 1024 * 1024
# Constant-index weight blocks bigger than this are single-buffered.
_SINGLE_BUF_BYTES = 2 * 1024 * 1024


# ----------------------------------------------------------------------------
# Tile pickers
# ----------------------------------------------------------------------------
def _fit_rows(m, fixed_bytes, bytes_per_row, cap=1024):
    """Largest row tile (divisor of m, multiple of 8) whose footprint fits."""
    divs = [t for t in (2048, 1024, 512, 256, 128, 64, 32, 16, 8)
            if t <= cap and m % t == 0]
    if not divs:
        return m
    for t in divs:                       # largest first
        if fixed_bytes + t * bytes_per_row <= _VMEM_BUDGET:
            return t
    return divs[-1]


def _col_tile(n):
    for t in (256, 128):
        if n % t == 0:
            return t
    return n


def _const_weight_spec(shape, nbytes):
    """Spec for a block whose index never changes; single-buffer it if big."""
    index_map = lambda i: (0,) * len(shape)
    if nbytes > _SINGLE_BUF_BYTES:
        return pl.BlockSpec(shape, index_map, pipeline_mode=pl.Buffered(1))
    return pl.BlockSpec(shape, index_map)


# ----------------------------------------------------------------------------
# Dense (+ optional activation)
# ----------------------------------------------------------------------------
def _dense_kernel(x_ref, w_ref, b_ref, o_ref, *, activation):
    y = jnp.dot(x_ref[...], w_ref[...], preferred_element_type=jnp.float32)
    y = y + b_ref[...]
    if activation == "gelu":
        y = jax.nn.gelu(y, approximate=True)
    o_ref[...] = y.astype(o_ref.dtype)


def dense(x2d, w, b, activation=None, out_dtype=None, weight_stationary=False):
    """y = act(x @ w + b).  Default: row-stationary (weight column tiles stream
    per row tile).  weight_stationary=True (vocab projection): vocab tiles on
    the outer grid axis so each weight tile is DMA'd once and the small
    activation tile is what gets re-streamed."""
    M, K = x2d.shape
    N = w.shape[1]
    out_dtype = out_dtype or MATMUL_DTYPE
    obytes = jnp.dtype(out_dtype).itemsize
    x2d = x2d.astype(MATMUL_DTYPE)
    w = w.astype(MATMUL_DTYPE)
    tn = _col_tile(N)
    tm = _fit_rows(M, fixed_bytes=2 * (K * tn * _IN_BYTES + tn * 4),
                   bytes_per_row=2 * (K * _IN_BYTES + tn * obytes))
    # TODO(synk): add K-tiling (3-D grid + VMEM f32 accumulator with pl.when
    # init/finalize) to bound the resident weight block for very large K.
    if weight_stationary:
        grid = (N // tn, M // tm)
        in_specs = [pl.BlockSpec((tm, K), lambda j, i: (i, 0)),
                    pl.BlockSpec((K, tn), lambda j, i: (0, j)),
                    pl.BlockSpec((1, tn), lambda j, i: (0, j))]
        out_spec = pl.BlockSpec((tm, tn), lambda j, i: (i, j))
    else:
        grid = (M // tm, N // tn)
        in_specs = [pl.BlockSpec((tm, K), lambda i, j: (i, 0)),
                    pl.BlockSpec((K, tn), lambda i, j: (0, j)),
                    pl.BlockSpec((1, tn), lambda i, j: (0, j))]
        out_spec = pl.BlockSpec((tm, tn), lambda i, j: (i, j))
    return pl.pallas_call(
        functools.partial(_dense_kernel, activation=activation),
        out_shape=jax.ShapeDtypeStruct((M, N), out_dtype),
        grid=grid,
        in_specs=in_specs,
        out_specs=out_spec,
        compiler_params=pltpu.CompilerParams(
            dimension_semantics=("parallel", "parallel"),
            vmem_limit_bytes=_VMEM_LIMIT),
    )(x2d, w, b.reshape(1, N).astype(jnp.float32))


# ----------------------------------------------------------------------------
# Dense + residual + LayerNorm (fused epilogue)
# ----------------------------------------------------------------------------
def _dense_ln_kernel(x_ref, w_ref, b_ref, r_ref, g_ref, be_ref, o_ref, *, eps):
    y = jnp.dot(x_ref[...], w_ref[...], preferred_element_type=jnp.float32)
    y = y + b_ref[...] + r_ref[...].astype(jnp.float32)
    mu = jnp.mean(y, axis=-1, keepdims=True)
    var = jnp.mean(jnp.square(y - mu), axis=-1, keepdims=True)
    o_ref[...] = (((y - mu) * jax.lax.rsqrt(var + eps)) * g_ref[...]
                  + be_ref[...]).astype(o_ref.dtype)


def dense_ln(x2d, w, b, residual2d, gamma, beta, eps=1e-5):
    """LayerNorm((x @ w + b) + residual); LN statistics in f32."""
    M, K = x2d.shape
    N = w.shape[1]
    x2d = x2d.astype(MATMUL_DTYPE)
    w = w.astype(MATMUL_DTYPE)
    residual2d = residual2d.astype(MATMUL_DTYPE)
    w_bytes = K * N * _IN_BYTES
    tm = _fit_rows(M, fixed_bytes=2 * w_bytes + 6 * N * 4,
                   bytes_per_row=2 * (K * _IN_BYTES + 2 * N * _IN_BYTES))
    return pl.pallas_call(
        functools.partial(_dense_ln_kernel, eps=eps),
        out_shape=jax.ShapeDtypeStruct((M, N), MATMUL_DTYPE),
        grid=(M // tm,),
        in_specs=[
            pl.BlockSpec((tm, K), lambda i: (i, 0)),
            _const_weight_spec((K, N), w_bytes),
            _const_weight_spec((1, N), N * 4),
            pl.BlockSpec((tm, N), lambda i: (i, 0)),
            _const_weight_spec((1, N), N * 4),
            _const_weight_spec((1, N), N * 4),
        ],
        out_specs=pl.BlockSpec((tm, N), lambda i: (i, 0)),
        compiler_params=pltpu.CompilerParams(
            dimension_semantics=("parallel",),
            vmem_limit_bytes=_VMEM_LIMIT),
    )(x2d, w, b.reshape(1, N).astype(jnp.float32), residual2d,
      gamma.reshape(1, N).astype(jnp.float32),
      beta.reshape(1, N).astype(jnp.float32))


# ----------------------------------------------------------------------------
# Embedding LayerNorm (pos_emb add fused) and plain LayerNorm
# ----------------------------------------------------------------------------
def _embed_ln_kernel(x_ref, p_ref, g_ref, b_ref, o_ref, *, eps):
    x = x_ref[...] + p_ref[...]                       # (tb,L,H) + (L,H), f32
    mu = jnp.mean(x, axis=-1, keepdims=True)
    var = jnp.mean(jnp.square(x - mu), axis=-1, keepdims=True)
    o_ref[...] = (((x - mu) * jax.lax.rsqrt(var + eps)) * g_ref[...]
                  + b_ref[...]).astype(o_ref.dtype)


def embed_layer_norm(seqs, pos_emb, gamma, beta, eps=1e-5):
    """LayerNorm(item_emb + pos_emb) in one pass (saves an M*H HBM round trip)."""
    B, L, H = seqs.shape
    per_b = 2 * L * H * (4 + _IN_BYTES)
    tb = 1
    for t in (256, 128, 64, 32, 16, 8, 4, 2, 1):
        if B % t == 0 and t * per_b + L * H * 4 <= _VMEM_BUDGET:
            tb = t
            break
    return pl.pallas_call(
        functools.partial(_embed_ln_kernel, eps=eps),
        out_shape=jax.ShapeDtypeStruct((B, L, H), MATMUL_DTYPE),
        grid=(B // tb,),
        in_specs=[
            pl.BlockSpec((tb, L, H), lambda i: (i, 0, 0)),
            pl.BlockSpec((L, H), lambda i: (0, 0)),
            pl.BlockSpec((1, 1, H), lambda i: (0, 0, 0)),
            pl.BlockSpec((1, 1, H), lambda i: (0, 0, 0)),
        ],
        out_specs=pl.BlockSpec((tb, L, H), lambda i: (i, 0, 0)),
        compiler_params=pltpu.CompilerParams(
            dimension_semantics=("parallel",),
            vmem_limit_bytes=_VMEM_LIMIT),
    )(seqs.astype(jnp.float32), pos_emb.astype(jnp.float32),
      gamma.reshape(1, 1, H), beta.reshape(1, 1, H))


def _ln_kernel(x_ref, g_ref, b_ref, o_ref, *, eps):
    x = x_ref[...].astype(jnp.float32)
    mu = jnp.mean(x, axis=-1, keepdims=True)
    var = jnp.mean(jnp.square(x - mu), axis=-1, keepdims=True)
    o_ref[...] = (((x - mu) * jax.lax.rsqrt(var + eps)) * g_ref[...]
                  + b_ref[...]).astype(o_ref.dtype)


def layer_norm(x2d, gamma, beta, eps=1e-5):
    """LayerNorm over the last axis (used when pos_emb is disabled)."""
    M, H = x2d.shape
    tm = _fit_rows(M, fixed_bytes=4 * H * 4,
                   bytes_per_row=2 * H * (4 + _IN_BYTES), cap=2048)
    return pl.pallas_call(
        functools.partial(_ln_kernel, eps=eps),
        out_shape=jax.ShapeDtypeStruct((M, H), MATMUL_DTYPE),
        grid=(M // tm,),
        in_specs=[
            pl.BlockSpec((tm, H), lambda i: (i, 0)),
            pl.BlockSpec((1, H), lambda i: (0, 0)),
            pl.BlockSpec((1, H), lambda i: (0, 0)),
        ],
        out_specs=pl.BlockSpec((tm, H), lambda i: (i, 0)),
        compiler_params=pltpu.CompilerParams(
            dimension_semantics=("parallel",),
            vmem_limit_bytes=_VMEM_LIMIT),
    )(x2d.astype(jnp.float32), gamma.reshape(1, H), beta.reshape(1, H))


# ----------------------------------------------------------------------------
# Multi-head self-attention core (fused QKV input)
# ----------------------------------------------------------------------------
def _attn_kernel(qkv_ref, m_ref, o_ref, *, num_heads, hidden, scale):
    H = hidden
    Dh = H // num_heads
    qkv = qkv_ref[...]                                    # (TB, L, 3H)
    neg = (1.0 - m_ref[...]) * (-1e9)                     # (TB, 1, L) f32
    # TODO(synk): when Dh >= 128, move heads to a grid axis with column-stripe
    # BlockSpecs so q/k/v are 128-lane-aligned DMA slices instead of in-kernel
    # lane slices.
    for h in range(num_heads):                            # small, unrolled
        q = qkv[:, :, h * Dh:(h + 1) * Dh]
        k = qkv[:, :, H + h * Dh:H + (h + 1) * Dh]
        v = qkv[:, :, 2 * H + h * Dh:2 * H + (h + 1) * Dh]
        s = jax.lax.dot_general(q, k, (((2,), (2,)), ((0,), (0,))),
                                preferred_element_type=jnp.float32)
        s = s * scale + neg
        s = s - jnp.max(s, axis=-1, keepdims=True)
        p = jnp.exp(s)
        p = p * pl.reciprocal(jnp.sum(p, axis=-1, keepdims=True), approx=True)
        ctx = jax.lax.dot_general(p.astype(v.dtype), v,
                                  (((2,), (1,)), ((0,), (0,))),
                                  preferred_element_type=jnp.float32)
        # Direct per-head store (no concatenate, fewer live vregs).
        o_ref[:, :, h * Dh:(h + 1) * Dh] = ctx.astype(o_ref.dtype)


def mha_core(qkv, key_mask, num_heads, hidden):
    """qkv: (B, L, 3H) fused projections; key_mask: (B, L) bool -> ctx (B,L,H)."""
    B, L, H3 = qkv.shape
    per_b = 2 * (L * H3 * _IN_BYTES + L * hidden * _IN_BYTES + L * 4)
    TB = 1
    for t in (16, 8, 4, 2, 1):
        if B % t == 0 and t * per_b <= _VMEM_BUDGET:
            TB = t
            break
    m = key_mask.reshape(B, 1, L).astype(jnp.float32)
    scale = 1.0 / math.sqrt(hidden // num_heads)
    return pl.pallas_call(
        functools.partial(_attn_kernel, num_heads=num_heads, hidden=hidden,
                          scale=scale),
        out_shape=jax.ShapeDtypeStruct((B, L, hidden), MATMUL_DTYPE),
        grid=(B // TB,),
        in_specs=[
            pl.BlockSpec((TB, L, H3), lambda b: (b, 0, 0)),
            pl.BlockSpec((TB, 1, L), lambda b: (b, 0, 0)),
        ],
        out_specs=pl.BlockSpec((TB, L, hidden), lambda b: (b, 0, 0)),
        compiler_params=pltpu.CompilerParams(
            dimension_semantics=("parallel",),
            vmem_limit_bytes=_VMEM_LIMIT),
    )(qkv, m)


# ----------------------------------------------------------------------------
# Fused make_mlp_in + first MLPRec Linear (merge='concat')
# ----------------------------------------------------------------------------
def _mlp_first_kernel(bert_ref, modal_ref, mask_ref, wa_ref, wb_ref, b_ref,
                      o_ref, *, activation):
    y = jnp.dot(bert_ref[...], wa_ref[...], preferred_element_type=jnp.float32)
    modal = modal_ref[...] * mask_ref[...]               # mask is exact 0/1
    y = y + jnp.dot(modal, wb_ref[...], preferred_element_type=jnp.float32)
    y = y + b_ref[...]
    if activation == "gelu":
        y = jax.nn.gelu(y, approximate=True)
    o_ref[...] = y.astype(o_ref.dtype)


def mlp_first_dense(bert2d, modal2d, mask2d, wa, wb, b, activation="gelu"):
    """act([bert | modal*mask] @ [wa; wb] + b) without materializing the concat."""
    M, H = bert2d.shape
    E = modal2d.shape[1]
    N = wa.shape[1]
    wa = wa.astype(MATMUL_DTYPE)
    wb = wb.astype(MATMUL_DTYPE)
    tm = _fit_rows(M, fixed_bytes=2 * ((H + E) * N * _IN_BYTES + N * 4),
                   bytes_per_row=2 * ((H + E + 1) * _IN_BYTES + N * _IN_BYTES))
    return pl.pallas_call(
        functools.partial(_mlp_first_kernel, activation=activation),
        out_shape=jax.ShapeDtypeStruct((M, N), MATMUL_DTYPE),
        grid=(M // tm,),
        in_specs=[
            pl.BlockSpec((tm, H), lambda i: (i, 0)),
            pl.BlockSpec((tm, E), lambda i: (i, 0)),
            pl.BlockSpec((tm, 1), lambda i: (i, 0)),
            pl.BlockSpec((H, N), lambda i: (0, 0)),
            pl.BlockSpec((E, N), lambda i: (0, 0)),
            pl.BlockSpec((1, N), lambda i: (0, 0)),
        ],
        out_specs=pl.BlockSpec((tm, N), lambda i: (i, 0)),
        compiler_params=pltpu.CompilerParams(
            dimension_semantics=("parallel",),
            vmem_limit_bytes=_VMEM_LIMIT),
    )(bert2d.astype(MATMUL_DTYPE), modal2d.astype(MATMUL_DTYPE),
      mask2d.astype(MATMUL_DTYPE), wa, wb, b.reshape(1, N).astype(jnp.float32))


def _mlp_in_kernel(bert_ref, modal_ref, mask_ref, o_ref, *, H):
    o_ref[:, :H] = bert_ref[...]
    o_ref[:, H:] = modal_ref[...] * mask_ref[...]


def build_mlp_in(bert2d, modal2d, mask2d):
    """Standalone make_mlp_in (only used when num_mlp_layers == 0)."""
    M, H = bert2d.shape
    E = modal2d.shape[1]
    tm = _fit_rows(M, fixed_bytes=0,
                   bytes_per_row=2 * (2 * H + 2 * E + 1) * _IN_BYTES, cap=2048)
    return pl.pallas_call(
        functools.partial(_mlp_in_kernel, H=H),
        out_shape=jax.ShapeDtypeStruct((M, H + E), MATMUL_DTYPE),
        grid=(M // tm,),
        in_specs=[
            pl.BlockSpec((tm, H), lambda i: (i, 0)),
            pl.BlockSpec((tm, E), lambda i: (i, 0)),
            pl.BlockSpec((tm, 1), lambda i: (i, 0)),
        ],
        out_specs=pl.BlockSpec((tm, H + E), lambda i: (i, 0)),
        compiler_params=pltpu.CompilerParams(
            dimension_semantics=("parallel",),
            vmem_limit_bytes=_VMEM_LIMIT),
    )(bert2d.astype(MATMUL_DTYPE), modal2d.astype(MATMUL_DTYPE),
      mask2d.astype(MATMUL_DTYPE))


# ----------------------------------------------------------------------------
# Model wrapper (glue: gathers, reshapes)
# ----------------------------------------------------------------------------
def bert_block(x2d, key_mask, p, B, L, num_heads, H):
    qkv = dense(x2d, p["wqkv"], p["bqkv"])                          # (M, 3H)
    ctx = mha_core(qkv.reshape(B, L, 3 * H), key_mask, num_heads, H)
    x2d = dense_ln(ctx.reshape(B * L, H), p["wo"], p["bo"], x2d,
                   p["ln1_g"], p["ln1_b"])
    h = dense(x2d, p["w1"], p["b1"], activation="gelu")
    x2d = dense_ln(h, p["w2"], p["b2"], x2d, p["ln2_g"], p["ln2_b"])
    return x2d


def mlpbert4rec_forward(params, log_seqs, modal_emb, labels, cfg):
    B, L = log_seqs.shape
    H = cfg["hidden_size"]
    E = cfg["linear_in_size"]
    M = B * L
    n_out = cfg["num_item"] + 1

    # ---------------- BERT4Rec (use_linear=False) ----------------
    seqs = params["item_emb"][log_seqs]                             # gather (glue)
    if cfg["pos_emb"]:
        x2d = embed_layer_norm(seqs, params["pos_emb"],
                               params["emb_ln_g"], params["emb_ln_b"]
                               ).reshape(M, H)
    else:
        x2d = layer_norm(seqs.reshape(M, H), params["emb_ln_g"],
                         params["emb_ln_b"])
    key_mask = log_seqs > 0
    for blk in params["blocks"]:
        x2d = bert_block(x2d, key_mask, blk, B, L, cfg["num_heads"], H)
    bert_out2d = x2d                                                # (M, H)

    # ------------- make_mlp_in (merge='concat') + MLPRec -------------
    mlp_layers = params["mlp_layers"]
    if E == 0:
        h = bert_out2d
        for w, b in mlp_layers:
            h = dense(h, w, b, activation="gelu")
    else:
        mask2d = ((labels != 0) & (log_seqs > 0)).reshape(M, 1)
        mask2d = mask2d.astype(MATMUL_DTYPE)
        modal2d = modal_emb.reshape(M, E)
        if mlp_layers:
            w0, b0 = mlp_layers[0]
            h = mlp_first_dense(bert_out2d, modal2d, mask2d,
                                w0[:H], w0[H:], b0, activation="gelu")
            for w, b in mlp_layers[1:]:
                h = dense(h, w, b, activation="gelu")
        else:
            h = build_mlp_in(bert_out2d, modal2d, mask2d)

    # ---- final projection: weight-stationary, 128-padded vocab, f32 logits ----
    out2d = dense(h, params["out_w"], params["out_b"],
                  out_dtype=jnp.float32, weight_stationary=True)
    return out2d[:, :n_out].reshape(B, L, n_out)


# ----------------------------------------------------------------------------
# Deterministic parameter initialization (synthetic weights)
# ----------------------------------------------------------------------------
def init_params(key, cfg):
    H = cfg["hidden_size"]
    E = cfg["linear_in_size"]
    L = cfg["max_len"]
    ffn = 4 * H
    in_size = H + E  # merge == 'concat'
    keys = iter(jax.random.split(key, 256))

    def nrm(shape, scale=0.02):
        return scale * jax.random.normal(next(keys), shape, jnp.float32)

    def mm(x):  # matmul operands cast once at init (not per call)
        return x.astype(MATMUL_DTYPE)

    params = {
        "item_emb": nrm((cfg["num_item"] + 2, H)).at[0].set(0.0),  # padding_idx=0
        "pos_emb": nrm((L, H)),
        "emb_ln_g": jnp.ones((H,), jnp.float32),
        "emb_ln_b": jnp.zeros((H,), jnp.float32),
        "blocks": [],
        "mlp_layers": [],
    }
    for _ in range(cfg["num_hidden_layers"]):
        params["blocks"].append({
            "wqkv": mm(nrm((H, 3 * H))), "bqkv": jnp.zeros((3 * H,), jnp.float32),
            "wo": mm(nrm((H, H))), "bo": jnp.zeros((H,), jnp.float32),
            "ln1_g": jnp.ones((H,), jnp.float32), "ln1_b": jnp.zeros((H,), jnp.float32),
            "w1": mm(nrm((H, ffn))), "b1": jnp.zeros((ffn,), jnp.float32),
            "w2": mm(nrm((ffn, H))), "b2": jnp.zeros((H,), jnp.float32),
            "ln2_g": jnp.ones((H,), jnp.float32), "ln2_b": jnp.zeros((H,), jnp.float32),
        })
    d = in_size
    for _ in range(cfg["num_mlp_layers"]):
        params["mlp_layers"].append(
            (mm(nrm((d, d // 2))), jnp.zeros((d // 2,), jnp.float32)))
        d //= 2
    # Final projection: pad the vocab dim to a 128 multiple (lane-dense stores,
    # bounded weight tiles); padded columns are zero and sliced off in forward.
    n_out = cfg["num_item"] + 1
    n_pad = -(-n_out // 128) * 128
    out_w = nrm((d, n_out))
    if n_pad != n_out:
        out_w = jnp.pad(out_w, ((0, 0), (0, n_pad - n_out)))
    params["out_w"] = mm(out_w)
    params["out_b"] = jnp.zeros((n_pad,), jnp.float32)
    return params


# ----------------------------------------------------------------------------
if __name__ == "__main__":
    cfg = dict(
        num_item=50,
        linear_in_size=16,
        hidden_size=32,
        num_heads=4,
        num_hidden_layers=2,
        max_len=8,
        pos_emb=True,
        num_mlp_layers=2,
    )
    key = jax.random.PRNGKey(0)
    pkey, k1, k2, k3 = jax.random.split(key, 4)
    params = init_params(pkey, cfg)

    B, L = 2, cfg["max_len"]
    log_seqs = jax.random.randint(k1, (B, L), 1, cfg["num_item"] + 1, jnp.int32)
    log_seqs = log_seqs.at[0, :2].set(0)  # some padding positions
    labels = jax.random.randint(k2, (B, L), 0, cfg["num_item"] + 1, jnp.int32)
    modal_emb = jax.random.normal(k3, (B, L, cfg["linear_in_size"]), jnp.float32)

    fwd = jax.jit(lambda p, s, m, lab: mlpbert4rec_forward(p, s, m, lab, cfg))
    out = fwd(params, log_seqs, modal_emb, labels)
    jax.block_until_ready(out)
    assert out.shape == (B, L, cfg["num_item"] + 1)
    assert bool(jnp.all(jnp.isfinite(out)))
    print("KERNEL_OK")
</pallas_src>

<mosaic_0001>
module attributes {stable_mosaic.version = 11 : i64} {
  func.func @_dense_kernel(%arg0: i32, %arg1: i32, %arg2: memref<16x32xbf16, #tpu.memory_space<vmem>>, %arg3: memref<32x96xbf16, #tpu.memory_space<vmem>>, %arg4: memref<1x96xf32, #tpu.memory_space<vmem>>, %arg5: memref<16x96xbf16, #tpu.memory_space<vmem>>) attributes {dimension_semantics = [#tpu.dimension_semantics<parallel>, #tpu.dimension_semantics<parallel>], iteration_bounds = array<i64: 1, 1>, scalar_prefetch = 0 : i64, scratch_operands = 0 : i64, tpu.core_type = #tpu.core_type<tc>, window_params = [{transform_indices = @transform_0, window_bounds = array<i64: 16, 32>}, {transform_indices = @transform_1, window_bounds = array<i64: 32, 96>}, {transform_indices = @transform_2, window_bounds = array<i64: 1, 96>}, {transform_indices = @transform_3, window_bounds = array<i64: 16, 96>}]} {
    %c0 = arith.constant 0 : index
    %c0_0 = arith.constant 0 : index
    %0 = vector.load %arg2[%c0, %c0_0] : memref<16x32xbf16, #tpu.memory_space<vmem>>, vector<16x32xbf16>
    %c0_1 = arith.constant 0 : index
    %c0_2 = arith.constant 0 : index
    %1 = vector.load %arg3[%c0_1, %c0_2] : memref<32x96xbf16, #tpu.memory_space<vmem>>, vector<32x96xbf16>
    %cst = arith.constant dense<0.000000e+00> : vector<16x96xf32>
    %2 = tpu.matmul %0, %1, %cst {dimension_numbers = #tpu.dot_dimension_numbers<[1], [0], [0], [1], [0, 0, 1, 1], [], []>} : vector<16x32xbf16>, vector<32x96xbf16>, vector<16x96xf32> -> vector<16x96xf32>
    %c0_3 = arith.constant 0 : index
    %c0_4 = arith.constant 0 : index
    %3 = vector.load %arg4[%c0_3, %c0_4] : memref<1x96xf32, #tpu.memory_space<vmem>>, vector<1x96xf32>
    %4 = vector.broadcast %3 : vector<1x96xf32> to vector<16x96xf32>
    %5 = arith.addf %2, %4 : vector<16x96xf32>
    %6 = arith.truncf %5 : vector<16x96xf32> to vector<16x96xbf16>
    %c0_5 = arith.constant 0 : index
    %c0_6 = arith.constant 0 : index
    %7 = vector.load %arg5[%c0_5, %c0_6] : memref<16x96xbf16, #tpu.memory_space<vmem>>, vector<16x96xbf16>
    tpu.vector_store %arg5[%c0_5, %c0_6], %6 {strides = array<i32>} : memref<16x96xbf16, #tpu.memory_space<vmem>>, vector<16x96xbf16>,
    return
  }
  func.func @transform_0(%arg0: i32, %arg1: i32) -> (i32, i32) {
    %c0_i32 = arith.constant 0 : i32
    %c0_i32_0 = arith.constant 0 : i32
    return %arg0, %c0_i32 : i32, i32
  }
  func.func @transform_1(%arg0: i32, %arg1: i32) -> (i32, i32) {
    %c0_i32 = arith.constant 0 : i32
    %c0_i32_0 = arith.constant 0 : i32
    return %c0_i32, %arg1 : i32, i32
  }
  func.func @transform_2(%arg0: i32, %arg1: i32) -> (i32, i32) {
    %c0_i32 = arith.constant 0 : i32
    %c0_i32_0 = arith.constant 0 : i32
    return %c0_i32, %arg1 : i32, i32
  }
  func.func @transform_3(%arg0: i32, %arg1: i32) -> (i32, i32) {
    %c0_i32 = arith.constant 0 : i32
    return %arg0, %arg1 : i32, i32
  }
}

module attributes {stable_mosaic.version = 11 : i64} {
  func.func @_embed_ln_kernel(%arg0: i32, %arg1: memref<2x8x32xf32, #tpu.memory_space<vmem>>, %arg2: memref<8x32xf32, #tpu.memory_space<vmem>>, %arg3: memref<1x1x32xf32, #tpu.memory_space<vmem>>, %arg4: memref<1x1x32xf32, #tpu.memory_space<vmem>>, %arg5: memref<2x8x32xbf16, #tpu.memory_space<vmem>>) attributes {dimension_semantics = [#tpu.dimension_semantics<parallel>], iteration_bounds = array<i64: 1>, scalar_prefetch = 0 : i64, scratch_operands = 0 : i64, tpu.core_type = #tpu.core_type<tc>, window_params = [{transform_indices = @transform_0, window_bounds = array<i64: 2, 8, 32>}, {pipeline_mode = #tpu.pipeline_mode<synchronous>, transform_indices = @transform_1, window_bounds = array<i64: 8, 32>}, {pipeline_mode = #tpu.pipeline_mode<synchronous>, transform_indices = @transform_2, window_bounds = array<i64: 1, 1, 32>}, {pipeline_mode = #tpu.pipeline_mode<synchronous>, transform_indices = @transform_3, window_bounds = array<i64: 1, 1, 32>}, {transform_indices = @transform_4, window_bounds = array<i64: 2, 8, 32>}]} {
    %c0 = arith.constant 0 : index
    %c0_0 = arith.constant 0 : index
    %c0_1 = arith.constant 0 : index
    %0 = vector.load %arg1[%c0, %c0_0, %c0_1] : memref<2x8x32xf32, #tpu.memory_space<vmem>>, vector<2x8x32xf32>
    %c0_2 = arith.constant 0 : index
    %c0_3 = arith.constant 0 : index
    %1 = vector.load %arg2[%c0_2, %c0_3] : memref<8x32xf32, #tpu.memory_space<vmem>>, vector<8x32xf32>
    %2 = vector.shape_cast %1 : vector<8x32xf32> to vector<1x8x32xf32>
    %3 = vector.broadcast %2 : vector<1x8x32xf32> to vector<2x8x32xf32>
    %4 = arith.addf %0, %3 : vector<2x8x32xf32>
    %cst = arith.constant dense<0.000000e+00> : vector<2x8xf32>
    %5 = vector.multi_reduction <add>, %4, %cst [2] : vector<2x8x32xf32> to vector<2x8xf32>
    %6 = vector.shape_cast %5 : vector<2x8xf32> to vector<2x8x1xf32>
    %cst_4 = arith.constant 3.200000e+01 : f32
    %7 = vector.broadcast %cst_4 : f32 to vector<2x8x1xf32>
    %8 = arith.divf %6, %7 : vector<2x8x1xf32>
    %9 = vector.broadcast %8 : vector<2x8x1xf32> to vector<2x8x32xf32>
    %10 = arith.subf %4, %9 : vector<2x8x32xf32>
    %11 = arith.mulf %10, %10 : vector<2x8x32xf32>
    %cst_5 = arith.constant dense<0.000000e+00> : vector<2x8xf32>
    %12 = vector.multi_reduction <add>, %11, %cst_5 [2] : vector<2x8x32xf32> to vector<2x8xf32>
    %13 = vector.shape_cast %12 : vector<2x8xf32> to vector<2x8x1xf32>
    %cst_6 = arith.constant 3.200000e+01 : f32
    %14 = vector.broadcast %cst_6 : f32 to vector<2x8x1xf32>
    %15 = arith.divf %13, %14 : vector<2x8x1xf32>
    %16 = vector.broadcast %8 : vector<2x8x1xf32> to vector<2x8x32xf32>
    %17 = arith.subf %4, %16 : vector<2x8x32xf32>
    %cst_7 = arith.constant 9.99999974E-6 : f32
    %18 = vector.broadcast %cst_7 : f32 to vector<2x8x1xf32>
    %19 = arith.addf %15, %18 : vector<2x8x1xf32>
    %20 = math.rsqrt %19 : vector<2x8x1xf32>
    %21 = vector.broadcast %20 : vector<2x8x1xf32> to vector<2x8x32xf32>
    %22 = arith.mulf %17, %21 : vector<2x8x32xf32>
    %c0_8 = arith.constant 0 : index
    %c0_9 = arith.constant 0 : index
    %c0_10 = arith.constant 0 : index
    %23 = vector.load %arg3[%c0_8, %c0_9, %c0_10] : memref<1x1x32xf32, #tpu.memory_space<vmem>>, vector<1x1x32xf32>
    %24 = vector.broadcast %23 : vector<1x1x32xf32> to vector<2x8x32xf32>
    %25 = arith.mulf %22, %24 : vector<2x8x32xf32>
    %c0_11 = arith.constant 0 : index
    %c0_12 = arith.constant 0 : index
    %c0_13 = arith.constant 0 : index
    %26 = vector.load %arg4[%c0_11, %c0_12, %c0_13] : memref<1x1x32xf32, #tpu.memory_space<vmem>>, vector<1x1x32xf32>
    %27 = vector.broadcast %26 : vector<1x1x32xf32> to vector<2x8x32xf32>
    %28 = arith.addf %25, %27 : vector<2x8x32xf32>
    %29 = arith.truncf %28 : vector<2x8x32xf32> to vector<2x8x32xbf16>
    %c0_14 = arith.constant 0 : index
    %c0_15 = arith.constant 0 : index
    %c0_16 = arith.constant 0 : index
    %30 = vector.load %arg5[%c0_14, %c0_15, %c0_16] : memref<2x8x32xbf16, #tpu.memory_space<vmem>>, vector<2x8x32xbf16>
    tpu.vector_store %arg5[%c0_14, %c0_15, %c0_16], %29 {strides = array<i32>} : memref<2x8x32xbf16, #tpu.memory_space<vmem>>, vector<2x8x32xbf16>,
    return
  }
  func.func @transform_0(%arg0: i32) -> (i32, i32, i32) {
    %c0_i32 = arith.constant 0 : i32
    %c0_i32_0 = arith.constant 0 : i32
    %c0_i32_1 = arith.constant 0 : i32
    return %arg0, %c0_i32, %c0_i32_0 : i32, i32, i32
  }
  func.func @transform_1(%arg0: i32) -> (i32, i32) {
    %c0_i32 = arith.constant 0 : i32
    %c0_i32_0 = arith.constant 0 : i32
    %c0_i32_1 = arith.constant 0 : i32
    return %c0_i32, %c0_i32_0 : i32, i32
  }
  func.func @transform_2(%arg0: i32) -> (i32, i32, i32) {
    %c0_i32 = arith.constant 0 : i32
    %c0_i32_0 = arith.constant 0 : i32
    %c0_i32_1 = arith.constant 0 : i32
    %c0_i32_2 = arith.constant 0 : i32
    return %c0_i32, %c0_i32_0, %c0_i32_1 : i32, i32, i32
  }
  func.func @transform_3(%arg0: i32) -> (i32, i32, i32) {
    %c0_i32 = arith.constant 0 : i32
    %c0_i32_0 = arith.constant 0 : i32
    %c0_i32_1 = arith.constant 0 : i32
    %c0_i32_2 = arith.constant 0 : i32
    return %c0_i32, %c0_i32_0, %c0_i32_1 : i32, i32, i32
  }
  func.func @transform_4(%arg0: i32) -> (i32, i32, i32) {
    %c0_i32 = arith.constant 0 : i32
    %c0_i32_0 = arith.constant 0 : i32
    %c0_i32_1 = arith.constant 0 : i32
    return %arg0, %c0_i32, %c0_i32_0 : i32, i32, i32
  }
}

module attributes {stable_mosaic.version = 11 : i64} {
  func.func @_attn_kernel(%arg0: i32, %arg1: memref<2x8x96xbf16, #tpu.memory_space<vmem>>, %arg2: memref<2x1x8xf32, #tpu.memory_space<vmem>>, %arg3: memref<2x8x32xbf16, #tpu.memory_space<vmem>>) attributes {dimension_semantics = [#tpu.dimension_semantics<parallel>], iteration_bounds = array<i64: 1>, scalar_prefetch = 0 : i64, scratch_operands = 0 : i64, tpu.core_type = #tpu.core_type<tc>, window_params = [{transform_indices = @transform_0, window_bounds = array<i64: 2, 8, 96>}, {transform_indices = @transform_1, window_bounds = array<i64: 2, 1, 8>}, {transform_indices = @transform_2, window_bounds = array<i64: 2, 8, 32>}]} {
    %c0 = arith.constant 0 : index
    %c0_0 = arith.constant 0 : index
    %c0_1 = arith.constant 0 : index
    %0 = vector.load %arg1[%c0, %c0_0, %c0_1] : memref<2x8x96xbf16, #tpu.memory_space<vmem>>, vector<2x8x96xbf16>
    %c0_2 = arith.constant 0 : index
    %c0_3 = arith.constant 0 : index
    %c0_4 = arith.constant 0 : index
    %1 = vector.load %arg2[%c0_2, %c0_3, %c0_4] : memref<2x1x8xf32, #tpu.memory_space<vmem>>, vector<2x1x8xf32>
    %cst = arith.constant 1.000000e+00 : f32
    %2 = vector.broadcast %cst : f32 to vector<2x1x8xf32>
    %3 = arith.subf %2, %1 : vector<2x1x8xf32>
    %cst_5 = arith.constant -1.000000e+09 : f32
    %4 = vector.broadcast %cst_5 : f32 to vector<2x1x8xf32>
    %5 = arith.mulf %3, %4 : vector<2x1x8xf32>
    %6 = vector.extract_strided_slice %0 {offsets = [0, 0, 0], sizes = [2, 8, 8], strides = [1, 1, 1]} : vector<2x8x96xbf16> to vector<2x8x8xbf16>
    %7 = vector.extract_strided_slice %0 {offsets = [0, 0, 32], sizes = [2, 8, 8], strides = [1, 1, 1]} : vector<2x8x96xbf16> to vector<2x8x8xbf16>
    %8 = vector.extract_strided_slice %0 {offsets = [0, 0, 64], sizes = [2, 8, 8], strides = [1, 1, 1]} : vector<2x8x96xbf16> to vector<2x8x8xbf16>
    %cst_6 = arith.constant dense<0.000000e+00> : vector<2x8x8xf32>
    %9 = tpu.matmul %6, %7, %cst_6 {dimension_numbers = #tpu.dot_dimension_numbers<[2], [2], [1], [1], [0, 0, 0, 1, 1, 1], [0], [0]>} : vector<2x8x8xbf16>, vector<2x8x8xbf16>, vector<2x8x8xf32> -> vector<2x8x8xf32>
    %cst_7 = arith.constant 0.353553385 : f32
    %10 = vector.broadcast %cst_7 : f32 to vector<2x8x8xf32>
    %11 = arith.mulf %9, %10 : vector<2x8x8xf32>
    %12 = vector.broadcast %5 : vector<2x1x8xf32> to vector<2x8x8xf32>
    %13 = arith.addf %11, %12 : vector<2x8x8xf32>
    %cst_8 = arith.constant dense<0xFF800000> : vector<2x8xf32>
    %14 = vector.multi_reduction <maximumf>, %13, %cst_8 [2] : vector<2x8x8xf32> to vector<2x8xf32>
    %15 = vector.shape_cast %14 : vector<2x8xf32> to vector<2x8x1xf32>
    %16 = vector.broadcast %15 : vector<2x8x1xf32> to vector<2x8x8xf32>
    %17 = arith.subf %13, %16 : vector<2x8x8xf32>
    %18 = math.exp %17 : vector<2x8x8xf32>
    %cst_9 = arith.constant dense<0.000000e+00> : vector<2x8xf32>
    %19 = vector.multi_reduction <add>, %18, %cst_9 [2] : vector<2x8x8xf32> to vector<2x8xf32>
    %20 = vector.shape_cast %19 : vector<2x8xf32> to vector<2x8x1xf32>
    %21 = tpu.reciprocal %20 {approx = true} : vector<2x8x1xf32> -> vector<2x8x1xf32>
    %22 = vector.broadcast %21 : vector<2x8x1xf32> to vector<2x8x8xf32>
    %23 = arith.mulf %18, %22 : vector<2x8x8xf32>
    %24 = arith.truncf %23 : vector<2x8x8xf32> to vector<2x8x8xbf16>
    %cst_10 = arith.constant dense<0.000000e+00> : vector<2x8x8xf32>
    %25 = tpu.matmul %24, %8, %cst_10 {dimension_numbers = #tpu.dot_dimension_numbers<[2], [1], [1], [2], [0, 0, 0, 1, 1, 2], [0], [0]>} : vector<2x8x8xbf16>, vector<2x8x8xbf16>, vector<2x8x8xf32> -> vector<2x8x8xf32>
    %26 = arith.truncf %25 : vector<2x8x8xf32> to vector<2x8x8xbf16>
    %c0_11 = arith.constant 0 : index
    %c0_12 = arith.constant 0 : index
    %c0_13 = arith.constant 0 : index
    %27 = vector.load %arg3[%c0_11, %c0_12, %c0_13] : memref<2x8x32xbf16, #tpu.memory_space<vmem>>, vector<2x8x8xbf16>
    tpu.vector_store %arg3[%c0_11, %c0_12, %c0_13], %26 {strides = array<i32>} : memref<2x8x32xbf16, #tpu.memory_space<vmem>>, vector<2x8x8xbf16>,
    %28 = vector.extract_strided_slice %0 {offsets = [0, 0, 8], sizes = [2, 8, 8], strides = [1, 1, 1]} : vector<2x8x96xbf16> to vector<2x8x8xbf16>
    %29 = vector.extract_strided_slice %0 {offsets = [0, 0, 40], sizes = [2, 8, 8], strides = [1, 1, 1]} : vector<2x8x96xbf16> to vector<2x8x8xbf16>
    %30 = vector.extract_strided_slice %0 {offsets = [0, 0, 72], sizes = [2, 8, 8], strides = [1, 1, 1]} : vector<2x8x96xbf16> to vector<2x8x8xbf16>
    %cst_14 = arith.constant dense<0.000000e+00> : vector<2x8x8xf32>
    %31 = tpu.matmul %28, %29, %cst_14 {dimension_numbers = #tpu.dot_dimension_numbers<[2], [2], [1], [1], [0, 0, 0, 1, 1, 1], [0], [0]>} : vector<2x8x8xbf16>, vector<2x8x8xbf16>, vector<2x8x8xf32> -> vector<2x8x8xf32>
    %cst_15 = arith.constant 0.353553385 : f32
    %32 = vector.broadcast %cst_15 : f32 to vector<2x8x8xf32>
    %33 = arith.mulf %31, %32 : vector<2x8x8xf32>
    %34 = vector.broadcast %5 : vector<2x1x8xf32> to vector<2x8x8xf32>
    %35 = arith.addf %33, %34 : vector<2x8x8xf32>
    %cst_16 = arith.constant dense<0xFF800000> : vector<2x8xf32>
    %36 = vector.multi_reduction <maximumf>, %35, %cst_16 [2] : vector<2x8x8xf32> to vector<2x8xf32>
    %37 = vector.shape_cast %36 : vector<2x8xf32> to vector<2x8x1xf32>
    %38 = vector.broadcast %37 : vector<2x8x1xf32> to vector<2x8x8xf32>
    %39 = arith.subf %35, %38 : vector<2x8x8xf32>
    %40 = math.exp %39 : vector<2x8x8xf32>
    %cst_17 = arith.constant dense<0.000000e+00> : vector<2x8xf32>
    %41 = vector.multi_reduction <add>, %40, %cst_17 [2] : vector<2x8x8xf32> to vector<2x8xf32>
    %42 = vector.shape_cast %41 : vector<2x8xf32> to vector<2x8x1xf32>
    %43 = tpu.reciprocal %42 {approx = true} : vector<2x8x1xf32> -> vector<2x8x1xf32>
    %44 = vector.broadcast %43 : vector<2x8x1xf32> to vector<2x8x8xf32>
    %45 = arith.mulf %40, %44 : vector<2x8x8xf32>
    %46 = arith.truncf %45 : vector<2x8x8xf32> to vector<2x8x8xbf16>
    %cst_18 = arith.constant dense<0.000000e+00> : vector<2x8x8xf32>
    %47 = tpu.matmul %46, %30, %cst_18 {dimension_numbers = #tpu.dot_dimension_numbers<[2], [1], [1], [2], [0, 0, 0, 1, 1, 2], [0], [0]>} : vector<2x8x8xbf16>, vector<2x8x8xbf16>, vector<2x8x8xf32> -> vector<2x8x8xf32>
    %48 = arith.truncf %47 : vector<2x8x8xf32> to vector<2x8x8xbf16>
    %c0_19 = arith.constant 0 : index
    %c0_20 = arith.constant 0 : index
    %c8 = arith.constant 8 : index
    %49 = vector.load %arg3[%c0_19, %c0_20, %c8] : memref<2x8x32xbf16, #tpu.memory_space<vmem>>, vector<2x8x8xbf16>
    tpu.vector_store %arg3[%c0_19, %c0_20, %c8], %48 {strides = array<i32>} : memref<2x8x32xbf16, #tpu.memory_space<vmem>>, vector<2x8x8xbf16>,
    %50 = vector.extract_strided_slice %0 {offsets = [0, 0, 16], sizes = [2, 8, 8], strides = [1, 1, 1]} : vector<2x8x96xbf16> to vector<2x8x8xbf16>
    %51 = vector.extract_strided_slice %0 {offsets = [0, 0, 48], sizes = [2, 8, 8], strides = [1, 1, 1]} : vector<2x8x96xbf16> to vector<2x8x8xbf16>
    %52 = vector.extract_strided_slice %0 {offsets = [0, 0, 80], sizes = [2, 8, 8], strides = [1, 1, 1]} : vector<2x8x96xbf16> to vector<2x8x8xbf16>
    %cst_21 = arith.constant dense<0.000000e+00> : vector<2x8x8xf32>
    %53 = tpu.matmul %50, %51, %cst_21 {dimension_numbers = #tpu.dot_dimension_numbers<[2], [2], [1], [1], [0, 0, 0, 1, 1, 1], [0], [0]>} : vector<2x8x8xbf16>, vector<2x8x8xbf16>, vector<2x8x8xf32> -> vector<2x8x8xf32>
    %cst_22 = arith.constant 0.353553385 : f32
    %54 = vector.broadcast %cst_22 : f32 to vector<2x8x8xf32>
    %55 = arith.mulf %53, %54 : vector<2x8x8xf32>
    %56 = vector.broadcast %5 : vector<2x1x8xf32> to vector<2x8x8xf32>
    %57 = arith.addf %55, %56 : vector<2x8x8xf32>
    %cst_23 = arith.constant dense<0xFF800000> : vector<2x8xf32>
    %58 = vector.multi_reduction <maximumf>, %57, %cst_23 [2] : vector<2x8x8xf32> to vector<2x8xf32>
    %59 = vector.shape_cast %58 : vector<2x8xf32> to vector<2x8x1xf32>
    %60 = vector.broadcast %59 : vector<2x8x1xf32> to vector<2x8x8xf32>
    %61 = arith.subf %57, %60 : vector<2x8x8xf32>
    %62 = math.exp %61 : vector<2x8x8xf32>
    %cst_24 = arith.constant dense<0.000000e+00> : vector<2x8xf32>
    %63 = vector.multi_reduction <add>, %62, %cst_24 [2] : vector<2x8x8xf32> to vector<2x8xf32>
    %64 = vector.shape_cast %63 : vector<2x8xf32> to vector<2x8x1xf32>
    %65 = tpu.reciprocal %64 {approx = true} : vector<2x8x1xf32> -> vector<2x8x1xf32>
    %66 = vector.broadcast %65 : vector<2x8x1xf32> to vector<2x8x8xf32>
    %67 = arith.mulf %62, %66 : vector<2x8x8xf32>
    %68 = arith.truncf %67 : vector<2x8x8xf32> to vector<2x8x8xbf16>
    %cst_25 = arith.constant dense<0.000000e+00> : vector<2x8x8xf32>
    %69 = tpu.matmul %68, %52, %cst_25 {dimension_numbers = #tpu.dot_dimension_numbers<[2], [1], [1], [2], [0, 0, 0, 1, 1, 2], [0], [0]>} : vector<2x8x8xbf16>, vector<2x8x8xbf16>, vector<2x8x8xf32> -> vector<2x8x8xf32>
    %70 = arith.truncf %69 : vector<2x8x8xf32> to vector<2x8x8xbf16>
    %c0_26 = arith.constant 0 : index
    %c0_27 = arith.constant 0 : index
    %c16 = arith.constant 16 : index
    %71 = vector.load %arg3[%c0_26, %c0_27, %c16] : memref<2x8x32xbf16, #tpu.memory_space<vmem>>, vector<2x8x8xbf16>
    tpu.vector_store %arg3[%c0_26, %c0_27, %c16], %70 {strides = array<i32>} : memref<2x8x32xbf16, #tpu.memory_space<vmem>>, vector<2x8x8xbf16>,
    %72 = vector.extract_strided_slice %0 {offsets = [0, 0, 24], sizes = [2, 8, 8], strides = [1, 1, 1]} : vector<2x8x96xbf16> to vector<2x8x8xbf16>
    %73 = vector.extract_strided_slice %0 {offsets = [0, 0, 56], sizes = [2, 8, 8], strides = [1, 1, 1]} : vector<2x8x96xbf16> to vector<2x8x8xbf16>
    %74 = vector.extract_strided_slice %0 {offsets = [0, 0, 88], sizes = [2, 8, 8], strides = [1, 1, 1]} : vector<2x8x96xbf16> to vector<2x8x8xbf16>
    %cst_28 = arith.constant dense<0.000000e+00> : vector<2x8x8xf32>
    %75 = tpu.matmul %72, %73, %cst_28 {dimension_numbers = #tpu.dot_dimension_numbers<[2], [2], [1], [1], [0, 0, 0, 1, 1, 1], [0], [0]>} : vector<2x8x8xbf16>, vector<2x8x8xbf16>, vector<2x8x8xf32> -> vector<2x8x8xf32>
    %cst_29 = arith.constant 0.353553385 : f32
    %76 = vector.broadcast %cst_29 : f32 to vector<2x8x8xf32>
    %77 = arith.mulf %75, %76 : vector<2x8x8xf32>
    %78 = vector.broadcast %5 : vector<2x1x8xf32> to vector<2x8x8xf32>
    %79 = arith.addf %77, %78 : vector<2x8x8xf32>
    %cst_30 = arith.constant dense<0xFF800000> : vector<2x8xf32>
    %80 = vector.multi_reduction <maximumf>, %79, %cst_30 [2] : vector<2x8x8xf32> to vector<2x8xf32>
    %81 = vector.shape_cast %80 : vector<2x8xf32> to vector<2x8x1xf32>
    %82 = vector.broadcast %81 : vector<2x8x1xf32> to vector<2x8x8xf32>
    %83 = arith.subf %79, %82 : vector<2x8x8xf32>
    %84 = math.exp %83 : vector<2x8x8xf32>
    %cst_31 = arith.constant dense<0.000000e+00> : vector<2x8xf32>
    %85 = vector.multi_reduction <add>, %84, %cst_31 [2] : vector<2x8x8xf32> to vector<2x8xf32>
    %86 = vector.shape_cast %85 : vector<2x8xf32> to vector<2x8x1xf32>
    %87 = tpu.reciprocal %86 {approx = true} : vector<2x8x1xf32> -> vector<2x8x1xf32>
    %88 = vector.broadcast %87 : vector<2x8x1xf32> to vector<2x8x8xf32>
    %89 = arith.mulf %84, %88 : vector<2x8x8xf32>
    %90 = arith.truncf %89 : vector<2x8x8xf32> to vector<2x8x8xbf16>
    %cst_32 = arith.constant dense<0.000000e+00> : vector<2x8x8xf32>
    %91 = tpu.matmul %90, %74, %cst_32 {dimension_numbers = #tpu.dot_dimension_numbers<[2], [1], [1], [2], [0, 0, 0, 1, 1, 2], [0], [0]>} : vector<2x8x8xbf16>, vector<2x8x8xbf16>, vector<2x8x8xf32> -> vector<2x8x8xf32>
    %92 = arith.truncf %91 : vector<2x8x8xf32> to vector<2x8x8xbf16>
    %c0_33 = arith.constant 0 : index
    %c0_34 = arith.constant 0 : index
    %c24 = arith.constant 24 : index
    %93 = vector.load %arg3[%c0_33, %c0_34, %c24] : memref<2x8x32xbf16, #tpu.memory_space<vmem>>, vector<2x8x8xbf16>
    tpu.vector_store %arg3[%c0_33, %c0_34, %c24], %92 {strides = array<i32>} : memref<2x8x32xbf16, #tpu.memory_space<vmem>>, vector<2x8x8xbf16>,
    return
  }
  func.func @transform_0(%arg0: i32) -> (i32, i32, i32) {
    %c0_i32 = arith.constant 0 : i32
    %c0_i32_0 = arith.constant 0 : i32
    %c0_i32_1 = arith.constant 0 : i32
    return %arg0, %c0_i32, %c0_i32_0 : i32, i32, i32
  }
  func.func @transform_1(%arg0: i32) -> (i32, i32, i32) {
    %c0_i32 = arith.constant 0 : i32
    %c0_i32_0 = arith.constant 0 : i32
    %c0_i32_1 = arith.constant 0 : i32
    return %arg0, %c0_i32, %c0_i32_0 : i32, i32, i32
  }
  func.func @transform_2(%arg0: i32) -> (i32, i32, i32) {
    %c0_i32 = arith.constant 0 : i32
    %c0_i32_0 = arith.constant 0 : i32
    %c0_i32_1 = arith.constant 0 : i32
    return %arg0, %c0_i32, %c0_i32_0 : i32, i32, i32
  }
}

module attributes {stable_mosaic.version = 11 : i64} {
  func.func @_dense_ln_kernel(%arg0: i32, %arg1: memref<16x32xbf16, #tpu.memory_space<vmem>>, %arg2: memref<32x32xbf16, #tpu.memory_space<vmem>>, %arg3: memref<1x32xf32, #tpu.memory_space<vmem>>, %arg4: memref<16x32xbf16, #tpu.memory_space<vmem>>, %arg5: memref<1x32xf32, #tpu.memory_space<vmem>>, %arg6: memref<1x32xf32, #tpu.memory_space<vmem>>, %arg7: memref<16x32xbf16, #tpu.memory_space<vmem>>) attributes {dimension_semantics = [#tpu.dimension_semantics<parallel>], iteration_bounds = array<i64: 1>, scalar_prefetch = 0 : i64, scratch_operands = 0 : i64, tpu.core_type = #tpu.core_type<tc>, window_params = [{transform_indices = @transform_0, window_bounds = array<i64: 16, 32>}, {pipeline_mode = #tpu.pipeline_mode<synchronous>, transform_indices = @transform_1, window_bounds = array<i64: 32, 32>}, {pipeline_mode = #tpu.pipeline_mode<synchronous>, transform_indices = @transform_2, window_bounds = array<i64: 1, 32>}, {transform_indices = @transform_3, window_bounds = array<i64: 16, 32>}, {pipeline_mode = #tpu.pipeline_mode<synchronous>, transform_indices = @transform_4, window_bounds = array<i64: 1, 32>}, {pipeline_mode = #tpu.pipeline_mode<synchronous>, transform_indices = @transform_5, window_bounds = array<i64: 1, 32>}, {transform_indices = @transform_6, window_bounds = array<i64: 16, 32>}]} {
    %c0 = arith.constant 0 : index
    %c0_0 = arith.constant 0 : index
    %0 = vector.load %arg1[%c0, %c0_0] : memref<16x32xbf16, #tpu.memory_space<vmem>>, vector<16x32xbf16>
    %c0_1 = arith.constant 0 : index
    %c0_2 = arith.constant 0 : index
    %1 = vector.load %arg2[%c0_1, %c0_2] : memref<32x32xbf16, #tpu.memory_space<vmem>>, vector<32x32xbf16>
    %cst = arith.constant dense<0.000000e+00> : vector<16x32xf32>
    %2 = tpu.matmul %0, %1, %cst {dimension_numbers = #tpu.dot_dimension_numbers<[1], [0], [0], [1], [0, 0, 1, 1], [], []>} : vector<16x32xbf16>, vector<32x32xbf16>, vector<16x32xf32> -> vector<16x32xf32>
    %c0_3 = arith.constant 0 : index
    %c0_4 = arith.constant 0 : index
    %3 = vector.load %arg3[%c0_3, %c0_4] : memref<1x32xf32, #tpu.memory_space<vmem>>, vector<1x32xf32>
    %4 = vector.broadcast %3 : vector<1x32xf32> to vector<16x32xf32>
    %5 = arith.addf %2, %4 : vector<16x32xf32>
    %c0_5 = arith.constant 0 : index
    %c0_6 = arith.constant 0 : index
    %6 = vector.load %arg4[%c0_5, %c0_6] : memref<16x32xbf16, #tpu.memory_space<vmem>>, vector<16x32xbf16>
    %7 = arith.extf %6 : vector<16x32xbf16> to vector<16x32xf32>
    %8 = arith.addf %5, %7 : vector<16x32xf32>
    %cst_7 = arith.constant dense<0.000000e+00> : vector<16xf32>
    %9 = vector.multi_reduction <add>, %8, %cst_7 [1] : vector<16x32xf32> to vector<16xf32>
    %10 = vector.shape_cast %9 : vector<16xf32> to vector<16x1xf32>
    %cst_8 = arith.constant 3.200000e+01 : f32
    %11 = vector.broadcast %cst_8 : f32 to vector<16x1xf32>
    %12 = arith.divf %10, %11 : vector<16x1xf32>
    %13 = vector.broadcast %12 : vector<16x1xf32> to vector<16x32xf32>
    %14 = arith.subf %8, %13 : vector<16x32xf32>
    %15 = arith.mulf %14, %14 : vector<16x32xf32>
    %cst_9 = arith.constant dense<0.000000e+00> : vector<16xf32>
    %16 = vector.multi_reduction <add>, %15, %cst_9 [1] : vector<16x32xf32> to vector<16xf32>
    %17 = vector.shape_cast %16 : vector<16xf32> to vector<16x1xf32>
    %cst_10 = arith.constant 3.200000e+01 : f32
    %18 = vector.broadcast %cst_10 : f32 to vector<16x1xf32>
    %19 = arith.divf %17, %18 : vector<16x1xf32>
    %20 = vector.broadcast %12 : vector<16x1xf32> to vector<16x32xf32>
    %21 = arith.subf %8, %20 : vector<16x32xf32>
    %cst_11 = arith.constant 9.99999974E-6 : f32
    %22 = vector.broadcast %cst_11 : f32 to vector<16x1xf32>
    %23 = arith.addf %19, %22 : vector<16x1xf32>
    %24 = math.rsqrt %23 : vector<16x1xf32>
    %25 = vector.broadcast %24 : vector<16x1xf32> to vector<16x32xf32>
    %26 = arith.mulf %21, %25 : vector<16x32xf32>
    %c0_12 = arith.constant 0 : index
    %c0_13 = arith.constant 0 : index
    %27 = vector.load %arg5[%c0_12, %c0_13] : memref<1x32xf32, #tpu.memory_space<vmem>>, vector<1x32xf32>
    %28 = vector.broadcast %27 : vector<1x32xf32> to vector<16x32xf32>
    %29 = arith.mulf %26, %28 : vector<16x32xf32>
    %c0_14 = arith.constant 0 : index
    %c0_15 = arith.constant 0 : index
    %30 = vector.load %arg6[%c0_14, %c0_15] : memref<1x32xf32, #tpu.memory_space<vmem>>, vector<1x32xf32>
    %31 = vector.broadcast %30 : vector<1x32xf32> to vector<16x32xf32>
    %32 = arith.addf %29, %31 : vector<16x32xf32>
    %33 = arith.truncf %32 : vector<16x32xf32> to vector<16x32xbf16>
    %c0_16 = arith.constant 0 : index
    %c0_17 = arith.constant 0 : index
    %34 = vector.load %arg7[%c0_16, %c0_17] : memref<16x32xbf16, #tpu.memory_space<vmem>>, vector<16x32xbf16>
    tpu.vector_store %arg7[%c0_16, %c0_17], %33 {strides = array<i32>} : memref<16x32xbf16, #tpu.memory_space<vmem>>, vector<16x32xbf16>,
    return
  }
  func.func @transform_0(%arg0: i32) -> (i32, i32) {
    %c0_i32 = arith.constant 0 : i32
    %c0_i32_0 = arith.constant 0 : i32
    return %arg0, %c0_i32 : i32, i32
  }
  func.func @transform_1(%arg0: i32) -> (i32, i32) {
    %c0_i32 = arith.constant 0 : i32
    %c0_i32_0 = arith.constant 0 : i32
    %c0_i32_1 = arith.constant 0 : i32
    return %c0_i32, %c0_i32_0 : i32, i32
  }
  func.func @transform_2(%arg0: i32) -> (i32, i32) {
    %c0_i32 = arith.constant 0 : i32
    %c0_i32_0 = arith.constant 0 : i32
    %c0_i32_1 = arith.constant 0 : i32
    return %c0_i32, %c0_i32_0 : i32, i32
  }
  func.func @transform_3(%arg0: i32) -> (i32, i32) {
    %c0_i32 = arith.constant 0 : i32
    %c0_i32_0 = arith.constant 0 : i32
    return %arg0, %c0_i32 : i32, i32
  }
  func.func @transform_4(%arg0: i32) -> (i32, i32) {
    %c0_i32 = arith.constant 0 : i32
    %c0_i32_0 = arith.constant 0 : i32
    %c0_i32_1 = arith.constant 0 : i32
    return %c0_i32, %c0_i32_0 : i32, i32
  }
  func.func @transform_5(%arg0: i32) -> (i32, i32) {
    %c0_i32 = arith.constant 0 : i32
    %c0_i32_0 = arith.constant 0 : i32
    %c0_i32_1 = arith.constant 0 : i32
    return %c0_i32, %c0_i32_0 : i32, i32
  }
  func.func @transform_6(%arg0: i32) -> (i32, i32) {
    %c0_i32 = arith.constant 0 : i32
    %c0_i32_0 = arith.constant 0 : i32
    return %arg0, %c0_i32 : i32, i32
  }
}

module attributes {stable_mosaic.version = 11 : i64} {
  func.func @_dense_kernel(%arg0: i32, %arg1: i32, %arg2: memref<16x32xbf16, #tpu.memory_space<vmem>>, %arg3: memref<32x128xbf16, #tpu.memory_space<vmem>>, %arg4: memref<1x128xf32, #tpu.memory_space<vmem>>, %arg5: memref<16x128xbf16, #tpu.memory_space<vmem>>) attributes {dimension_semantics = [#tpu.dimension_semantics<parallel>, #tpu.dimension_semantics<parallel>], iteration_bounds = array<i64: 1, 1>, scalar_prefetch = 0 : i64, scratch_operands = 0 : i64, tpu.core_type = #tpu.core_type<tc>, window_params = [{transform_indices = @transform_0, window_bounds = array<i64: 16, 32>}, {transform_indices = @transform_1, window_bounds = array<i64: 32, 128>}, {transform_indices = @transform_2, window_bounds = array<i64: 1, 128>}, {transform_indices = @transform_3, window_bounds = array<i64: 16, 128>}]} {
    %c0 = arith.constant 0 : index
    %c0_0 = arith.constant 0 : index
    %0 = vector.load %arg2[%c0, %c0_0] : memref<16x32xbf16, #tpu.memory_space<vmem>>, vector<16x32xbf16>
    %c0_1 = arith.constant 0 : index
    %c0_2 = arith.constant 0 : index
    %1 = vector.load %arg3[%c0_1, %c0_2] : memref<32x128xbf16, #tpu.memory_space<vmem>>, vector<32x128xbf16>
    %cst = arith.constant dense<0.000000e+00> : vector<16x128xf32>
    %2 = tpu.matmul %0, %1, %cst {dimension_numbers = #tpu.dot_dimension_numbers<[1], [0], [0], [1], [0, 0, 1, 1], [], []>} : vector<16x32xbf16>, vector<32x128xbf16>, vector<16x128xf32> -> vector<16x128xf32>
    %c0_3 = arith.constant 0 : index
    %c0_4 = arith.constant 0 : index
    %3 = vector.load %arg4[%c0_3, %c0_4] : memref<1x128xf32, #tpu.memory_space<vmem>>, vector<1x128xf32>
    %4 = vector.broadcast %3 : vector<1x128xf32> to vector<16x128xf32>
    %5 = arith.addf %2, %4 : vector<16x128xf32>
    %6 = arith.mulf %5, %5 : vector<16x128xf32>
    %7 = arith.mulf %5, %6 : vector<16x128xf32>
    %cst_5 = arith.constant 4.471500e-02 : f32
    %8 = vector.broadcast %cst_5 : f32 to vector<16x128xf32>
    %9 = arith.mulf %8, %7 : vector<16x128xf32>
    %10 = arith.addf %5, %9 : vector<16x128xf32>
    %cst_6 = arith.constant 0.797884583 : f32
    %11 = vector.broadcast %cst_6 : f32 to vector<16x128xf32>
    %12 = arith.mulf %11, %10 : vector<16x128xf32>
    %13 = math.tanh %12 : vector<16x128xf32>
    %cst_7 = arith.constant 1.000000e+00 : f32
    %14 = vector.broadcast %cst_7 : f32 to vector<16x128xf32>
    %15 = arith.addf %14, %13 : vector<16x128xf32>
    %cst_8 = arith.constant 5.000000e-01 : f32
    %16 = vector.broadcast %cst_8 : f32 to vector<16x128xf32>
    %17 = arith.mulf %16, %15 : vector<16x128xf32>
    %18 = arith.mulf %5, %17 : vector<16x128xf32>
    %19 = arith.truncf %18 : vector<16x128xf32> to vector<16x128xbf16>
    %c0_9 = arith.constant 0 : index
    %c0_10 = arith.constant 0 : index
    %20 = vector.load %arg5[%c0_9, %c0_10] : memref<16x128xbf16, #tpu.memory_space<vmem>>, vector<16x128xbf16>
    tpu.vector_store %arg5[%c0_9, %c0_10], %19 {strides = array<i32>} : memref<16x128xbf16, #tpu.memory_space<vmem>>, vector<16x128xbf16>,
    return
  }
  func.func @transform_0(%arg0: i32, %arg1: i32) -> (i32, i32) {
    %c0_i32 = arith.constant 0 : i32
    %c0_i32_0 = arith.constant 0 : i32
    return %arg0, %c0_i32 : i32, i32
  }
  func.func @transform_1(%arg0: i32, %arg1: i32) -> (i32, i32) {
    %c0_i32 = arith.constant 0 : i32
    %c0_i32_0 = arith.constant 0 : i32
    return %c0_i32, %arg1 : i32, i32
  }
  func.func @transform_2(%arg0: i32, %arg1: i32) -> (i32, i32) {
    %c0_i32 = arith.constant 0 : i32
    %c0_i32_0 = arith.constant 0 : i32
    return %c0_i32, %arg1 : i32, i32
  }
  func.func @transform_3(%arg0: i32, %arg1: i32) -> (i32, i32) {
    %c0_i32 = arith.constant 0 : i32
    return %arg0, %arg1 : i32, i32
  }
}

module attributes {stable_mosaic.version = 11 : i64} {
  func.func @_dense_ln_kernel(%arg0: i32, %arg1: memref<16x128xbf16, #tpu.memory_space<vmem>>, %arg2: memref<128x32xbf16, #tpu.memory_space<vmem>>, %arg3: memref<1x32xf32, #tpu.memory_space<vmem>>, %arg4: memref<16x32xbf16, #tpu.memory_space<vmem>>, %arg5: memref<1x32xf32, #tpu.memory_space<vmem>>, %arg6: memref<1x32xf32, #tpu.memory_space<vmem>>, %arg7: memref<16x32xbf16, #tpu.memory_space<vmem>>) attributes {dimension_semantics = [#tpu.dimension_semantics<parallel>], iteration_bounds = array<i64: 1>, scalar_prefetch = 0 : i64, scratch_operands = 0 : i64, tpu.core_type = #tpu.core_type<tc>, window_params = [{transform_indices = @transform_0, window_bounds = array<i64: 16, 128>}, {pipeline_mode = #tpu.pipeline_mode<synchronous>, transform_indices = @transform_1, window_bounds = array<i64: 128, 32>}, {pipeline_mode = #tpu.pipeline_mode<synchronous>, transform_indices = @transform_2, window_bounds = array<i64: 1, 32>}, {transform_indices = @transform_3, window_bounds = array<i64: 16, 32>}, {pipeline_mode = #tpu.pipeline_mode<synchronous>, transform_indices = @transform_4, window_bounds = array<i64: 1, 32>}, {pipeline_mode = #tpu.pipeline_mode<synchronous>, transform_indices = @transform_5, window_bounds = array<i64: 1, 32>}, {transform_indices = @transform_6, window_bounds = array<i64: 16, 32>}]} {
    %c0 = arith.constant 0 : index
    %c0_0 = arith.constant 0 : index
    %0 = vector.load %arg1[%c0, %c0_0] : memref<16x128xbf16, #tpu.memory_space<vmem>>, vector<16x128xbf16>
    %c0_1 = arith.constant 0 : index
    %c0_2 = arith.constant 0 : index
    %1 = vector.load %arg2[%c0_1, %c0_2] : memref<128x32xbf16, #tpu.memory_space<vmem>>, vector<128x32xbf16>
    %cst = arith.constant dense<0.000000e+00> : vector<16x32xf32>
    %2 = tpu.matmul %0, %1, %cst {dimension_numbers = #tpu.dot_dimension_numbers<[1], [0], [0], [1], [0, 0, 1, 1], [], []>} : vector<16x128xbf16>, vector<128x32xbf16>, vector<16x32xf32> -> vector<16x32xf32>
    %c0_3 = arith.constant 0 : index
    %c0_4 = arith.constant 0 : index
    %3 = vector.load %arg3[%c0_3, %c0_4] : memref<1x32xf32, #tpu.memory_space<vmem>>, vector<1x32xf32>
    %4 = vector.broadcast %3 : vector<1x32xf32> to vector<16x32xf32>
    %5 = arith.addf %2, %4 : vector<16x32xf32>
    %c0_5 = arith.constant 0 : index
    %c0_6 = arith.constant 0 : index
    %6 = vector.load %arg4[%c0_5, %c0_6] : memref<16x32xbf16, #tpu.memory_space<vmem>>, vector<16x32xbf16>
    %7 = arith.extf %6 : vector<16x32xbf16> to vector<16x32xf32>
    %8 = arith.addf %5, %7 : vector<16x32xf32>
    %cst_7 = arith.constant dense<0.000000e+00> : vector<16xf32>
    %9 = vector.multi_reduction <add>, %8, %cst_7 [1] : vector<16x32xf32> to vector<16xf32>
    %10 = vector.shape_cast %9 : vector<16xf32> to vector<16x1xf32>
    %cst_8 = arith.constant 3.200000e+01 : f32
    %11 = vector.broadcast %cst_8 : f32 to vector<16x1xf32>
    %12 = arith.divf %10, %11 : vector<16x1xf32>
    %13 = vector.broadcast %12 : vector<16x1xf32> to vector<16x32xf32>
    %14 = arith.subf %8, %13 : vector<16x32xf32>
    %15 = arith.mulf %14, %14 : vector<16x32xf32>
    %cst_9 = arith.constant dense<0.000000e+00> : vector<16xf32>
    %16 = vector.multi_reduction <add>, %15, %cst_9 [1] : vector<16x32xf32> to vector<16xf32>
    %17 = vector.shape_cast %16 : vector<16xf32> to vector<16x1xf32>
    %cst_10 = arith.constant 3.200000e+01 : f32
    %18 = vector.broadcast %cst_10 : f32 to vector<16x1xf32>
    %19 = arith.divf %17, %18 : vector<16x1xf32>
    %20 = vector.broadcast %12 : vector<16x1xf32> to vector<16x32xf32>
    %21 = arith.subf %8, %20 : vector<16x32xf32>
    %cst_11 = arith.constant 9.99999974E-6 : f32
    %22 = vector.broadcast %cst_11 : f32 to vector<16x1xf32>
    %23 = arith.addf %19, %22 : vector<16x1xf32>
    %24 = math.rsqrt %23 : vector<16x1xf32>
    %25 = vector.broadcast %24 : vector<16x1xf32> to vector<16x32xf32>
    %26 = arith.mulf %21, %25 : vector<16x32xf32>
    %c0_12 = arith.constant 0 : index
    %c0_13 = arith.constant 0 : index
    %27 = vector.load %arg5[%c0_12, %c0_13] : memref<1x32xf32, #tpu.memory_space<vmem>>, vector<1x32xf32>
    %28 = vector.broadcast %27 : vector<1x32xf32> to vector<16x32xf32>
    %29 = arith.mulf %26, %28 : vector<16x32xf32>
    %c0_14 = arith.constant 0 : index
    %c0_15 = arith.constant 0 : index
    %30 = vector.load %arg6[%c0_14, %c0_15] : memref<1x32xf32, #tpu.memory_space<vmem>>, vector<1x32xf32>
    %31 = vector.broadcast %30 : vector<1x32xf32> to vector<16x32xf32>
    %32 = arith.addf %29, %31 : vector<16x32xf32>
    %33 = arith.truncf %32 : vector<16x32xf32> to vector<16x32xbf16>
    %c0_16 = arith.constant 0 : index
    %c0_17 = arith.constant 0 : index
    %34 = vector.load %arg7[%c0_16, %c0_17] : memref<16x32xbf16, #tpu.memory_space<vmem>>, vector<16x32xbf16>
    tpu.vector_store %arg7[%c0_16, %c0_17], %33 {strides = array<i32>} : memref<16x32xbf16, #tpu.memory_space<vmem>>, vector<16x32xbf16>,
    return
  }
  func.func @transform_0(%arg0: i32) -> (i32, i32) {
    %c0_i32 = arith.constant 0 : i32
    %c0_i32_0 = arith.constant 0 : i32
    return %arg0, %c0_i32 : i32, i32
  }
  func.func @transform_1(%arg0: i32) -> (i32, i32) {
    %c0_i32 = arith.constant 0 : i32
    %c0_i32_0 = arith.constant 0 : i32
    %c0_i32_1 = arith.constant 0 : i32
    return %c0_i32, %c0_i32_0 : i32, i32
  }
  func.func @transform_2(%arg0: i32) -> (i32, i32) {
    %c0_i32 = arith.constant 0 : i32
    %c0_i32_0 = arith.constant 0 : i32
    %c0_i32_1 = arith.constant 0 : i32
    return %c0_i32, %c0_i32_0 : i32, i32
  }
  func.func @transform_3(%arg0: i32) -> (i32, i32) {
    %c0_i32 = arith.constant 0 : i32
    %c0_i32_0 = arith.constant 0 : i32
    return %arg0, %c0_i32 : i32, i32
  }
  func.func @transform_4(%arg0: i32) -> (i32, i32) {
    %c0_i32 = arith.constant 0 : i32
    %c0_i32_0 = arith.constant 0 : i32
    %c0_i32_1 = arith.constant 0 : i32
    return %c0_i32, %c0_i32_0 : i32, i32
  }
  func.func @transform_5(%arg0: i32) -> (i32, i32) {
    %c0_i32 = arith.constant 0 : i32
    %c0_i32_0 = arith.constant 0 : i32
    %c0_i32_1 = arith.constant 0 : i32
    return %c0_i32, %c0_i32_0 : i32, i32
  }
  func.func @transform_6(%arg0: i32) -> (i32, i32) {
    %c0_i32 = arith.constant 0 : i32
    %c0_i32_0 = arith.constant 0 : i32
    return %arg0, %c0_i32 : i32, i32
  }
}

module attributes {stable_mosaic.version = 11 : i64} {
  func.func @_dense_kernel(%arg0: i32, %arg1: i32, %arg2: memref<16x12xbf16, #tpu.memory_space<vmem>>, %arg3: memref<12x128xbf16, #tpu.memory_space<vmem>>, %arg4: memref<1x128xf32, #tpu.memory_space<vmem>>, %arg5: memref<16x128xf32, #tpu.memory_space<vmem>>) attributes {dimension_semantics = [#tpu.dimension_semantics<parallel>, #tpu.dimension_semantics<parallel>], iteration_bounds = array<i64: 1, 1>, scalar_prefetch = 0 : i64, scratch_operands = 0 : i64, tpu.core_type = #tpu.core_type<tc>, window_params = [{transform_indices = @transform_0, window_bounds = array<i64: 16, 12>}, {transform_indices = @transform_1, window_bounds = array<i64: 12, 128>}, {transform_indices = @transform_2, window_bounds = array<i64: 1, 128>}, {transform_indices = @transform_3, window_bounds = array<i64: 16, 128>}]} {
    %c0 = arith.constant 0 : index
    %c0_0 = arith.constant 0 : index
    %0 = vector.load %arg2[%c0, %c0_0] : memref<16x12xbf16, #tpu.memory_space<vmem>>, vector<16x12xbf16>
    %c0_1 = arith.constant 0 : index
    %c0_2 = arith.constant 0 : index
    %1 = vector.load %arg3[%c0_1, %c0_2] : memref<12x128xbf16, #tpu.memory_space<vmem>>, vector<12x128xbf16>
    %cst = arith.constant dense<0.000000e+00> : vector<16x128xf32>
    %2 = tpu.matmul %0, %1, %cst {dimension_numbers = #tpu.dot_dimension_numbers<[1], [0], [0], [1], [0, 0, 1, 1], [], []>} : vector<16x12xbf16>, vector<12x128xbf16>, vector<16x128xf32> -> vector<16x128xf32>
    %c0_3 = arith.constant 0 : index
    %c0_4 = arith.constant 0 : index
    %3 = vector.load %arg4[%c0_3, %c0_4] : memref<1x128xf32, #tpu.memory_space<vmem>>, vector<1x128xf32>
    %4 = vector.broadcast %3 : vector<1x128xf32> to vector<16x128xf32>
    %5 = arith.addf %2, %4 : vector<16x128xf32>
    %c0_5 = arith.constant 0 : index
    %c0_6 = arith.constant 0 : index
    %6 = vector.load %arg5[%c0_5, %c0_6] : memref<16x128xf32, #tpu.memory_space<vmem>>, vector<16x128xf32>
    tpu.vector_store %arg5[%c0_5, %c0_6], %5 {strides = array<i32>} : memref<16x128xf32, #tpu.memory_space<vmem>>, vector<16x128xf32>,
    return
  }
  func.func @transform_0(%arg0: i32, %arg1: i32) -> (i32, i32) {
    %c0_i32 = arith.constant 0 : i32
    %c0_i32_0 = arith.constant 0 : i32
    return %arg1, %c0_i32 : i32, i32
  }
  func.func @transform_1(%arg0: i32, %arg1: i32) -> (i32, i32) {
    %c0_i32 = arith.constant 0 : i32
    %c0_i32_0 = arith.constant 0 : i32
    return %c0_i32, %arg0 : i32, i32
  }
  func.func @transform_2(%arg0: i32, %arg1: i32) -> (i32, i32) {
    %c0_i32 = arith.constant 0 : i32
    %c0_i32_0 = arith.constant 0 : i32
    return %c0_i32, %arg0 : i32, i32
  }
  func.func @transform_3(%arg0: i32, %arg1: i32) -> (i32, i32) {
    %c0_i32 = arith.constant 0 : i32
    return %arg1, %arg0 : i32, i32
  }
}

module attributes {stable_mosaic.version = 11 : i64} {
  func.func @_dense_kernel(%arg0: i32, %arg1: i32, %arg2: memref<16x24xbf16, #tpu.memory_space<vmem>>, %arg3: memref<24x12xbf16, #tpu.memory_space<vmem>>, %arg4: memref<1x12xf32, #tpu.memory_space<vmem>>, %arg5: memref<16x12xbf16, #tpu.memory_space<vmem>>) attributes {dimension_semantics = [#tpu.dimension_semantics<parallel>, #tpu.dimension_semantics<parallel>], iteration_bounds = array<i64: 1, 1>, scalar_prefetch = 0 : i64, scratch_operands = 0 : i64, tpu.core_type = #tpu.core_type<tc>, window_params = [{transform_indices = @transform_0, window_bounds = array<i64: 16, 24>}, {transform_indices = @transform_1, window_bounds = array<i64: 24, 12>}, {transform_indices = @transform_2, window_bounds = array<i64: 1, 12>}, {transform_indices = @transform_3, window_bounds = array<i64: 16, 12>}]} {
    %c0 = arith.constant 0 : index
    %c0_0 = arith.constant 0 : index
    %0 = vector.load %arg2[%c0, %c0_0] : memref<16x24xbf16, #tpu.memory_space<vmem>>, vector<16x24xbf16>
    %c0_1 = arith.constant 0 : index
    %c0_2 = arith.constant 0 : index
    %1 = vector.load %arg3[%c0_1, %c0_2] : memref<24x12xbf16, #tpu.memory_space<vmem>>, vector<24x12xbf16>
    %cst = arith.constant dense<0.000000e+00> : vector<16x12xf32>
    %2 = tpu.matmul %0, %1, %cst {dimension_numbers = #tpu.dot_dimension_numbers<[1], [0], [0], [1], [0, 0, 1, 1], [], []>} : vector<16x24xbf16>, vector<24x12xbf16>, vector<16x12xf32> -> vector<16x12xf32>
    %c0_3 = arith.constant 0 : index
    %c0_4 = arith.constant 0 : index
    %3 = vector.load %arg4[%c0_3, %c0_4] : memref<1x12xf32, #tpu.memory_space<vmem>>, vector<1x12xf32>
    %4 = vector.broadcast %3 : vector<1x12xf32> to vector<16x12xf32>
    %5 = arith.addf %2, %4 : vector<16x12xf32>
    %6 = arith.mulf %5, %5 : vector<16x12xf32>
    %7 = arith.mulf %5, %6 : vector<16x12xf32>
    %cst_5 = arith.constant 4.471500e-02 : f32
    %8 = vector.broadcast %cst_5 : f32 to vector<16x12xf32>
    %9 = arith.mulf %8, %7 : vector<16x12xf32>
    %10 = arith.addf %5, %9 : vector<16x12xf32>
    %cst_6 = arith.constant 0.797884583 : f32
    %11 = vector.broadcast %cst_6 : f32 to vector<16x12xf32>
    %12 = arith.mulf %11, %10 : vector<16x12xf32>
    %13 = math.tanh %12 : vector<16x12xf32>
    %cst_7 = arith.constant 1.000000e+00 : f32
    %14 = vector.broadcast %cst_7 : f32 to vector<16x12xf32>
    %15 = arith.addf %14, %13 : vector<16x12xf32>
    %cst_8 = arith.constant 5.000000e-01 : f32
    %16 = vector.broadcast %cst_8 : f32 to vector<16x12xf32>
    %17 = arith.mulf %16, %15 : vector<16x12xf32>
    %18 = arith.mulf %5, %17 : vector<16x12xf32>
    %19 = arith.truncf %18 : vector<16x12xf32> to vector<16x12xbf16>
    %c0_9 = arith.constant 0 : index
    %c0_10 = arith.constant 0 : index
    %20 = vector.load %arg5[%c0_9, %c0_10] : memref<16x12xbf16, #tpu.memory_space<vmem>>, vector<16x12xbf16>
    tpu.vector_store %arg5[%c0_9, %c0_10], %19 {strides = array<i32>} : memref<16x12xbf16, #tpu.memory_space<vmem>>, vector<16x12xbf16>,
    return
  }
  func.func @transform_0(%arg0: i32, %arg1: i32) -> (i32, i32) {
    %c0_i32 = arith.constant 0 : i32
    %c0_i32_0 = arith.constant 0 : i32
    return %arg0, %c0_i32 : i32, i32
  }
  func.func @transform_1(%arg0: i32, %arg1: i32) -> (i32, i32) {
    %c0_i32 = arith.constant 0 : i32
    %c0_i32_0 = arith.constant 0 : i32
    return %c0_i32, %arg1 : i32, i32
  }
  func.func @transform_2(%arg0: i32, %arg1: i32) -> (i32, i32) {
    %c0_i32 = arith.constant 0 : i32
    %c0_i32_0 = arith.constant 0 : i32
    return %c0_i32, %arg1 : i32, i32
  }
  func.func @transform_3(%arg0: i32, %arg1: i32) -> (i32, i32) {
    %c0_i32 = arith.constant 0 : i32
    return %arg0, %arg1 : i32, i32
  }
}

module attributes {stable_mosaic.version = 11 : i64} {
  func.func @_mlp_first_kernel(%arg0: i32, %arg1: memref<16x32xbf16, #tpu.memory_space<vmem>>, %arg2: memref<16x16xbf16, #tpu.memory_space<vmem>>, %arg3: memref<16x1xbf16, #tpu.memory_space<vmem>>, %arg4: memref<32x24xbf16, #tpu.memory_space<vmem>>, %arg5: memref<16x24xbf16, #tpu.memory_space<vmem>>, %arg6: memref<1x24xf32, #tpu.memory_space<vmem>>, %arg7: memref<16x24xbf16, #tpu.memory_space<vmem>>) attributes {dimension_semantics = [#tpu.dimension_semantics<parallel>], iteration_bounds = array<i64: 1>, scalar_prefetch = 0 : i64, scratch_operands = 0 : i64, tpu.core_type = #tpu.core_type<tc>, window_params = [{transform_indices = @transform_0, window_bounds = array<i64: 16, 32>}, {transform_indices = @transform_1, window_bounds = array<i64: 16, 16>}, {transform_indices = @transform_2, window_bounds = array<i64: 16, 1>}, {pipeline_mode = #tpu.pipeline_mode<synchronous>, transform_indices = @transform_3, window_bounds = array<i64: 32, 24>}, {pipeline_mode = #tpu.pipeline_mode<synchronous>, transform_indices = @transform_4, window_bounds = array<i64: 16, 24>}, {pipeline_mode = #tpu.pipeline_mode<synchronous>, transform_indices = @transform_5, window_bounds = array<i64: 1, 24>}, {transform_indices = @transform_6, window_bounds = array<i64: 16, 24>}]} {
    %c0 = arith.constant 0 : index
    %c0_0 = arith.constant 0 : index
    %0 = vector.load %arg1[%c0, %c0_0] : memref<16x32xbf16, #tpu.memory_space<vmem>>, vector<16x32xbf16>
    %c0_1 = arith.constant 0 : index
    %c0_2 = arith.constant 0 : index
    %1 = vector.load %arg4[%c0_1, %c0_2] : memref<32x24xbf16, #tpu.memory_space<vmem>>, vector<32x24xbf16>
    %cst = arith.constant dense<0.000000e+00> : vector<16x24xf32>
    %2 = tpu.matmul %0, %1, %cst {dimension_numbers = #tpu.dot_dimension_numbers<[1], [0], [0], [1], [0, 0, 1, 1], [], []>} : vector<16x32xbf16>, vector<32x24xbf16>, vector<16x24xf32> -> vector<16x24xf32>
    %c0_3 = arith.constant 0 : index
    %c0_4 = arith.constant 0 : index
    %3 = vector.load %arg2[%c0_3, %c0_4] : memref<16x16xbf16, #tpu.memory_space<vmem>>, vector<16x16xbf16>
    %c0_5 = arith.constant 0 : index
    %c0_6 = arith.constant 0 : index
    %4 = vector.load %arg3[%c0_5, %c0_6] : memref<16x1xbf16, #tpu.memory_space<vmem>>, vector<16x1xbf16>
    %5 = vector.broadcast %4 : vector<16x1xbf16> to vector<16x16xbf16>
    %6 = arith.mulf %3, %5 : vector<16x16xbf16>
    %c0_7 = arith.constant 0 : index
    %c0_8 = arith.constant 0 : index
    %7 = vector.load %arg5[%c0_7, %c0_8] : memref<16x24xbf16, #tpu.memory_space<vmem>>, vector<16x24xbf16>
    %cst_9 = arith.constant dense<0.000000e+00> : vector<16x24xf32>
    %8 = tpu.matmul %6, %7, %cst_9 {dimension_numbers = #tpu.dot_dimension_numbers<[1], [0], [0], [1], [0, 0, 1, 1], [], []>} : vector<16x16xbf16>, vector<16x24xbf16>, vector<16x24xf32> -> vector<16x24xf32>
    %9 = arith.addf %2, %8 : vector<16x24xf32>
    %c0_10 = arith.constant 0 : index
    %c0_11 = arith.constant 0 : index
    %10 = vector.load %arg6[%c0_10, %c0_11] : memref<1x24xf32, #tpu.memory_space<vmem>>, vector<1x24xf32>
    %11 = vector.broadcast %10 : vector<1x24xf32> to vector<16x24xf32>
    %12 = arith.addf %9, %11 : vector<16x24xf32>
    %13 = arith.mulf %12, %12 : vector<16x24xf32>
    %14 = arith.mulf %12, %13 : vector<16x24xf32>
    %cst_12 = arith.constant 4.471500e-02 : f32
    %15 = vector.broadcast %cst_12 : f32 to vector<16x24xf32>
    %16 = arith.mulf %15, %14 : vector<16x24xf32>
    %17 = arith.addf %12, %16 : vector<16x24xf32>
    %cst_13 = arith.constant 0.797884583 : f32
    %18 = vector.broadcast %cst_13 : f32 to vector<16x24xf32>
    %19 = arith.mulf %18, %17 : vector<16x24xf32>
    %20 = math.tanh %19 : vector<16x24xf32>
    %cst_14 = arith.constant 1.000000e+00 : f32
    %21 = vector.broadcast %cst_14 : f32 to vector<16x24xf32>
    %22 = arith.addf %21, %20 : vector<16x24xf32>
    %cst_15 = arith.constant 5.000000e-01 : f32
    %23 = vector.broadcast %cst_15 : f32 to vector<16x24xf32>
    %24 = arith.mulf %23, %22 : vector<16x24xf32>
    %25 = arith.mulf %12, %24 : vector<16x24xf32>
    %26 = arith.truncf %25 : vector<16x24xf32> to vector<16x24xbf16>
    %c0_16 = arith.constant 0 : index
    %c0_17 = arith.constant 0 : index
    %27 = vector.load %arg7[%c0_16, %c0_17] : memref<16x24xbf16, #tpu.memory_space<vmem>>, vector<16x24xbf16>
    tpu.vector_store %arg7[%c0_16, %c0_17], %26 {strides = array<i32>} : memref<16x24xbf16, #tpu.memory_space<vmem>>, vector<16x24xbf16>,
    return
  }
  func.func @transform_0(%arg0: i32) -> (i32, i32) {
    %c0_i32 = arith.constant 0 : i32
    %c0_i32_0 = arith.constant 0 : i32
    return %arg0, %c0_i32 : i32, i32
  }
  func.func @transform_1(%arg0: i32) -> (i32, i32) {
    %c0_i32 = arith.constant 0 : i32
    %c0_i32_0 = arith.constant 0 : i32
    return %arg0, %c0_i32 : i32, i32
  }
  func.func @transform_2(%arg0: i32) -> (i32, i32) {
    %c0_i32 = arith.constant 0 : i32
    %c0_i32_0 = arith.constant 0 : i32
    return %arg0, %c0_i32 : i32, i32
  }
  func.func @transform_3(%arg0: i32) -> (i32, i32) {
    %c0_i32 = arith.constant 0 : i32
    %c0_i32_0 = arith.constant 0 : i32
    %c0_i32_1 = arith.constant 0 : i32
    return %c0_i32, %c0_i32_0 : i32, i32
  }
  func.func @transform_4(%arg0: i32) -> (i32, i32) {
    %c0_i32 = arith.constant 0 : i32
    %c0_i32_0 = arith.constant 0 : i32
    %c0_i32_1 = arith.constant 0 : i32
    return %c0_i32, %c0_i32_0 : i32, i32
  }
  func.func @transform_5(%arg0: i32) -> (i32, i32) {
    %c0_i32 = arith.constant 0 : i32
    %c0_i32_0 = arith.constant 0 : i32
    %c0_i32_1 = arith.constant 0 : i32
    return %c0_i32, %c0_i32_0 : i32, i32
  }
  func.func @transform_6(%arg0: i32) -> (i32, i32) {
    %c0_i32 = arith.constant 0 : i32
    %c0_i32_0 = arith.constant 0 : i32
    return %arg0, %c0_i32 : i32, i32
  }
}

</mosaic_0001>

<bundles_post_ra>
// kernel: _lambda_.15
= control target key start
LH: loop header
LB: loop body
LE: loop exit
PB: predicated region body
PF: predicated region fallthrough
CT: control target
= control target key end

     0   :  { %8 = vsyncpa [#allocation3], 0  ;;  %s376_s0 = inlined_call_operand.hbm [shape: bf16[16,32], index: 0, kind: input, shape index: {}]   ;;  %s377_s1 = inlined_call_operand.hbm [shape: bf16[32,96], index: 1, kind: input, shape index: {}]   ;;  %s378_s2 = inlined_call_operand.hbm [shape: f32[1,96], index: 2, kind: input, shape index: {}]   ;;  %s379_s3 = inlined_call_operand.hbm [shape: bf16[16,96], index: 3, kind: output, shape index: {}]  }
   0x1   :  { %9 = vsyncpa [#allocation6], 0 }
   0x2   :  { %10 = vsyncpa [#allocation4], 0  ;;  %s284_s12 = smov [#allocation5]   ;;  %s285_s14 = smov [#allocation2]  }
   0x3   :  { %s28_s13 = sshll.u32 %s284_s12, 4  ;;  %s16_s15 = sshll.u32 %s285_s14, 4  ;;  %s29_s13 = int_to_ptr.vmem [resolvable:$true] %s28_s13  ;;  %s312_s15 = int_to_ptr.vmem [resolvable:$true] %s16_s15 }
   0x4   :  { %s190_s18 = scalar_lea.hbm %s377_s1, 256 }
   0x5   :  { %p191_p0 = scmp.ne.s32.totalorder %s377_s1, %s190_s18  ;;  %p194_p1 = scmp.lt.u32.totalorder %s190_s18, %s377_s1 }
   0x7   :  { %p196_p2 = pnand %p194_p1, %p191_p0 }
   0x9   :  { %199 = shalt.err (!%p196_p2)
}
   0xa   :  { %s200_s23 = scalar_lea.vmem %s29_s13, 256  ;;  %p205_p4 = scmp.lt.s32.totalorder %s29_s13, %s29_s13 }
   0xb   :  { %p201_p3 = scmp.ne.s32.totalorder %s29_s13, %s200_s23  ;;  %p206_p5 = scmp.lt.s32.totalorder %s200_s23, %s200_s23 }
   0xd   :  { %p207_p6 = por %p206_p5, %p205_p4 }
   0xf   :  { %p208_p7 = pnand %p207_p6, %p201_p3 }
  0x11   :  { %211 = shalt.err (!%p208_p7)
}
  0x12   :  { %s286_s24 = smov 64   ;;  %s287_s25 = smov 4  }
  0x13   :  { %34 = dma.hbm_to_vmem [thread:$0]  %s377_s1, 256, %s29_s13, [#allocation6], %s286_s24, %s286_s24, %s287_s25  }
  0x14   :  { %s212_s30 = scalar_lea.hbm %s376_s0, 128 }
  0x15   :  { %p213_p8 = scmp.ne.s32.totalorder %s376_s0, %s212_s30  ;;  %p216_p9 = scmp.lt.u32.totalorder %s212_s30, %s376_s0 }
  0x17   :  { %p218_p10 = pnand %p216_p9, %p213_p8 }
  0x19   :  { %221 = shalt.err (!%p218_p10)
}
  0x1a   :  { %s222_s8 = scalar_lea.vmem %s312_s15, 128  ;;  %p227_p12 = scmp.lt.s32.totalorder %s312_s15, %s312_s15 }
  0x1b   :  { %p223_p11 = scmp.ne.s32.totalorder %s312_s15, %s222_s8  ;;  %p228_p13 = scmp.lt.s32.totalorder %s222_s8, %s222_s8 }
  0x1d   :  { %p229_p0 = por %p228_p13, %p227_p12 }
  0x1f   :  { %p230_p1 = pnand %p229_p0, %p223_p11 }
  0x21   :  { %233 = shalt.err (!%p230_p1)
}
  0x22   :  { %22 = dma.hbm_to_vmem [thread:$0]  %s376_s0, 128, %s312_s15, [#allocation3], %s286_s24, %s286_s24, %s287_s25  }
  0x23   :  { %s288_s10 = smov [#allocation7]   ;;  %s234_s14 = scalar_lea.hbm %s378_s2, 16 }
  0x24   :  { %s41_s11 = sshll.u32 %s288_s10, 4  ;;  %p235_p2 = scmp.ne.s32.totalorder %s378_s2, %s234_s14  ;;  %s42_s11 = int_to_ptr.vmem [resolvable:$true] %s41_s11 }
  0x25   :  { %p238_p3 = scmp.lt.u32.totalorder %s234_s14, %s378_s2 }
  0x27   :  { %p240_p4 = pnand %p238_p3, %p235_p2 }
  0x29   :  { %243 = shalt.err (!%p240_p4)
}
  0x2a   :  { %s244_s20 = scalar_lea.vmem %s42_s11, 16  ;;  %s248_s0 = scalar_lea.vmem %s42_s11, 32 }
  0x2b   :  { %p245_p5 = scmp.ne.s32.totalorder %s42_s11, %s244_s20  ;;  %p249_p6 = scmp.lt.s32.totalorder %s42_s11, %s42_s11 }
  0x2c   :  { %p250_p7 = scmp.lt.s32.totalorder %s248_s0, %s244_s20 }
  0x2e   :  { %p251_p8 = por %p250_p7, %p249_p6 }
  0x30   :  { %p252_p9 = pnand %p251_p8, %p245_p5 }
  0x32   :  { %255 = shalt.err (!%p252_p9)
}
  0x33   :  { %44 = dma.hbm_to_vmem [thread:$0]  %s378_s2, 16, %s42_s11, [#allocation6]  }
  0x34   :  { %278 = dma.done.wait [#allocation3], 128  }
  0x35   :  { %279 = vsyncadd [#allocation3], 4294967168 }
  0x36   :  { %280 = dma.done.wait [#allocation6], 272  }
  0x37   :  { %281 = vsyncadd [#allocation6], 4294967024  ;;  %v289_v0 = vmov 0.0   ;;  %vm290_vm0 = vmmov 0   ;;  %v187_v1 = vld [vmem:[#allocation5] sm:$0xff]   ;;  %v188_v2 = vld [vmem:[#allocation5 + $0x8] sm:$0xff]  }
  0x38   :  { %171 = vmatprep.subr.bf16.mxu0 %v289_v0  ;;  %175 = vmatprep.mubr.msk.bf16.mxu0 %vm290_vm0, %v289_v0  ;;  %v189_v3 = vld [vmem:[#allocation2] sm:$0xff]   ;;  %vm85_vm1 = vcmask 261120   ;;  %v159_v4 = vld [vmem:[#allocation7] ss:$0 sm:$0xff]  ;;  %vm138_vm2 = vcmask 781312   ;;  %s291_s2 = smov [#allocation8]  }
  0x39   :  { %172 = vmatpush3.bf16.msra.mxu0 %v187_v1  ;;  %s146_s22 = sshll.u32 %s291_s2, 4  ;;  %s147_s22 = int_to_ptr.vmem [resolvable:$true] %s146_s22 }
  0x3a   :  { %173 = vmatprep.subr.bf16.mxu0 %v289_v0  ;;  %s256_s23 = scalar_lea.vmem %s147_s22, 128  ;;  %p261_p11 = scmp.lt.s32.totalorder %s147_s22, %s147_s22 }
  0x3b   :  { %p257_p10 = scmp.ne.s32.totalorder %s147_s22, %s256_s23  ;;  %p262_p12 = scmp.lt.s32.totalorder %s256_s23, %s256_s23 }
  0x3d   :  { %174 = vmatpush3.bf16.msra.mxu0 %v188_v2  ;;  %p263_p13 = por %p262_p12, %p261_p11 }
  0x3f   :  { %p264_p0 = pnand %p263_p13, %p257_p10 }
  0x40   :  { %176 = vmatmul.mubr.msk.bf16.vlgmr.msra.gmra.mrb[0].mxu0 %vm85_vm1, %v189_v3 }
 0x113   :  { %v123_v5 = vpop.f32.mrb[0].mxu0 }
 0x114   :  { %v124_v6 = vadd.f32 %v159_v4, %v123_v5  ;;  %v177_v7 = vpop.f32.mrb[1].mxu0 }
 0x115   :  { %v126_v8 = vpop.f32.mrb[2].mxu0 }
 0x116   :  { %v166_v9 = vpack.c.bf16 %v124_v6, %v124_v6  ;;  %v127_v10 = vadd.f32 %v159_v4, %v126_v8  ;;  %v178_v11 = vpop.f32.mrb[3].mxu0 }
 0x118   :  { %v167_v12 = vpack.c.bf16 %v127_v10, %v127_v10  ;;  %139 = vst.msk [vmem:[#allocation8] sm:$0xf] %vm138_vm2, %v166_v9 }
 0x11a   :  { %140 = vst.msk [vmem:[#allocation8 + $0x4] sm:$0xf] %vm138_vm2, %v167_v12 }
 0x11b   :  { %267 = shalt.err (!%p264_p0)
}
 0x11c   :  { %s268_s28 = scalar_lea.hbm %s379_s3, 128 }
 0x11d   :  { %p269_p1 = scmp.ne.s32.totalorder %s379_s3, %s268_s28  ;;  %p272_p2 = scmp.lt.u32.totalorder %s268_s28, %s379_s3 }
 0x11f   :  { %p274_p3 = pnand %p272_p2, %p269_p1 }
 0x121   :  { %277 = shalt.err (!%p274_p3)
}
 0x122   :  { %152 = dma.vmem_to_hbm [thread:$0]  %s147_s22, 128, %s379_s3, [#allocation4], %s286_s24, %s286_s24, %s287_s25  }
 0x123   :  { %282 = dma.done.wait [#allocation4], 128  }
 0x124   :  { %283 = vsyncadd [#allocation4], 4294967168 }
 0x125   :  { %156 = vsyncpa [#allocation3], 1 }
 0x126   :  { %157 = vsyncpa [#allocation6], 1 }
 0x127   :  { %158 = vsyncpa [#allocation4], 1 }

// kernel: _lambda_.14
= control target key start
LH: loop header
LB: loop body
LE: loop exit
PB: predicated region body
PF: predicated region fallthrough
CT: control target
= control target key end

     0   :  { %9 = vsyncpa [#allocation3], 0  ;;  %s380_s0 = inlined_call_operand.hbm [shape: f32[2,8,32], index: 0, kind: input, shape index: {}]   ;;  %s381_s1 = inlined_call_operand.hbm [shape: f32[8,32], index: 1, kind: input, shape index: {}]   ;;  %s382_s2 = inlined_call_operand.hbm [shape: f32[1,1,32], index: 2, kind: input, shape index: {}]   ;;  %s383_s3 = inlined_call_operand.hbm [shape: f32[1,1,32], index: 3, kind: input, shape index: {}]   ;;  %s384_s4 = inlined_call_operand.hbm [shape: bf16[2,8,32], index: 4, kind: output, shape index: {}]  }
   0x1   :  { %10 = vsyncpa [#allocation6], 0 }
   0x2   :  { %11 = vsyncpa [#allocation9], 0 }
   0x3   :  { %12 = vsyncpa [#allocation4], 0  ;;  %s275_s15 = smov [#allocation5]   ;;  %s276_s17 = smov [#allocation2]  }
   0x4   :  { %s31_s16 = sshll.u32 %s275_s15, 4  ;;  %s18_s18 = sshll.u32 %s276_s17, 4  ;;  %s32_s16 = int_to_ptr.vmem [resolvable:$true] %s31_s16  ;;  %s309_s18 = int_to_ptr.vmem [resolvable:$true] %s18_s18 }
   0x5   :  { %s157_s21 = scalar_lea.hbm %s381_s1, 128 }
   0x6   :  { %p158_p0 = scmp.ne.s32.totalorder %s381_s1, %s157_s21  ;;  %p161_p1 = scmp.lt.u32.totalorder %s157_s21, %s381_s1 }
   0x8   :  { %p163_p2 = pnand %p161_p1, %p158_p0 }
   0xa   :  { %166 = shalt.err (!%p163_p2)
}
   0xb   :  { %s167_s26 = scalar_lea.vmem %s32_s16, 128  ;;  %p172_p4 = scmp.lt.s32.totalorder %s32_s16, %s32_s16 }
   0xc   :  { %p168_p3 = scmp.ne.s32.totalorder %s32_s16, %s167_s26  ;;  %p173_p5 = scmp.lt.s32.totalorder %s167_s26, %s167_s26 }
   0xe   :  { %p174_p6 = por %p173_p5, %p172_p4 }
  0x10   :  { %p175_p7 = pnand %p174_p6, %p168_p3 }
  0x12   :  { %178 = shalt.err (!%p175_p7)
}
  0x13   :  { %34 = dma.hbm_to_vmem [thread:$0]  %s381_s1, 128, %s32_s16, [#allocation6]  }
  0x14   :  { %s179_s5 = scalar_lea.hbm %s380_s0, 256 }
  0x15   :  { %p180_p8 = scmp.ne.s32.totalorder %s380_s0, %s179_s5  ;;  %p183_p9 = scmp.lt.u32.totalorder %s179_s5, %s380_s0 }
  0x17   :  { %p185_p10 = pnand %p183_p9, %p180_p8 }
  0x19   :  { %188 = shalt.err (!%p185_p10)
}
  0x1a   :  { %s189_s10 = scalar_lea.vmem %s309_s18, 256  ;;  %p194_p12 = scmp.lt.s32.totalorder %s309_s18, %s309_s18 }
  0x1b   :  { %p190_p11 = scmp.ne.s32.totalorder %s309_s18, %s189_s10  ;;  %p195_p13 = scmp.lt.s32.totalorder %s189_s10, %s189_s10 }
  0x1d   :  { %p196_p0 = por %p195_p13, %p194_p12 }
  0x1f   :  { %p197_p1 = pnand %p196_p0, %p190_p11 }
  0x21   :  { %200 = shalt.err (!%p197_p1)
}
  0x22   :  { %s277_s1 = smov 128   ;;  %s278_s11 = smov 8  }
  0x23   :  { %24 = dma.hbm_to_vmem [thread:$0]  %s380_s0, 256, %s309_s18, [#allocation3], %s277_s1, %s277_s1, %s278_s11  }
  0x24   :  { %s279_s14 = smov [#allocation7]   ;;  %s280_s16 = smov [#allocation8]  }
  0x25   :  { %s41_s15 = sshll.u32 %s279_s14, 4  ;;  %s51_s17 = sshll.u32 %s280_s16, 4  ;;  %s42_s15 = int_to_ptr.vmem [resolvable:$true] %s41_s15  ;;  %s52_s17 = int_to_ptr.vmem [resolvable:$true] %s51_s17 }
  0x26   :  { %s201_s21 = scalar_lea.hbm %s382_s2, 16 }
  0x27   :  { %p202_p2 = scmp.ne.s32.totalorder %s382_s2, %s201_s21  ;;  %p205_p3 = scmp.lt.u32.totalorder %s201_s21, %s382_s2 }
  0x29   :  { %p207_p4 = pnand %p205_p3, %p202_p2 }
  0x2b   :  { %210 = shalt.err (!%p207_p4)
}
  0x2c   :  { %s211_s0 = scalar_lea.vmem %s42_s15, 16  ;;  %s215_s18 = scalar_lea.vmem %s42_s15, 32 }
  0x2d   :  { %p212_p5 = scmp.ne.s32.totalorder %s42_s15, %s211_s0  ;;  %p216_p6 = scmp.lt.s32.totalorder %s42_s15, %s42_s15 }
  0x2e   :  { %p217_p7 = scmp.lt.s32.totalorder %s215_s18, %s211_s0 }
  0x30   :  { %p218_p8 = por %p217_p7, %p216_p6 }
  0x32   :  { %p219_p9 = pnand %p218_p8, %p212_p5 }
  0x34   :  { %222 = shalt.err (!%p219_p9)
}
  0x35   :  { %44 = dma.hbm_to_vmem [thread:$0]  %s382_s2, 16, %s42_s15, [#allocation6]  }
  0x36   :  { %s223_s30 = scalar_lea.hbm %s383_s3, 16 }
  0x37   :  { %p224_p10 = scmp.ne.s32.totalorder %s383_s3, %s223_s30  ;;  %p227_p11 = scmp.lt.u32.totalorder %s223_s30, %s383_s3 }
  0x39   :  { %p229_p12 = pnand %p227_p11, %p224_p10 }
  0x3b   :  { %232 = shalt.err (!%p229_p12)
}
  0x3c   :  { %s233_s9 = scalar_lea.vmem %s52_s17, 16  ;;  %s237_s10 = scalar_lea.vmem %s52_s17, 32 }
  0x3d   :  { %p234_p13 = scmp.ne.s32.totalorder %s52_s17, %s233_s9  ;;  %p238_p0 = scmp.lt.s32.totalorder %s52_s17, %s52_s17 }
  0x3e   :  { %p239_p1 = scmp.lt.s32.totalorder %s237_s10, %s233_s9 }
  0x40   :  { %p240_p2 = por %p239_p1, %p238_p0 }
  0x42   :  { %p241_p3 = pnand %p240_p2, %p234_p13 }
  0x44   :  { %244 = shalt.err (!%p241_p3)
}
  0x45   :  { %54 = dma.hbm_to_vmem [thread:$0]  %s383_s3, 16, %s52_s17, [#allocation9]  }
  0x46   :  { %267 = dma.done.wait [#allocation3], 256  }
  0x47   :  { %268 = vsyncadd [#allocation3], 4294967040 }
  0x48   :  { %269 = dma.done.wait [#allocation6], 144  }
  0x49   :  { %270 = vsyncadd [#allocation6], 4294967152 }
  0x4a   :  { %271 = dma.done.wait [#allocation9], 16  }
  0x4b   :  { %272 = vsyncadd [#allocation9], 4294967280  ;;  %v67_v0 = vld [vmem:[#allocation2] sm:$0xff]  ;;  %v69_v1 = vld [vmem:[#allocation5] sm:$0xff]  ;;  %vm72_vm0 = vcmask 261120   ;;  %vm120_vm1 = vcmask 257024  }
  0x4c   :  { %v68_v2 = vld [vmem:[#allocation2 + $0x8] sm:$0xff]  ;;  %v70_v3 = vadd.f32 %v69_v1, %v67_v0  ;;  %v142_v24 = vld [vmem:[#allocation7] ss:$0 sm:$0xff]  ;;  %v143_v26 = vld [vmem:[#allocation8] ss:$0 sm:$0xff]  ;;  %s281_s3 = smov [#allocation10]  }
  0x4d   :  { %v71_v4 = vadd.f32 %v69_v1, %v68_v2  ;;  %s128_s11 = sshll.u32 %s281_s3, 4  ;;  %s129_s11 = int_to_ptr.vmem [resolvable:$true] %s128_s11 }
  0x4e   :  { %v73_v5 = vsel %vm72_vm0, %v70_v3, 0.0  ;;  %s245_s12 = scalar_lea.vmem %s129_s11, 128  ;;  %p250_p5 = scmp.lt.s32.totalorder %s129_s11, %s129_s11 }
  0x4f   :  { %74 = vadd.xlane.f32.xlu0 %v73_v5  ;;  %v76_v6 = vsel %vm72_vm0, %v71_v4, 0.0  ;;  %p246_p4 = scmp.ne.s32.totalorder %s129_s11, %s245_s12  ;;  %p251_p6 = scmp.lt.s32.totalorder %s245_s12, %s245_s12 }
  0x51   :  { %p252_p7 = por %p251_p6, %p250_p5 }
  0x53   :  { %77 = vadd.xlane.f32.xlu0 %v76_v6  ;;  %p253_p8 = pnand %p252_p7, %p246_p4 }
  0xdc   :  { %v75_v7 = vpop.xlane.xlu0 %74 }
  0xdd   :  { %v80_v8 = vmul.f32 0.03125, %v75_v7 }
  0xdf   :  { %v82_v9 = vsub.f32 %v70_v3, %v80_v8 }
  0xe0   :  { %v78_v10 = vpop.xlane.xlu0 %77 }
  0xe1   :  { %v81_v11 = vmul.f32 0.03125, %v78_v10  ;;  %v84_v12 = vmul.f32 %v82_v9, %v82_v9 }
  0xe3   :  { %v83_v13 = vsub.f32 %v71_v4, %v81_v11  ;;  %v86_v14 = vsel %vm72_vm0, %v84_v12, 0.0 }
  0xe4   :  { %87 = vadd.xlane.f32.xlu1 %v86_v14 }
  0xe5   :  { %v85_v15 = vmul.f32 %v83_v13, %v83_v13 }
  0xe7   :  { %v89_v16 = vsel %vm72_vm0, %v85_v15, 0.0 }
  0xe8   :  { %90 = vadd.xlane.f32.xlu1 %v89_v16 }
 0x171   :  { %v88_v17 = vpop.xlane.xlu1 %87 }
 0x172   :  { %v92_v18 = vmul.f32 0.03125, %v88_v17 }
 0x174   :  { %v94_v19 = vadd.f32 1e-05, %v92_v18 }
 0x175   :  { %v91_v20 = vpop.xlane.xlu1 %90 }
 0x176   :  { %153 = vrsqrt.f32 %v94_v19  ;;  %v93_v21 = vmul.f32 0.03125, %v91_v20 }
 0x178   :  { %v95_v22 = vadd.f32 1e-05, %v93_v21 }
 0x17a   :  { %155 = vrsqrt.f32 %v95_v22 }
 0x180   :  { %v154_v23 = vpop.eup %153 }
 0x181   :  { %v98_v25 = vmul.f32 %v154_v23, %v82_v9 }
 0x183   :  { %v107_v27 = vmul.f32 %v142_v24, %v98_v25 }
 0x184   :  { %v156_v28 = vpop.eup %155 }
 0x185   :  { %v99_v29 = vmul.f32 %v156_v28, %v83_v13  ;;  %v116_v30 = vadd.f32 %v143_v26, %v107_v27 }
 0x187   :  { %v108_v31 = vmul.f32 %v142_v24, %v99_v29  ;;  %v118_v32 = vpack.c.bf16 %v116_v30, %v116_v30 }
 0x189   :  { %v117_v33 = vadd.f32 %v143_v26, %v108_v31  ;;  %121 = vst.msk [vmem:[#allocation10] sm:$0xf] %vm120_vm1, %v118_v32 }
 0x18b   :  { %v119_v34 = vpack.c.bf16 %v117_v33, %v117_v33 }
 0x18d   :  { %122 = vst.msk [vmem:[#allocation10 + $0x4] sm:$0xf] %vm120_vm1, %v119_v34 }
 0x18e   :  { %256 = shalt.err (!%p253_p8)
}
 0x18f   :  { %s257_s15 = scalar_lea.hbm %s384_s4, 128 }
 0x190   :  { %p258_p9 = scmp.ne.s32.totalorder %s384_s4, %s257_s15  ;;  %p261_p10 = scmp.lt.u32.totalorder %s257_s15, %s384_s4 }
 0x192   :  { %p263_p11 = pnand %p261_p10, %p258_p9 }
 0x194   :  { %266 = shalt.err (!%p263_p11)
}
 0x195   :  { %s282_s21 = smov 64   ;;  %s283_s22 = smov 4  }
 0x196   :  { %134 = dma.vmem_to_hbm [thread:$0]  %s129_s11, 128, %s384_s4, [#allocation4], %s282_s21, %s282_s21, %s283_s22  }
 0x197   :  { %273 = dma.done.wait [#allocation4], 128  }
 0x198   :  { %274 = vsyncadd [#allocation4], 4294967168 }
 0x199   :  { %138 = vsyncpa [#allocation3], 1 }
 0x19a   :  { %139 = vsyncpa [#allocation6], 1 }
 0x19b   :  { %140 = vsyncpa [#allocation9], 1 }
 0x19c   :  { %141 = vsyncpa [#allocation4], 1 }

// kernel: _lambda_.17
= control target key start
LH: loop header
LB: loop body
LE: loop exit
PB: predicated region body
PF: predicated region fallthrough
CT: control target
= control target key end

     0   :  { %11 = vsyncpa [#allocation3], 0  ;;  %s620_s0 = inlined_call_operand.hbm [shape: bf16[16,32], index: 0, kind: input, shape index: {}]   ;;  %s621_s1 = inlined_call_operand.hbm [shape: bf16[32,32], index: 1, kind: input, shape index: {}]   ;;  %s622_s2 = inlined_call_operand.hbm [shape: f32[1,32], index: 2, kind: input, shape index: {}]   ;;  %s623_s3 = inlined_call_operand.hbm [shape: bf16[16,32], index: 3, kind: input, shape index: {}]   ;;  %s624_s4 = inlined_call_operand.hbm [shape: f32[1,32], index: 4, kind: input, shape index: {}]   ;;  %s625_s5 = inlined_call_operand.hbm [shape: f32[1,32], index: 5, kind: input, shape index: {}]   ;;  %s626_s6 = inlined_call_operand.hbm [shape: bf16[16,32], index: 6, kind: output, shape index: {}]  }
   0x1   :  { %12 = vsyncpa [#allocation6], 0 }
   0x2   :  { %13 = vsyncpa [#allocation9], 0 }
   0x3   :  { %14 = vsyncpa [#allocation12], 0 }
   0x4   :  { %15 = vsyncpa [#allocation4], 0  ;;  %s466_s21 = smov [#allocation5]   ;;  %s467_s23 = smov [#allocation8]  }
   0x5   :  { %s33_s22 = sshll.u32 %s466_s21, 4  ;;  %s55_s24 = sshll.u32 %s467_s23, 4  ;;  %s34_s22 = int_to_ptr.vmem [resolvable:$true] %s33_s22  ;;  %s512_s24 = int_to_ptr.vmem [resolvable:$true] %s55_s24 }
   0x6   :  { %s302_s27 = scalar_lea.hbm %s621_s1, 256 }
   0x7   :  { %p303_p0 = scmp.ne.s32.totalorder %s621_s1, %s302_s27  ;;  %p306_p1 = scmp.lt.u32.totalorder %s302_s27, %s621_s1 }
   0x9   :  { %p308_p2 = pnand %p306_p1, %p303_p0 }
   0xb   :  { %311 = shalt.err (!%p308_p2)
}
   0xc   :  { %s312_s8 = scalar_lea.vmem %s34_s22, 256  ;;  %p317_p4 = scmp.lt.s32.totalorder %s34_s22, %s34_s22 }
   0xd   :  { %p313_p3 = scmp.ne.s32.totalorder %s34_s22, %s312_s8  ;;  %p318_p5 = scmp.lt.s32.totalorder %s312_s8, %s312_s8 }
   0xf   :  { %p319_p6 = por %p318_p5, %p317_p4 }
  0x11   :  { %p320_p7 = pnand %p319_p6, %p313_p3 }
  0x13   :  { %323 = shalt.err (!%p320_p7)
}
  0x14   :  { %s468_s9 = smov 64   ;;  %s469_s10 = smov 4  }
  0x15   :  { %39 = dma.hbm_to_vmem [thread:$0]  %s621_s1, 256, %s34_s22, [#allocation6], %s468_s9, %s468_s9, %s469_s10  }
  0x16   :  { %s324_s15 = scalar_lea.hbm %s623_s3, 128 }
  0x17   :  { %p325_p8 = scmp.ne.s32.totalorder %s623_s3, %s324_s15  ;;  %p328_p9 = scmp.lt.u32.totalorder %s324_s15, %s623_s3 }
  0x19   :  { %p330_p10 = pnand %p328_p9, %p325_p8 }
  0x1b   :  { %333 = shalt.err (!%p330_p10)
}
  0x1c   :  { %s334_s20 = scalar_lea.vmem %s512_s24, 128  ;;  %p339_p12 = scmp.lt.s32.totalorder %s512_s24, %s512_s24 }
  0x1d   :  { %p335_p11 = scmp.ne.s32.totalorder %s512_s24, %s334_s20  ;;  %p340_p13 = scmp.lt.s32.totalorder %s334_s20, %s334_s20 }
  0x1f   :  { %p341_p0 = por %p340_p13, %p339_p12 }
  0x21   :  { %p342_p1 = pnand %p341_p0, %p335_p11 }
  0x23   :  { %345 = shalt.err (!%p342_p1)
}
  0x24   :  { %61 = dma.hbm_to_vmem [thread:$0]  %s623_s3, 128, %s512_s24, [#allocation9], %s468_s9, %s468_s9, %s469_s10  }
  0x25   :  { %s470_s22 = smov [#allocation2]   ;;  %s471_s25 = smov [#allocation7]  }
  0x26   :  { %s21_s23 = sshll.u32 %s470_s22, 4  ;;  %s46_s26 = sshll.u32 %s471_s25, 4  ;;  %s22_s23 = int_to_ptr.vmem [resolvable:$true] %s21_s23  ;;  %s47_s26 = int_to_ptr.vmem [resolvable:$true] %s46_s26 }
  0x27   :  { %s346_s29 = scalar_lea.hbm %s620_s0, 128 }
  0x28   :  { %p347_p2 = scmp.ne.s32.totalorder %s620_s0, %s346_s29  ;;  %p350_p3 = scmp.lt.u32.totalorder %s346_s29, %s620_s0 }
  0x2a   :  { %p352_p4 = pnand %p350_p3, %p347_p2 }
  0x2c   :  { %355 = shalt.err (!%p352_p4)
}
  0x2d   :  { %s356_s3 = scalar_lea.vmem %s22_s23, 128  ;;  %p361_p6 = scmp.lt.s32.totalorder %s22_s23, %s22_s23 }
  0x2e   :  { %p357_p5 = scmp.ne.s32.totalorder %s22_s23, %s356_s3  ;;  %p362_p7 = scmp.lt.s32.totalorder %s356_s3, %s356_s3 }
  0x30   :  { %p363_p8 = por %p362_p7, %p361_p6 }
  0x32   :  { %p364_p9 = pnand %p363_p8, %p357_p5 }
  0x34   :  { %367 = shalt.err (!%p364_p9)
}
  0x35   :  { %27 = dma.hbm_to_vmem [thread:$0]  %s620_s0, 128, %s22_s23, [#allocation3], %s468_s9, %s468_s9, %s469_s10  }
  0x36   :  { %s368_s15 = scalar_lea.hbm %s622_s2, 16 }
  0x37   :  { %p369_p10 = scmp.ne.s32.totalorder %s622_s2, %s368_s15  ;;  %p372_p11 = scmp.lt.u32.totalorder %s368_s15, %s622_s2 }
  0x39   :  { %p374_p12 = pnand %p372_p11, %p369_p10 }
  0x3b   :  { %377 = shalt.err (!%p374_p12)
}
  0x3c   :  { %s378_s20 = scalar_lea.vmem %s47_s26, 16  ;;  %s382_s1 = scalar_lea.vmem %s47_s26, 32 }
  0x3d   :  { %p379_p13 = scmp.ne.s32.totalorder %s47_s26, %s378_s20  ;;  %p383_p0 = scmp.lt.s32.totalorder %s47_s26, %s47_s26 }
  0x3e   :  { %p384_p1 = scmp.lt.s32.totalorder %s382_s1, %s378_s20 }
  0x40   :  { %p385_p2 = por %p384_p1, %p383_p0 }
  0x42   :  { %p386_p3 = pnand %p385_p2, %p379_p13 }
  0x44   :  { %389 = shalt.err (!%p386_p3)
}
  0x45   :  { %49 = dma.hbm_to_vmem [thread:$0]  %s622_s2, 16, %s47_s26, [#allocation6]  }
  0x46   :  { %s472_s22 = smov [#allocation10]   ;;  %s473_s25 = smov [#allocation11]  }
  0x47   :  { %s68_s23 = sshll.u32 %s472_s22, 4  ;;  %s78_s27 = sshll.u32 %s473_s25, 4  ;;  %s69_s23 = int_to_ptr.vmem [resolvable:$true] %s68_s23  ;;  %s79_s27 = int_to_ptr.vmem [resolvable:$true] %s78_s27 }
  0x48   :  { %s390_s30 = scalar_lea.hbm %s624_s4, 16 }
  0x49   :  { %p391_p4 = scmp.ne.s32.totalorder %s624_s4, %s390_s30  ;;  %p394_p5 = scmp.lt.u32.totalorder %s390_s30, %s624_s4 }
  0x4b   :  { %p396_p6 = pnand %p394_p5, %p391_p4 }
  0x4d   :  { %399 = shalt.err (!%p396_p6)
}
  0x4e   :  { %s400_s2 = scalar_lea.vmem %s69_s23, 16  ;;  %s404_s26 = scalar_lea.vmem %s69_s23, 32 }
  0x4f   :  { %p401_p7 = scmp.ne.s32.totalorder %s69_s23, %s400_s2  ;;  %p405_p8 = scmp.lt.s32.totalorder %s69_s23, %s69_s23 }
  0x50   :  { %p406_p9 = scmp.lt.s32.totalorder %s404_s26, %s400_s2 }
  0x52   :  { %p407_p10 = por %p406_p9, %p405_p8 }
  0x54   :  { %p408_p11 = pnand %p407_p10, %p401_p7 }
  0x56   :  { %411 = shalt.err (!%p408_p11)
}
  0x57   :  { %71 = dma.hbm_to_vmem [thread:$0]  %s624_s4, 16, %s69_s23, [#allocation9]  }
  0x58   :  { %s412_s15 = scalar_lea.hbm %s625_s5, 16 }
  0x59   :  { %p413_p12 = scmp.ne.s32.totalorder %s625_s5, %s412_s15  ;;  %p416_p13 = scmp.lt.u32.totalorder %s412_s15, %s625_s5 }
  0x5b   :  { %p418_p0 = pnand %p416_p13, %p413_p12 }
  0x5d   :  { %421 = shalt.err (!%p418_p0)
}
  0x5e   :  { %s422_s20 = scalar_lea.vmem %s79_s27, 16  ;;  %s426_s1 = scalar_lea.vmem %s79_s27, 32 }
  0x5f   :  { %p423_p1 = scmp.ne.s32.totalorder %s79_s27, %s422_s20  ;;  %p427_p2 = scmp.lt.s32.totalorder %s79_s27, %s79_s27 }
  0x60   :  { %p428_p3 = scmp.lt.s32.totalorder %s426_s1, %s422_s20 }
  0x62   :  { %p429_p4 = por %p428_p3, %p427_p2 }
  0x64   :  { %p430_p5 = pnand %p429_p4, %p423_p1 }
  0x66   :  { %433 = shalt.err (!%p430_p5)
}
  0x67   :  { %81 = dma.hbm_to_vmem [thread:$0]  %s625_s5, 16, %s79_s27, [#allocation12]  }
  0x68   :  { %456 = dma.done.wait [#allocation3], 128  }
  0x69   :  { %457 = vsyncadd [#allocation3], 4294967168 }
  0x6a   :  { %458 = dma.done.wait [#allocation6], 272  }
  0x6b   :  { %459 = vsyncadd [#allocation6], 4294967024 }
  0x6c   :  { %460 = dma.done.wait [#allocation9], 144  }
  0x6d   :  { %461 = vsyncadd [#allocation9], 4294967152 }
  0x6e   :  { %462 = dma.done.wait [#allocation12], 16  }
  0x6f   :  { %463 = vsyncadd [#allocation12], 4294967280  ;;  %v474_v0 = vmov 0.0   ;;  %vm475_vm0 = vmmov 0   ;;  %v295_v1 = vld [vmem:[#allocation5] sm:$0xff]   ;;  %v296_v2 = vld [vmem:[#allocation5 + $0x8] sm:$0xff]  }
  0x70   :  { %276 = vmatprep.subr.bf16.mxu0 %v474_v0  ;;  %280 = vmatprep.mubr.msk.bf16.mxu0 %vm475_vm0, %v474_v0  ;;  %v297_v3 = vld [vmem:[#allocation2] sm:$0xff]   ;;  %vm131_vm1 = vcmask 261120   ;;  %v258_v5 = vld [vmem:[#allocation7] ss:$0 sm:$0xff]  ;;  %vm235_vm2 = vcmask 257024   ;;  %s476_s5 = smov [#allocation13]  }
  0x71   :  { %277 = vmatpush3.bf16.msra.mxu0 %v295_v1  ;;  %v270_v4 = vld [vmem:[#allocation8] sm:$0xff]   ;;  %v263_v35 = vld [vmem:[#allocation10] ss:$0 sm:$0xff]  ;;  %v264_v37 = vld [vmem:[#allocation11] ss:$0 sm:$0xff]  ;;  %s243_s21 = sshll.u32 %s476_s5, 4  ;;  %s244_s21 = int_to_ptr.vmem [resolvable:$true] %s243_s21 }
  0x72   :  { %278 = vmatprep.subr.bf16.mxu0 %v474_v0  ;;  %v271_v6 = vunpack.c.l.bf16 %v270_v4  ;;  %v272_v10 = vunpack.c.h.bf16 %v270_v4  ;;  %s434_s22 = scalar_lea.vmem %s244_s21, 128  ;;  %p439_p7 = scmp.lt.s32.totalorder %s244_s21, %s244_s21 }
  0x73   :  { %p435_p6 = scmp.ne.s32.totalorder %s244_s21, %s434_s22  ;;  %p440_p8 = scmp.lt.s32.totalorder %s434_s22, %s434_s22 }
  0x75   :  { %279 = vmatpush3.bf16.msra.mxu0 %v296_v2  ;;  %p441_p9 = por %p440_p8, %p439_p7 }
  0x77   :  { %p442_p10 = pnand %p441_p9, %p435_p6 }
  0x78   :  { %281 = vmatmul.mubr.msk.bf16.vlgmr.msra.gmra.mrb[0].mxu0 %vm131_vm1, %v297_v3 }
 0x14b   :  { %v169_v7 = vpop.f32.mrb[0].mxu0 }
 0x14c   :  { %v170_v8 = vadd.f32 %v258_v5, %v169_v7  ;;  %v282_v9 = vpop.f32.mrb[1].mxu0 }
 0x14d   :  { %v172_v11 = vpop.f32.mrb[2].mxu0 }
 0x14e   :  { %v173_v12 = vadd.f32 %v258_v5, %v172_v11  ;;  %v283_v13 = vpop.f32.mrb[3].mxu0  ;;  %v180_v14 = vadd.f32 %v271_v6, %v170_v8 }
 0x150   :  { %v182_v15 = vsel %vm131_vm1, %v180_v14, 0.0  ;;  %v181_v16 = vadd.f32 %v272_v10, %v173_v12 }
 0x151   :  { %183 = vadd.xlane.f32.xlu0 %v182_v15 }
 0x152   :  { %v185_v17 = vsel %vm131_vm1, %v181_v16, 0.0 }
 0x155   :  { %186 = vadd.xlane.f32.xlu0 %v185_v17 }
 0x1de   :  { %v184_v18 = vpop.xlane.xlu0 %183 }
 0x1df   :  { %v189_v19 = vmul.f32 0.03125, %v184_v18 }
 0x1e1   :  { %v191_v20 = vsub.f32 %v180_v14, %v189_v19 }
 0x1e2   :  { %v187_v21 = vpop.xlane.xlu0 %186 }
 0x1e3   :  { %v190_v22 = vmul.f32 0.03125, %v187_v21  ;;  %v193_v23 = vmul.f32 %v191_v20, %v191_v20 }
 0x1e5   :  { %v192_v24 = vsub.f32 %v181_v16, %v190_v22  ;;  %v195_v25 = vsel %vm131_vm1, %v193_v23, 0.0 }
 0x1e6   :  { %196 = vadd.xlane.f32.xlu1 %v195_v25 }
 0x1e7   :  { %v194_v26 = vmul.f32 %v192_v24, %v192_v24 }
 0x1e9   :  { %v198_v27 = vsel %vm131_vm1, %v194_v26, 0.0 }
 0x1ea   :  { %199 = vadd.xlane.f32.xlu1 %v198_v27 }
 0x273   :  { %v197_v28 = vpop.xlane.xlu1 %196 }
 0x274   :  { %v201_v29 = vmul.f32 0.03125, %v197_v28 }
 0x276   :  { %v203_v30 = vadd.f32 1e-05, %v201_v29 }
 0x277   :  { %v200_v31 = vpop.xlane.xlu1 %199 }
 0x278   :  { %298 = vrsqrt.f32 %v203_v30  ;;  %v202_v32 = vmul.f32 0.03125, %v200_v31 }
 0x27a   :  { %v204_v33 = vadd.f32 1e-05, %v202_v32 }
 0x27c   :  { %300 = vrsqrt.f32 %v204_v33 }
 0x282   :  { %v299_v34 = vpop.eup %298 }
 0x283   :  { %v207_v36 = vmul.f32 %v299_v34, %v191_v20 }
 0x285   :  { %v216_v38 = vmul.f32 %v263_v35, %v207_v36 }
 0x286   :  { %v301_v39 = vpop.eup %300 }
 0x287   :  { %v208_v40 = vmul.f32 %v301_v39, %v192_v24  ;;  %v225_v41 = vadd.f32 %v264_v37, %v216_v38 }
 0x289   :  { %v217_v42 = vmul.f32 %v263_v35, %v208_v40  ;;  %v267_v43 = vpack.c.bf16 %v225_v41, %v225_v41 }
 0x28b   :  { %v226_v44 = vadd.f32 %v264_v37, %v217_v42  ;;  %236 = vst.msk [vmem:[#allocation13] sm:$0xf] %vm235_vm2, %v267_v43 }
 0x28d   :  { %v268_v45 = vpack.c.bf16 %v226_v44, %v226_v44 }
 0x28f   :  { %237 = vst.msk [vmem:[#allocation13 + $0x4] sm:$0xf] %vm235_vm2, %v268_v45 }
 0x290   :  { %445 = shalt.err (!%p442_p10)
}
 0x291   :  { %s446_s27 = scalar_lea.hbm %s626_s6, 128 }
 0x292   :  { %p447_p11 = scmp.ne.s32.totalorder %s626_s6, %s446_s27  ;;  %p450_p12 = scmp.lt.u32.totalorder %s446_s27, %s626_s6 }
 0x294   :  { %p452_p13 = pnand %p450_p12, %p447_p11 }
 0x296   :  { %455 = shalt.err (!%p452_p13)
}
 0x297   :  { %249 = dma.vmem_to_hbm [thread:$0]  %s244_s21, 128, %s626_s6, [#allocation4], %s468_s9, %s468_s9, %s469_s10  }
 0x298   :  { %464 = dma.done.wait [#allocation4], 128  }
 0x299   :  { %465 = vsyncadd [#allocation4], 4294967168 }
 0x29a   :  { %253 = vsyncpa [#allocation3], 1 }
 0x29b   :  { %254 = vsyncpa [#allocation6], 1 }
 0x29c   :  { %255 = vsyncpa [#allocation9], 1 }
 0x29d   :  { %256 = vsyncpa [#allocation12], 1 }
 0x29e   :  { %257 = vsyncpa [#allocation4], 1 }

// kernel: _lambda_.16
= control target key start
LH: loop header
LB: loop body
LE: loop exit
PB: predicated region body
PF: predicated region fallthrough
CT: control target
= control target key end

     0   :  { %7 = vsyncpa [#allocation3], 0  ;;  %s1550_s0 = inlined_call_operand.hbm [shape: bf16[2,8,96], index: 0, kind: input, shape index: {}]   ;;  %s1551_s1 = inlined_call_operand.hbm [shape: f32[2,1,8], index: 1, kind: input, shape index: {}]   ;;  %s1552_s2 = inlined_call_operand.hbm [shape: bf16[2,8,32], index: 2, kind: output, shape index: {}]  }
   0x1   :  { %8 = vsyncpa [#allocation6], 0 }
   0x2   :  { %9 = vsyncpa [#allocation4], 0  ;;  %s1320_s9 = smov [#allocation2]   ;;  %s1248_s13 = scalar_lea.hbm %s1550_s0, 128 }
   0x3   :  { %s15_s10 = sshll.u32 %s1320_s9, 4  ;;  %p1249_p0 = scmp.ne.s32.totalorder %s1550_s0, %s1248_s13  ;;  %s16_s10 = int_to_ptr.vmem [resolvable:$true] %s15_s10 }
   0x4   :  { %p1252_p1 = scmp.lt.u32.totalorder %s1248_s13, %s1550_s0 }
   0x6   :  { %p1254_p2 = pnand %p1252_p1, %p1249_p0 }
   0x8   :  { %1257 = shalt.err (!%p1254_p2)
}
   0x9   :  { %s1258_s18 = scalar_lea.vmem %s16_s10, 128  ;;  %p1263_p4 = scmp.lt.s32.totalorder %s16_s10, %s16_s10 }
   0xa   :  { %p1259_p3 = scmp.ne.s32.totalorder %s16_s10, %s1258_s18  ;;  %p1264_p5 = scmp.lt.s32.totalorder %s1258_s18, %s1258_s18 }
   0xc   :  { %p1265_p6 = por %p1264_p5, %p1263_p4 }
   0xe   :  { %p1266_p7 = pnand %p1265_p6, %p1259_p3 }
  0x10   :  { %1269 = shalt.err (!%p1266_p7)
}
  0x11   :  { %s1321_s19 = smov 64   ;;  %s1322_s20 = smov 4  }
  0x12   :  { %21 = dma.hbm_to_vmem [thread:$0]  %s1550_s0, 128, %s16_s10, [#allocation3], %s1321_s19, %s1321_s19, %s1322_s20  }
  0x13   :  { %s1323_s23 = smov [#allocation5]   ;;  %s1270_s27 = scalar_lea.hbm %s1551_s1, 32 }
  0x14   :  { %s27_s24 = sshll.u32 %s1323_s23, 4  ;;  %p1271_p8 = scmp.ne.s32.totalorder %s1551_s1, %s1270_s27  ;;  %s28_s24 = int_to_ptr.vmem [resolvable:$true] %s27_s24 }
  0x15   :  { %p1274_p9 = scmp.lt.u32.totalorder %s1270_s27, %s1551_s1 }
  0x17   :  { %p1276_p10 = pnand %p1274_p9, %p1271_p8 }
  0x19   :  { %1279 = shalt.err (!%p1276_p10)
}
  0x1a   :  { %s1280_s4 = scalar_lea.vmem %s28_s24, 32  ;;  %p1285_p12 = scmp.lt.s32.totalorder %s28_s24, %s28_s24 }
  0x1b   :  { %p1281_p11 = scmp.ne.s32.totalorder %s28_s24, %s1280_s4  ;;  %p1286_p13 = scmp.lt.s32.totalorder %s1280_s4, %s1280_s4 }
  0x1d   :  { %p1287_p0 = por %p1286_p13, %p1285_p12 }
  0x1f   :  { %p1288_p1 = pnand %p1287_p0, %p1281_p11 }
  0x21   :  { %1291 = shalt.err (!%p1288_p1)
}
  0x22   :  { %s1324_s0 = smov 16   ;;  %s1325_s5 = smov 1  }
  0x23   :  { %33 = dma.hbm_to_vmem [thread:$0]  %s1551_s1, 32, %s28_s24, [#allocation6], %s1324_s0, %s1324_s0, %s1325_s5  }
  0x24   :  { %1314 = dma.done.wait [#allocation3], 128  }
  0x25   :  { %1315 = vsyncadd [#allocation3], 4294967168 }
  0x26   :  { %1316 = dma.done.wait [#allocation6], 32  }
  0x27   :  { %1317 = vsyncadd [#allocation6], 4294967264  ;;  %v1326_v0 = vmov 0.0   ;;  %vm1327_vm0 = vmmov 0   ;;  %v41_v1 = vld [vmem:[#allocation2] sm:$0xf]  ;;  %v156_v9 = vlaneseq }
  0x28   :  { %1097 = vmatprep.subr.bf16.mxu0 %v1326_v0  ;;  %1103 = vmatprep.subr.bf16.mxu1 %v1326_v0  ;;  %v42_v2 = vld [vmem:[#allocation2 + $0x4] sm:$0xf]  ;;  %v1391_v3 = vcombine.low %v41_v1, %v41_v1  ;;  %s1328_s1 = smov 96   ;;  %vm54_vm1 = vcmask 64512   ;;  %v43_v10 = vld [vmem:[#allocation5] sm:$0x1] }
  0x29   :  { %1099 = vmatprep.mubr.msk.bf16.mxu0 %vm1327_vm0, %v1326_v0  ;;  %1105 = vmatprep.mubr.msk.bf16.mxu1 %vm1327_vm0, %v1326_v0  ;;  %v1394_v4 = vcombine.low %v42_v2, %v42_v2  ;;  %v45_v11 = vsub.f32 1.0, %v43_v10  ;;  %v157_v12 = vshrl.u32 %v156_v9, 7  ;;  %v44_v13 = vld [vmem:[#allocation5 + $0x1] sm:$0x1]  ;;  %s1329_s8 = smov 88   ;;  %vm197_vm2 = vcmask 1043456  }
  0x2a   :  { %52 = vrot.lane.b32.xlu0 %v1391_v3, %s1328_s1  ;;  %v46_v16 = vsub.f32 1.0, %v44_v13  ;;  %s1330_s9 = smov 120   ;;  %vm291_vm3 = vcmask 60416   ;;  %s1331_s10 = smov 56   ;;  %vm532_vm4 = vcmask 126016   ;;  %vm773_vm5 = vcmask 191616  }
  0x2b   :  { %v47_v14 = vmul.f32 -1e+09, %v45_v11  ;;  %v158_v15 = vsub.s32 0, %v157_v12  ;;  %s1332_s11 = smov 80   ;;  %s1333_s12 = smov 112   ;;  %vm1014_vm6 = vcmask 257216  }
  0x2c   :  { %v48_v18 = vmul.f32 -1e+09, %v46_v16  ;;  %s1334_s13 = smov 48   ;;  %s1335_s14 = smov 72  }
  0x2d   :  { %v1407_v17 = vrot.slane %v47_v14, %v158_v15  ;;  %s1336_s15 = smov 104   ;;  %s1337_s16 = smov 40  }
  0x2e   :  { %104 = vrot.lane.b32.xlu0 %v1394_v4, %s1328_s1  ;;  %v1410_v25 = vrot.slane %v48_v18, %v158_v15  ;;  %s1338_s17 = smov 8   ;;  %s1339_s18 = smov 24  }
  0x2f   :  { %s1340_s21 = smov [#allocation7]  }
  0x30   :  { %s1022_s22 = sshll.u32 %s1340_s21, 4  ;;  %s1023_s22 = int_to_ptr.vmem [resolvable:$true] %s1022_s22 }
  0x31   :  { %s1292_s23 = scalar_lea.vmem %s1023_s22, 128  ;;  %p1297_p3 = scmp.lt.s32.totalorder %s1023_s22, %s1023_s22 }
  0x32   :  { %p1293_p2 = scmp.ne.s32.totalorder %s1023_s22, %s1292_s23  ;;  %p1298_p4 = scmp.lt.s32.totalorder %s1292_s23, %s1292_s23 }
  0x34   :  { %p1299_p5 = por %p1298_p4, %p1297_p3 }
  0x36   :  { %p1300_p6 = pnand %p1299_p5, %p1293_p2 }
  0x9c   :  { %v53_v5 = vpop.permute.xlu0 %52 }
  0x9d   :  { %v59_v6 = vsel %vm54_vm1, %v53_v5, 0 }
  0x9e   :  { %1098 = vmatpush3.bf16.xpose.msra.mxu0 %v59_v6 }
  0x9f   :  { %1109 = vmatprep.subr.bf16.mxu0 %v1326_v0 }
  0xa0   :  { %v105_v7 = vpop.permute.xlu0 %104 }
  0xa1   :  { %v110_v8 = vsel %vm54_vm1, %v105_v7, 0 }
  0xa2   :  { %1104 = vmatpush3.bf16.xpose.msra.mxu1 %v110_v8 }
  0xa3   :  { %1115 = vmatprep.subr.bf16.mxu1 %v1326_v0 }
  0xa5   :  { %1100 = vmatmul.mubr.msk.bf16.vlgmr.msra.gmra.mrb[0].mxu0 %vm54_vm1, %v41_v1 }
  0xa6   :  { %1111 = vmatprep.mubr.msk.bf16.mxu0 %vm1327_vm0, %v1326_v0 }
  0xa9   :  { %1106 = vmatmul.mubr.msk.bf16.vlgmr.msra.gmra.mrb[0].mxu1 %vm54_vm1, %v42_v2 }
  0xaa   :  { %1117 = vmatprep.mubr.msk.bf16.mxu1 %vm1327_vm0, %v1326_v0 }
 0x178   :  { %v95_v19 = vpop.f32.mrb[0].mxu0 }
 0x179   :  { %v152_v20 = vmul.f32 0.35355338, %v95_v19  ;;  %v1101_v21 = vpop.f32.mrb[1].mxu0 }
 0x17a   :  { %v98_v22 = vpop.f32.mrb[2].mxu0 }
 0x17b   :  { %v1102_v23 = vpop.f32.mrb[3].mxu0  ;;  %v166_v24 = vadd.f32 %v1407_v17, %v152_v20 }
 0x17c   :  { %v146_v26 = vpop.f32.mrb[0].mxu1 }
 0x17d   :  { %v153_v27 = vmul.f32 0.35355338, %v146_v26  ;;  %v1107_v28 = vpop.f32.mrb[1].mxu1  ;;  %v168_v29 = vsel %vm54_vm1, %v166_v24, -inf }
 0x17e   :  { %169 = vmax.xlane.f32.xlu1 %v168_v29  ;;  %v149_v30 = vpop.f32.mrb[2].mxu1 }
 0x17f   :  { %v1108_v31 = vpop.f32.mrb[3].mxu1  ;;  %v167_v32 = vadd.f32 %v1410_v25, %v153_v27 }
 0x181   :  { %v171_v33 = vsel %vm54_vm1, %v167_v32, -inf }
 0x182   :  { %172 = vmax.xlane.f32.xlu1 %v171_v33 }
 0x193   :  { %192 = vrot.lane.b32.xlu1 %v1391_v3, %s1321_s19 }
 0x197   :  { %241 = vrot.lane.b32.xlu1 %v1394_v4, %s1321_s19 }
 0x19b   :  { %296 = vrot.lane.b32.xlu1 %v1391_v3, %s1329_s8 }
 0x20b   :  { %v170_v34 = vpop.xlane.xlu1 %169 }
 0x20c   :  { %v174_v35 = vsub.f32 %v166_v24, %v170_v34 }
 0x20e   :  { %v176_v36 = vmul.f32 1.442695, %v174_v35 }
 0x20f   :  { %v173_v37 = vpop.xlane.xlu1 %172 }
 0x210   :  { %1216 = vpow2.f32 %v176_v36  ;;  %v175_v38 = vsub.f32 %v167_v32, %v173_v37 }
 0x212   :  { %v178_v39 = vmul.f32 1.442695, %v175_v38 }
 0x213   :  { %v193_v40 = vpop.permute.xlu1 %192 }
 0x214   :  { %1218 = vpow2.f32 %v178_v39  ;;  %v199_v41 = vsel %vm197_vm2, %v193_v40, 0 }
 0x215   :  { %1110 = vmatpush3.bf16.msra.mxu0 %v199_v41 }
 0x216   :  { %1121 = vmatprep.subr.bf16.mxu0 %v1326_v0 }
 0x217   :  { %v242_v42 = vpop.permute.xlu1 %241 }
 0x218   :  { %v247_v43 = vsel %vm197_vm2, %v242_v42, 0 }
 0x219   :  { %1116 = vmatpush3.bf16.msra.mxu1 %v247_v43 }
 0x21a   :  { %v1217_v44 = vpop.eup %1216  ;;  %1127 = vmatprep.subr.bf16.mxu1 %v1326_v0 }
 0x21b   :  { %v180_v45 = vsel %vm54_vm1, %v1217_v44, 0.0  ;;  %v297_v48 = vpop.permute.xlu1 %296 }
 0x21c   :  { %181 = vadd.xlane.f32.xlu0 %v180_v45  ;;  %v302_v56 = vsel %vm54_vm1, %v297_v48, 0 }
 0x21e   :  { %v1219_v46 = vpop.eup %1218 }
 0x21f   :  { %v183_v47 = vsel %vm54_vm1, %v1219_v46, 0.0 }
 0x220   :  { %184 = vadd.xlane.f32.xlu1 %v183_v47 }
 0x231   :  { %346 = vrot.lane.b32.xlu1 %v1394_v4, %s1329_s8 }
 0x232   :  { %294 = vrot.lane.b32.xlu0 %v1391_v3, %s1330_s9 }
 0x235   :  { %344 = vrot.lane.b32.xlu1 %v1394_v4, %s1330_s9 }
 0x2a9   :  { %v182_v49 = vpop.xlane.xlu0 %181 }
 0x2aa   :  { %1220 = vrcp.f32 %v182_v49 }
 0x2ad   :  { %v185_v50 = vpop.xlane.xlu1 %184  ;;  %v295_v60 = vpop.permute.xlu0 %294 }
 0x2ae   :  { %1222 = vrcp.f32 %v185_v50 }
 0x2b1   :  { %v347_v55 = vpop.permute.xlu1 %346 }
 0x2b2   :  { %v352_v58 = vsel %vm54_vm1, %v347_v55, 0 }
 0x2b4   :  { %v1221_v51 = vpop.eup %1220 }
 0x2b5   :  { %v188_v52 = vmul.f32 %v1221_v51, %v1217_v44  ;;  %v345_v61 = vpop.permute.xlu1 %344 }
 0x2b7   :  { %v190_v53 = vpack.c.bf16 %v188_v52, %v188_v52 }
 0x2b8   :  { %v1223_v54 = vpop.eup %1222 }
 0x2b9   :  { %v189_v57 = vmul.f32 %v1223_v54, %v1219_v46  ;;  %1112 = vmatmul.mubr.msk.bf16.vlgmr.msra.gmra.mrb[4].mxu0 %vm54_vm1, %v190_v53 }
 0x2ba   :  { %1122 = vmatpush3.bf16.xpose.msra.mxu0 %v302_v56  ;;  %1123 = vmatprep.mubr.msk.bf16.mxu0 %vm1327_vm0, %v1326_v0 }
 0x2bb   :  { %v191_v59 = vpack.c.bf16 %v189_v57, %v189_v57  ;;  %1133 = vmatprep.subr.bf16.mxu0 %v1326_v0 }
 0x2bd   :  { %1118 = vmatmul.mubr.msk.bf16.vlgmr.msra.gmra.mrb[4].mxu1 %vm54_vm1, %v191_v59 }
 0x2be   :  { %1128 = vmatpush3.bf16.xpose.msra.mxu1 %v352_v58  ;;  %1129 = vmatprep.mubr.msk.bf16.mxu1 %vm1327_vm0, %v1326_v0 }
 0x2bf   :  { %1139 = vmatprep.subr.bf16.mxu1 %v1326_v0 }
 0x2c1   :  { %1124 = vmatmul.mubr.msk.bf16.vlgmr.msra.gmra.mrb[8].mxu0 %vm54_vm1, %v295_v60 }
 0x2c2   :  { %1135 = vmatprep.mubr.msk.bf16.mxu0 %vm1327_vm0, %v1326_v0 }
 0x2c5   :  { %1130 = vmatmul.mubr.msk.bf16.vlgmr.msra.gmra.mrb[8].mxu1 %vm54_vm1, %v345_v61 }
 0x2c6   :  { %1141 = vmatprep.mubr.msk.bf16.mxu1 %vm1327_vm0, %v1326_v0 }
 0x38c   :  { %v235_v62 = vpop.f32.mrb[4].mxu0 }
 0x38d   :  { %v289_v63 = vpack.c.bf16 %v235_v62, %v235_v62  ;;  %v1113_v1 = vpop.f32.mrb[5].mxu0 }
 0x38e   :  { %v238_v2 = vpop.f32.mrb[6].mxu0 }
 0x38f   :  { %292 = vst.msk [vmem:[#allocation7] sm:$0xf] %vm291_vm3, %v289_v63  ;;  %v1114_v5 = vpop.f32.mrb[7].mxu0 }
 0x390   :  { %v283_v6 = vpop.f32.mrb[4].mxu1 }
 0x391   :  { %v290_v7 = vpack.c.bf16 %v283_v6, %v283_v6  ;;  %v1119_v8 = vpop.f32.mrb[5].mxu1 }
 0x392   :  { %v286_v9 = vpop.f32.mrb[6].mxu1 }
 0x393   :  { %293 = vst.msk [vmem:[#allocation7 + $0x4] sm:$0xf] %vm291_vm3, %v290_v7  ;;  %v1120_v10 = vpop.f32.mrb[7].mxu1 }
 0x394   :  { %v338_v11 = vpop.f32.mrb[8].mxu0 }
 0x395   :  { %v394_v12 = vmul.f32 0.35355338, %v338_v11  ;;  %v1125_v13 = vpop.f32.mrb[9].mxu0 }
 0x396   :  { %v341_v14 = vpop.f32.mrb[10].mxu0 }
 0x397   :  { %v1126_v15 = vpop.f32.mrb[11].mxu0  ;;  %v396_v16 = vadd.f32 %v394_v12, %v1407_v17 }
 0x398   :  { %v388_v18 = vpop.f32.mrb[8].mxu1 }
 0x399   :  { %v395_v19 = vmul.f32 0.35355338, %v388_v18  ;;  %v1131_v20 = vpop.f32.mrb[9].mxu1  ;;  %v398_v21 = vsel %vm54_vm1, %v396_v16, -inf }
 0x39a   :  { %v391_v22 = vpop.f32.mrb[10].mxu1  ;;  %399 = vmax.xlane.f32.xlu1 %v398_v21 }
 0x39b   :  { %v1132_v23 = vpop.f32.mrb[11].mxu1  ;;  %v397_v24 = vadd.f32 %v395_v19, %v1410_v25 }
 0x39d   :  { %v401_v26 = vsel %vm54_vm1, %v397_v24, -inf }
 0x39e   :  { %402 = vmax.xlane.f32.xlu0 %v401_v26 }
 0x3ab   :  { %422 = vrot.lane.b32.xlu1 %v1391_v3, %s1331_s10 }
 0x3af   :  { %537 = vrot.lane.b32.xlu1 %v1391_v3, %s1332_s11 }
 0x3b4   :  { %470 = vrot.lane.b32.xlu0 %v1394_v4, %s1331_s10 }
 0x3b8   :  { %535 = vrot.lane.b32.xlu0 %v1391_v3, %s1333_s12 }
 0x427   :  { %v400_v27 = vpop.xlane.xlu1 %399 }
 0x428   :  { %v404_v28 = vsub.f32 %v396_v16, %v400_v27 }
 0x42a   :  { %v406_v29 = vmul.f32 1.442695, %v404_v28 }
 0x42b   :  { %v403_v30 = vpop.xlane.xlu0 %402  ;;  %v423_v31 = vpop.permute.xlu1 %422 }
 0x42c   :  { %1224 = vpow2.f32 %v406_v29  ;;  %v405_v32 = vsub.f32 %v397_v24, %v403_v30  ;;  %v428_v33 = vsel %vm197_vm2, %v423_v31, 0 }
 0x42d   :  { %1134 = vmatpush3.bf16.msra.mxu0 %v428_v33 }
 0x42e   :  { %v408_v34 = vmul.f32 1.442695, %v405_v32  ;;  %1145 = vmatprep.subr.bf16.mxu0 %v1326_v0 }
 0x42f   :  { %v471_v39 = vpop.permute.xlu0 %470  ;;  %v538_v41 = vpop.permute.xlu1 %537 }
 0x430   :  { %1226 = vpow2.f32 %v408_v34  ;;  %v476_v40 = vsel %vm197_vm2, %v471_v39, 0  ;;  %v543_v49 = vsel %vm54_vm1, %v538_v41, 0 }
 0x431   :  { %1140 = vmatpush3.bf16.msra.mxu1 %v476_v40 }
 0x432   :  { %1151 = vmatprep.subr.bf16.mxu1 %v1326_v0 }
 0x433   :  { %v536_v53 = vpop.permute.xlu0 %535 }
 0x436   :  { %v1225_v35 = vpop.eup %1224 }
 0x437   :  { %v410_v36 = vsel %vm54_vm1, %v1225_v35, 0.0 }
 0x438   :  { %411 = vadd.xlane.f32.xlu1 %v410_v36 }
 0x43a   :  { %v1227_v37 = vpop.eup %1226 }
 0x43b   :  { %v413_v38 = vsel %vm54_vm1, %v1227_v37, 0.0 }
 0x43c   :  { %414 = vadd.xlane.f32.xlu1 %v413_v38 }
 0x44d   :  { %587 = vrot.lane.b32.xlu1 %v1394_v4, %s1332_s11 }
 0x451   :  { %585 = vrot.lane.b32.xlu1 %v1394_v4, %s1333_s12 }
 0x4c5   :  { %v412_v42 = vpop.xlane.xlu1 %411 }
 0x4c6   :  { %1228 = vrcp.f32 %v412_v42 }
 0x4c9   :  { %v415_v43 = vpop.xlane.xlu1 %414 }
 0x4ca   :  { %1230 = vrcp.f32 %v415_v43 }
 0x4cd   :  { %v588_v48 = vpop.permute.xlu1 %587 }
 0x4ce   :  { %v593_v51 = vsel %vm54_vm1, %v588_v48, 0 }
 0x4d0   :  { %v1229_v44 = vpop.eup %1228 }
 0x4d1   :  { %v418_v45 = vmul.f32 %v1229_v44, %v1225_v35  ;;  %v586_v54 = vpop.permute.xlu1 %585 }
 0x4d3   :  { %v420_v46 = vpack.c.bf16 %v418_v45, %v418_v45 }
 0x4d4   :  { %v1231_v47 = vpop.eup %1230 }
 0x4d5   :  { %v419_v50 = vmul.f32 %v1231_v47, %v1227_v37  ;;  %1136 = vmatmul.mubr.msk.bf16.vlgmr.msra.gmra.mrb[12].mxu0 %vm54_vm1, %v420_v46 }
 0x4d6   :  { %1146 = vmatpush3.bf16.xpose.msra.mxu0 %v543_v49  ;;  %1147 = vmatprep.mubr.msk.bf16.mxu0 %vm1327_vm0, %v1326_v0 }
 0x4d7   :  { %v421_v52 = vpack.c.bf16 %v419_v50, %v419_v50  ;;  %1157 = vmatprep.subr.bf16.mxu0 %v1326_v0 }
 0x4d9   :  { %1142 = vmatmul.mubr.msk.bf16.vlgmr.msra.gmra.mrb[12].mxu1 %vm54_vm1, %v421_v52 }
 0x4da   :  { %1152 = vmatpush3.bf16.xpose.msra.mxu1 %v593_v51  ;;  %1153 = vmatprep.mubr.msk.bf16.mxu1 %vm1327_vm0, %v1326_v0 }
 0x4db   :  { %1163 = vmatprep.subr.bf16.mxu1 %v1326_v0 }
 0x4dd   :  { %1148 = vmatmul.mubr.msk.bf16.vlgmr.msra.gmra.mrb[16].mxu0 %vm54_vm1, %v536_v53 }
 0x4de   :  { %1159 = vmatprep.mubr.msk.bf16.mxu0 %vm1327_vm0, %v1326_v0 }
 0x4e1   :  { %1154 = vmatmul.mubr.msk.bf16.vlgmr.msra.gmra.mrb[16].mxu1 %vm54_vm1, %v586_v54 }
 0x4e2   :  { %1165 = vmatprep.mubr.msk.bf16.mxu1 %vm1327_vm0, %v1326_v0 }
 0x5a8   :  { %v1477_v55 = vpop.f32.mrb[12].mxu0 }
 0x5a9   :  { %v1137_v56 = vpop.f32.mrb[13].mxu0 }
 0x5aa   :  { %v467_v57 = vpop.f32.mrb[14].mxu0 }
 0x5ab   :  { %v1138_v58 = vpop.f32.mrb[15].mxu0 }
 0x5ac   :  { %v1479_v59 = vpop.f32.mrb[12].mxu1 }
 0x5ad   :  { %v1143_v60 = vpop.f32.mrb[13].mxu1 }
 0x5ae   :  { %v515_v61 = vpop.f32.mrb[14].mxu1 }
 0x5af   :  { %v1144_v62 = vpop.f32.mrb[15].mxu1 }
 0x5b0   :  { %v579_v63 = vpop.f32.mrb[16].mxu0 }
 0x5b1   :  { %v635_v1 = vmul.f32 0.35355338, %v579_v63  ;;  %v1149_v2 = vpop.f32.mrb[17].mxu0 }
 0x5b2   :  { %v582_v5 = vpop.f32.mrb[18].mxu0 }
 0x5b3   :  { %v1150_v6 = vpop.f32.mrb[19].mxu0  ;;  %v637_v7 = vadd.f32 %v635_v1, %v1407_v17 }
 0x5b4   :  { %v629_v8 = vpop.f32.mrb[16].mxu1 }
 0x5b5   :  { %v636_v9 = vmul.f32 0.35355338, %v629_v8  ;;  %v1155_v10 = vpop.f32.mrb[17].mxu1  ;;  %v639_v11 = vsel %vm54_vm1, %v637_v7, -inf  ;;  %v1060_v8 = vpack.c.bf16 %v1479_v59, %v1479_v59 }
 0x5b6   :  { %v632_v12 = vpop.f32.mrb[18].mxu1  ;;  %640 = vmax.xlane.f32.xlu0 %v639_v11 }
 0x5b7   :  { %v1156_v13 = vpop.f32.mrb[19].mxu1  ;;  %v638_v14 = vadd.f32 %v636_v9, %v1410_v25 }
 0x5b9   :  { %v642_v15 = vsel %vm54_vm1, %v638_v14, -inf }
 0x5ba   :  { %643 = vmax.xlane.f32.xlu1 %v642_v15 }
 0x5cb   :  { %663 = vrot.lane.b32.xlu1 %v1391_v3, %s1334_s13 }
 0x5cf   :  { %778 = vrot.lane.b32.xlu1 %v1391_v3, %s1335_s14 }
 0x5d3   :  { %828 = vrot.lane.b32.xlu1 %v1394_v4, %s1335_s14 }
 0x5d7   :  { %826 = vrot.lane.b32.xlu1 %v1394_v4, %s1336_s15 }
 0x643   :  { %v641_v16 = vpop.xlane.xlu0 %640 }
 0x644   :  { %v645_v18 = vsub.f32 %v637_v7, %v641_v16 }
 0x646   :  { %v647_v19 = vmul.f32 1.442695, %v645_v18 }
 0x647   :  { %v644_v20 = vpop.xlane.xlu1 %643 }
 0x648   :  { %1232 = vpow2.f32 %v647_v19  ;;  %v646_v21 = vsub.f32 %v638_v14, %v644_v20 }
 0x64a   :  { %v649_v22 = vmul.f32 1.442695, %v646_v21 }
 0x64b   :  { %v664_v28 = vpop.permute.xlu1 %663 }
 0x64c   :  { %1234 = vpow2.f32 %v649_v22  ;;  %v669_v29 = vsel %vm197_vm2, %v664_v28, 0 }
 0x64d   :  { %1158 = vmatpush3.bf16.msra.mxu0 %v669_v29 }
 0x64e   :  { %1169 = vmatprep.subr.bf16.mxu0 %v1326_v0 }
 0x64f   :  { %v779_v34 = vpop.permute.xlu1 %778 }
 0x650   :  { %v784_v37 = vsel %vm54_vm1, %v779_v34, 0 }
 0x652   :  { %v1233_v23 = vpop.eup %1232 }
 0x653   :  { %v651_v24 = vsel %vm54_vm1, %v1233_v23, 0.0  ;;  %v829_v40 = vpop.permute.xlu1 %828 }
 0x654   :  { %652 = vadd.xlane.f32.xlu0 %v651_v24  ;;  %v834_v42 = vsel %vm54_vm1, %v829_v40, 0 }
 0x656   :  { %v1235_v26 = vpop.eup %1234 }
 0x657   :  { %v654_v27 = vsel %vm54_vm1, %v1235_v26, 0.0  ;;  %v827_v45 = vpop.permute.xlu1 %826 }
 0x658   :  { %655 = vadd.xlane.f32.xlu0 %v654_v27 }
 0x66e   :  { %711 = vrot.lane.b32.xlu0 %v1394_v4, %s1334_s13 }
 0x672   :  { %776 = vrot.lane.b32.xlu0 %v1391_v3, %s1336_s15 }
 0x6e1   :  { %v653_v30 = vpop.xlane.xlu0 %652 }
 0x6e2   :  { %1236 = vrcp.f32 %v653_v30 }
 0x6e5   :  { %v656_v31 = vpop.xlane.xlu0 %655 }
 0x6e6   :  { %1238 = vrcp.f32 %v656_v31 }
 0x6e9   :  { %v712_v32 = vpop.permute.xlu0 %711 }
 0x6ea   :  { %v717_v33 = vsel %vm197_vm2, %v712_v32, 0 }
 0x6eb   :  { %1164 = vmatpush3.bf16.msra.mxu1 %v717_v33 }
 0x6ec   :  { %v1237_v35 = vpop.eup %1236  ;;  %1175 = vmatprep.subr.bf16.mxu1 %v1326_v0 }
 0x6ed   :  { %v659_v36 = vmul.f32 %v1237_v35, %v1233_v23  ;;  %v777_v44 = vpop.permute.xlu0 %776 }
 0x6ef   :  { %v661_v38 = vpack.c.bf16 %v659_v36, %v659_v36 }
 0x6f0   :  { %v1239_v39 = vpop.eup %1238 }
 0x6f1   :  { %v660_v41 = vmul.f32 %v1239_v39, %v1235_v26  ;;  %1160 = vmatmul.mubr.msk.bf16.vlgmr.msra.gmra.mrb[20].mxu0 %vm54_vm1, %v661_v38 }
 0x6f2   :  { %1170 = vmatpush3.bf16.xpose.msra.mxu0 %v784_v37  ;;  %1171 = vmatprep.mubr.msk.bf16.mxu0 %vm1327_vm0, %v1326_v0 }
 0x6f3   :  { %v662_v43 = vpack.c.bf16 %v660_v41, %v660_v41  ;;  %1181 = vmatprep.subr.bf16.mxu0 %v1326_v0 }
 0x6f5   :  { %1166 = vmatmul.mubr.msk.bf16.vlgmr.msra.gmra.mrb[20].mxu1 %vm54_vm1, %v662_v43 }
 0x6f6   :  { %1176 = vmatpush3.bf16.xpose.msra.mxu1 %v834_v42  ;;  %1177 = vmatprep.mubr.msk.bf16.mxu1 %vm1327_vm0, %v1326_v0 }
 0x6f7   :  { %1187 = vmatprep.subr.bf16.mxu1 %v1326_v0 }
 0x6f9   :  { %1172 = vmatmul.mubr.msk.bf16.vlgmr.msra.gmra.mrb[24].mxu0 %vm54_vm1, %v777_v44 }
 0x6fa   :  { %1183 = vmatprep.mubr.msk.bf16.mxu0 %vm1327_vm0, %v1326_v0 }
 0x6fd   :  { %1178 = vmatmul.mubr.msk.bf16.vlgmr.msra.gmra.mrb[24].mxu1 %vm54_vm1, %v827_v45 }
 0x6fe   :  { %1189 = vmatprep.mubr.msk.bf16.mxu1 %vm1327_vm0, %v1326_v0 }
 0x7c4   :  { %v705_v46 = vpop.f32.mrb[20].mxu0 }
 0x7c5   :  { %v1161_v47 = vpop.f32.mrb[21].mxu0  ;;  %v1061_v22 = vpack.c.bf16 %v705_v46, %v705_v46 }
 0x7c6   :  { %v708_v48 = vpop.f32.mrb[22].mxu0 }
 0x7c7   :  { %v1162_v49 = vpop.f32.mrb[23].mxu0 }
 0x7c8   :  { %v753_v50 = vpop.f32.mrb[20].mxu1 }
 0x7c9   :  { %v1167_v51 = vpop.f32.mrb[21].mxu1  ;;  %v1062_v9 = vpack.c.bf16 %v753_v50, %v753_v50 }
 0x7ca   :  { %v756_v52 = vpop.f32.mrb[22].mxu1 }
 0x7cb   :  { %v1168_v53 = vpop.f32.mrb[23].mxu1 }
 0x7cc   :  { %v820_v54 = vpop.f32.mrb[24].mxu0 }
 0x7cd   :  { %v876_v56 = vmul.f32 0.35355338, %v820_v54  ;;  %v1173_v57 = vpop.f32.mrb[25].mxu0 }
 0x7ce   :  { %v823_v58 = vpop.f32.mrb[26].mxu0 }
 0x7cf   :  { %v1174_v60 = vpop.f32.mrb[27].mxu0  ;;  %v878_v61 = vadd.f32 %v876_v56, %v1407_v17  ;;  %v1059_v17 = vpack.c.bf16 %v1477_v55, %v1477_v55 }
 0x7d0   :  { %v870_v62 = vpop.f32.mrb[24].mxu1 }
 0x7d1   :  { %v877_v63 = vmul.f32 0.35355338, %v870_v62  ;;  %v1179_v1 = vpop.f32.mrb[25].mxu1  ;;  %v880_v0 = vsel %vm54_vm1, %v878_v61, -inf }
 0x7d2   :  { %v873_v2 = vpop.f32.mrb[26].mxu1  ;;  %881 = vmax.xlane.f32.xlu0 %v880_v0 }
 0x7d3   :  { %v1180_v5 = vpop.f32.mrb[27].mxu1  ;;  %v879_v6 = vadd.f32 %v877_v63, %v1410_v25 }
 0x7d5   :  { %v883_v7 = vsel %vm54_vm1, %v879_v6, -inf }
 0x7d6   :  { %884 = vmax.xlane.f32.xlu1 %v883_v7 }
 0x7e7   :  { %904 = vrot.lane.b32.xlu1 %v1391_v3, %s1337_s16 }
 0x7eb   :  { %526 = vrot.lane.b32.xlu1 %v1059_v17, %s1338_s17 }
 0x7ef   :  { %528 = vrot.lane.b32.xlu1 %v1060_v8, %s1338_s17 }
 0x7f3   :  { %769 = vrot.lane.b32.xlu1 %v1062_v9, %s1324_s0 }
 0x85f   :  { %v882_v25 = vpop.xlane.xlu0 %881 }
 0x860   :  { %v886_v10 = vsub.f32 %v878_v61, %v882_v25 }
 0x862   :  { %v888_v11 = vmul.f32 1.442695, %v886_v10 }
 0x863   :  { %v885_v12 = vpop.xlane.xlu1 %884 }
 0x864   :  { %1240 = vpow2.f32 %v888_v11  ;;  %v887_v13 = vsub.f32 %v879_v6, %v885_v12 }
 0x866   :  { %v890_v14 = vmul.f32 1.442695, %v887_v13 }
 0x867   :  { %v905_v3 = vpop.permute.xlu1 %904 }
 0x868   :  { %1242 = vpow2.f32 %v890_v14  ;;  %v910_v55 = vsel %vm197_vm2, %v905_v3, 0 }
 0x869   :  { %1182 = vmatpush3.bf16.msra.mxu0 %v910_v55 }
 0x86b   :  { %v527_v15 = vpop.permute.xlu1 %526 }
 0x86c   :  { %533 = vst.msk [vmem:[#allocation7] sm:$0xf] %vm532_vm4, %v527_v15 }
 0x86e   :  { %v1241_v59 = vpop.eup %1240 }
 0x86f   :  { %v529_v16 = vpop.permute.xlu1 %528  ;;  %v892_v18 = vsel %vm54_vm1, %v1241_v59, 0.0 }
 0x870   :  { %534 = vst.msk [vmem:[#allocation7 + $0x4] sm:$0xf] %vm532_vm4, %v529_v16  ;;  %893 = vadd.xlane.f32.xlu0 %v892_v18 }
 0x872   :  { %v1243_v19 = vpop.eup %1242 }
 0x873   :  { %v770_v20 = vpop.permute.xlu1 %769  ;;  %v895_v21 = vsel %vm54_vm1, %v1243_v19, 0.0 }
 0x874   :  { %775 = vst.msk [vmem:[#allocation7 + $0x4] sm:$0xf] %vm773_vm5, %v770_v20  ;;  %896 = vadd.xlane.f32.xlu0 %v895_v21 }
 0x88a   :  { %952 = vrot.lane.b32.xlu0 %v1394_v4, %s1337_s16 }
 0x88e   :  { %767 = vrot.lane.b32.xlu0 %v1061_v22, %s1324_s0 }
 0x8fd   :  { %v894_v23 = vpop.xlane.xlu0 %893 }
 0x8fe   :  { %1244 = vrcp.f32 %v894_v23 }
 0x901   :  { %v897_v24 = vpop.xlane.xlu0 %896 }
 0x902   :  { %1246 = vrcp.f32 %v897_v24 }
 0x905   :  { %v953_v26 = vpop.permute.xlu0 %952 }
 0x906   :  { %v958_v27 = vsel %vm197_vm2, %v953_v26, 0 }
 0x907   :  { %1188 = vmatpush3.bf16.msra.mxu1 %v958_v27 }
 0x908   :  { %v1245_v28 = vpop.eup %1244 }
 0x909   :  { %v900_v29 = vmul.f32 %v1245_v28, %v1241_v59  ;;  %v768_v30 = vpop.permute.xlu0 %767 }
 0x90a   :  { %774 = vst.msk [vmem:[#allocation7] sm:$0xf] %vm773_vm5, %v768_v30 }
 0x90b   :  { %v902_v31 = vpack.c.bf16 %v900_v29, %v900_v29 }
 0x90c   :  { %v1247_v32 = vpop.eup %1246 }
 0x90d   :  { %v901_v33 = vmul.f32 %v1247_v32, %v1243_v19  ;;  %1184 = vmatmul.mubr.msk.bf16.vlgmr.msra.gmra.mrb[28].mxu0 %vm54_vm1, %v902_v31 }
 0x90f   :  { %v903_v4 = vpack.c.bf16 %v901_v33, %v901_v33 }
 0x911   :  { %1190 = vmatmul.mubr.msk.bf16.vlgmr.msra.gmra.mrb[28].mxu1 %vm54_vm1, %v903_v4 }
 0x9e0   :  { %v946_v34 = vpop.f32.mrb[28].mxu0 }
 0x9e1   :  { %v1063_v35 = vpack.c.bf16 %v946_v34, %v946_v34  ;;  %v1185_v36 = vpop.f32.mrb[29].mxu0 }
 0x9e2   :  { %v949_v37 = vpop.f32.mrb[30].mxu0 }
 0x9e3   :  { %1008 = vrot.lane.b32.xlu0 %v1063_v35, %s1339_s18  ;;  %v1186_v38 = vpop.f32.mrb[31].mxu0 }
 0x9e4   :  { %v994_v39 = vpop.f32.mrb[28].mxu1 }
 0x9e5   :  { %v1064_v40 = vpack.c.bf16 %v994_v39, %v994_v39  ;;  %v1191_v41 = vpop.f32.mrb[29].mxu1 }
 0x9e6   :  { %v997_v42 = vpop.f32.mrb[30].mxu1 }
 0x9e7   :  { %1010 = vrot.lane.b32.xlu1 %v1064_v40, %s1339_s18  ;;  %v1192_v43 = vpop.f32.mrb[31].mxu1 }
 0xa55   :  { %v1009_v44 = vpop.permute.xlu0 %1008 }
 0xa56   :  { %1015 = vst.msk [vmem:[#allocation7] sm:$0xf] %vm1014_vm6, %v1009_v44 }
 0xa59   :  { %v1011_v45 = vpop.permute.xlu1 %1010 }
 0xa5a   :  { %1016 = vst.msk [vmem:[#allocation7 + $0x4] sm:$0xf] %vm1014_vm6, %v1011_v45 }
 0xa5b   :  { %1303 = shalt.err (!%p1300_p6)
}
 0xa5c   :  { %s1304_s26 = scalar_lea.hbm %s1552_s2, 128 }
 0xa5d   :  { %p1305_p7 = scmp.ne.s32.totalorder %s1552_s2, %s1304_s26  ;;  %p1308_p8 = scmp.lt.u32.totalorder %s1304_s26, %s1552_s2 }
 0xa5f   :  { %p1310_p9 = pnand %p1308_p8, %p1305_p7 }
 0xa61   :  { %1313 = shalt.err (!%p1310_p9)
}
 0xa62   :  { %1028 = dma.vmem_to_hbm [thread:$0]  %s1023_s22, 128, %s1552_s2, [#allocation4], %s1321_s19, %s1321_s19, %s1322_s20  }
 0xa63   :  { %1318 = dma.done.wait [#allocation4], 128  }
 0xa64   :  { %1319 = vsyncadd [#allocation4], 4294967168 }
 0xa65   :  { %1032 = vsyncpa [#allocation3], 1 }
 0xa66   :  { %1033 = vsyncpa [#allocation6], 1 }
 0xa67   :  { %1034 = vsyncpa [#allocation4], 1 }

// kernel: _lambda_.18
= control target key start
LH: loop header
LB: loop body
LE: loop exit
PB: predicated region body
PF: predicated region fallthrough
CT: control target
= control target key end

     0   :  { %8 = vsyncpa [#allocation3], 0  ;;  %s402_s0 = inlined_call_operand.hbm [shape: bf16[16,32], index: 0, kind: input, shape index: {}]   ;;  %s403_s1 = inlined_call_operand.hbm [shape: bf16[32,128], index: 1, kind: input, shape index: {}]   ;;  %s404_s2 = inlined_call_operand.hbm [shape: f32[1,128], index: 2, kind: input, shape index: {}]   ;;  %s405_s3 = inlined_call_operand.hbm [shape: bf16[16,128], index: 3, kind: output, shape index: {}]  }
   0x1   :  { %9 = vsyncpa [#allocation6], 0 }
   0x2   :  { %10 = vsyncpa [#allocation4], 0  ;;  %s310_s12 = smov [#allocation5]   ;;  %s311_s14 = smov [#allocation2]  }
   0x3   :  { %s28_s13 = sshll.u32 %s310_s12, 4  ;;  %s16_s15 = sshll.u32 %s311_s14, 4  ;;  %s29_s13 = int_to_ptr.vmem [resolvable:$true] %s28_s13  ;;  %s338_s15 = int_to_ptr.vmem [resolvable:$true] %s16_s15 }
   0x4   :  { %s216_s18 = scalar_lea.hbm %s403_s1, 256 }
   0x5   :  { %p217_p0 = scmp.ne.s32.totalorder %s403_s1, %s216_s18  ;;  %p220_p1 = scmp.lt.u32.totalorder %s216_s18, %s403_s1 }
   0x7   :  { %p222_p2 = pnand %p220_p1, %p217_p0 }
   0x9   :  { %225 = shalt.err (!%p222_p2)
}
   0xa   :  { %s226_s23 = scalar_lea.vmem %s29_s13, 256  ;;  %p231_p4 = scmp.lt.s32.totalorder %s29_s13, %s29_s13 }
   0xb   :  { %p227_p3 = scmp.ne.s32.totalorder %s29_s13, %s226_s23  ;;  %p232_p5 = scmp.lt.s32.totalorder %s226_s23, %s226_s23 }
   0xd   :  { %p233_p6 = por %p232_p5, %p231_p4 }
   0xf   :  { %p234_p7 = pnand %p233_p6, %p227_p3 }
  0x11   :  { %237 = shalt.err (!%p234_p7)
}
  0x12   :  { %s312_s24 = smov 64   ;;  %s313_s25 = smov 4  }
  0x13   :  { %34 = dma.hbm_to_vmem [thread:$0]  %s403_s1, 256, %s29_s13, [#allocation6], %s312_s24, %s312_s24, %s313_s25  }
  0x14   :  { %s238_s30 = scalar_lea.hbm %s402_s0, 128 }
  0x15   :  { %p239_p8 = scmp.ne.s32.totalorder %s402_s0, %s238_s30  ;;  %p242_p9 = scmp.lt.u32.totalorder %s238_s30, %s402_s0 }
  0x17   :  { %p244_p10 = pnand %p242_p9, %p239_p8 }
  0x19   :  { %247 = shalt.err (!%p244_p10)
}
  0x1a   :  { %s248_s8 = scalar_lea.vmem %s338_s15, 128  ;;  %p253_p12 = scmp.lt.s32.totalorder %s338_s15, %s338_s15 }
  0x1b   :  { %p249_p11 = scmp.ne.s32.totalorder %s338_s15, %s248_s8  ;;  %p254_p13 = scmp.lt.s32.totalorder %s248_s8, %s248_s8 }
  0x1d   :  { %p255_p0 = por %p254_p13, %p253_p12 }
  0x1f   :  { %p256_p1 = pnand %p255_p0, %p249_p11 }
  0x21   :  { %259 = shalt.err (!%p256_p1)
}
  0x22   :  { %22 = dma.hbm_to_vmem [thread:$0]  %s402_s0, 128, %s338_s15, [#allocation3], %s312_s24, %s312_s24, %s313_s25  }
  0x23   :  { %s314_s10 = smov [#allocation7]   ;;  %s260_s14 = scalar_lea.hbm %s404_s2, 16 }
  0x24   :  { %s41_s11 = sshll.u32 %s314_s10, 4  ;;  %p261_p2 = scmp.ne.s32.totalorder %s404_s2, %s260_s14  ;;  %s42_s11 = int_to_ptr.vmem [resolvable:$true] %s41_s11 }
  0x25   :  { %p264_p3 = scmp.lt.u32.totalorder %s260_s14, %s404_s2 }
  0x27   :  { %p266_p4 = pnand %p264_p3, %p261_p2 }
  0x29   :  { %269 = shalt.err (!%p266_p4)
}
  0x2a   :  { %s270_s20 = scalar_lea.vmem %s42_s11, 16  ;;  %s274_s0 = scalar_lea.vmem %s42_s11, 32 }
  0x2b   :  { %p271_p5 = scmp.ne.s32.totalorder %s42_s11, %s270_s20  ;;  %p275_p6 = scmp.lt.s32.totalorder %s42_s11, %s42_s11 }
  0x2c   :  { %p276_p7 = scmp.lt.s32.totalorder %s274_s0, %s270_s20 }
  0x2e   :  { %p277_p8 = por %p276_p7, %p275_p6 }
  0x30   :  { %p278_p9 = pnand %p277_p8, %p271_p5 }
  0x32   :  { %281 = shalt.err (!%p278_p9)
}
  0x33   :  { %44 = dma.hbm_to_vmem [thread:$0]  %s404_s2, 16, %s42_s11, [#allocation6]  }
  0x34   :  { %304 = dma.done.wait [#allocation3], 128  }
  0x35   :  { %305 = vsyncadd [#allocation3], 4294967168 }
  0x36   :  { %306 = dma.done.wait [#allocation6], 272  }
  0x37   :  { %307 = vsyncadd [#allocation6], 4294967024  ;;  %v315_v0 = vmov 0.0   ;;  %vm316_vm0 = vmmov 0   ;;  %v209_v1 = vld [vmem:[#allocation5] sm:$0xff]   ;;  %v210_v2 = vld [vmem:[#allocation5 + $0x8] sm:$0xff]  }
  0x38   :  { %193 = vmatprep.subr.bf16.mxu0 %v315_v0  ;;  %197 = vmatprep.mubr.msk.bf16.mxu0 %vm316_vm0, %v315_v0  ;;  %v211_v3 = vld [vmem:[#allocation2] sm:$0xff]   ;;  %vm85_vm1 = vcmask 261120   ;;  %v176_v4 = vld [vmem:[#allocation7] ss:$0 sm:$0xff]  ;;  %s317_s2 = smov [#allocation8]  }
  0x39   :  { %194 = vmatpush3.bf16.msra.mxu0 %v209_v1  ;;  %s163_s22 = sshll.u32 %s317_s2, 4  ;;  %s164_s22 = int_to_ptr.vmem [resolvable:$true] %s163_s22 }
  0x3a   :  { %195 = vmatprep.subr.bf16.mxu0 %v315_v0  ;;  %s282_s23 = scalar_lea.vmem %s164_s22, 128  ;;  %p287_p11 = scmp.lt.s32.totalorder %s164_s22, %s164_s22 }
  0x3b   :  { %p283_p10 = scmp.ne.s32.totalorder %s164_s22, %s282_s23  ;;  %p288_p12 = scmp.lt.s32.totalorder %s282_s23, %s282_s23 }
  0x3d   :  { %196 = vmatpush3.bf16.msra.mxu0 %v210_v2  ;;  %p289_p13 = por %p288_p12, %p287_p11 }
  0x3f   :  { %p290_p0 = pnand %p289_p13, %p283_p10 }
  0x40   :  { %198 = vmatmul.mubr.msk.bf16.vlgmr.msra.gmra.mrb[0].mxu0 %vm85_vm1, %v211_v3 }
 0x113   :  { %v123_v5 = vpop.f32.mrb[0].mxu0 }
 0x114   :  { %v124_v6 = vadd.f32 %v176_v4, %v123_v5  ;;  %v199_v7 = vpop.f32.mrb[1].mxu0 }
 0x115   :  { %v126_v8 = vpop.f32.mrb[2].mxu0 }
 0x116   :  { %v130_v9 = vmul.f32 %v124_v6, %v124_v6  ;;  %v127_v10 = vadd.f32 %v176_v4, %v126_v8  ;;  %v200_v11 = vpop.f32.mrb[3].mxu0 }
 0x118   :  { %v132_v12 = vmul.f32 %v130_v9, %v124_v6  ;;  %v131_v13 = vmul.f32 %v127_v10, %v127_v10 }
 0x11a   :  { %v134_v14 = vmul.f32 0.044715, %v132_v12  ;;  %v133_v15 = vmul.f32 %v131_v13, %v127_v10 }
 0x11c   :  { %v136_v16 = vadd.f32 %v134_v14, %v124_v6  ;;  %v135_v17 = vmul.f32 0.044715, %v133_v15 }
 0x11e   :  { %v138_v18 = vmul.f32 0.7978846, %v136_v16  ;;  %v137_v19 = vadd.f32 %v135_v17, %v127_v10 }
 0x120   :  { %212 = vtanh.f32 %v138_v18  ;;  %v139_v20 = vmul.f32 0.7978846, %v137_v19 }
 0x122   :  { %214 = vtanh.f32 %v139_v20 }
 0x12a   :  { %v213_v21 = vpop.eup %212 }
 0x12b   :  { %v142_v22 = vadd.f32 1.0, %v213_v21 }
 0x12c   :  { %v215_v23 = vpop.eup %214 }
 0x12d   :  { %v143_v24 = vadd.f32 1.0, %v215_v23  ;;  %v144_v25 = vmul.f32 0.5, %v142_v22 }
 0x12f   :  { %v145_v26 = vmul.f32 0.5, %v143_v24  ;;  %v146_v27 = vmul.f32 %v144_v25, %v124_v6 }
 0x131   :  { %v147_v28 = vmul.f32 %v145_v26, %v127_v10 }
 0x133   :  { %v188_v29 = vpack.c.bf16 %v147_v28, %v146_v27 }
 0x135   :  { %189 = vst [vmem:[#allocation8] sm:$0xff] %v188_v29  }
 0x136   :  { %293 = shalt.err (!%p290_p0)
}
 0x137   :  { %s294_s28 = scalar_lea.hbm %s405_s3, 128 }
 0x138   :  { %p295_p1 = scmp.ne.s32.totalorder %s405_s3, %s294_s28  ;;  %p298_p2 = scmp.lt.u32.totalorder %s294_s28, %s405_s3 }
 0x13a   :  { %p300_p3 = pnand %p298_p2, %p295_p1 }
 0x13c   :  { %303 = shalt.err (!%p300_p3)
}
 0x13d   :  { %169 = dma.vmem_to_hbm [thread:$0]  %s164_s22, 128, %s405_s3, [#allocation4], %s312_s24, %s312_s24, %s313_s25  }
 0x13e   :  { %308 = dma.done.wait [#allocation4], 128  }
 0x13f   :  { %309 = vsyncadd [#allocation4], 4294967168 }
 0x140   :  { %173 = vsyncpa [#allocation3], 1 }
 0x141   :  { %174 = vsyncpa [#allocation6], 1 }
 0x142   :  { %175 = vsyncpa [#allocation4], 1 }

// kernel: _lambda_.19
= control target key start
LH: loop header
LB: loop body
LE: loop exit
PB: predicated region body
PF: predicated region fallthrough
CT: control target
= control target key end

     0   :  { %11 = vsyncpa [#allocation3], 0  ;;  %s694_s0 = inlined_call_operand.hbm [shape: bf16[16,128], index: 0, kind: input, shape index: {}]   ;;  %s695_s1 = inlined_call_operand.hbm [shape: bf16[128,32], index: 1, kind: input, shape index: {}]   ;;  %s696_s2 = inlined_call_operand.hbm [shape: f32[1,32], index: 2, kind: input, shape index: {}]   ;;  %s697_s3 = inlined_call_operand.hbm [shape: bf16[16,32], index: 3, kind: input, shape index: {}]   ;;  %s698_s4 = inlined_call_operand.hbm [shape: f32[1,32], index: 4, kind: input, shape index: {}]   ;;  %s699_s5 = inlined_call_operand.hbm [shape: f32[1,32], index: 5, kind: input, shape index: {}]   ;;  %s700_s6 = inlined_call_operand.hbm [shape: bf16[16,32], index: 6, kind: output, shape index: {}]  }
   0x1   :  { %12 = vsyncpa [#allocation6], 0 }
   0x2   :  { %13 = vsyncpa [#allocation9], 0 }
   0x3   :  { %14 = vsyncpa [#allocation12], 0 }
   0x4   :  { %15 = vsyncpa [#allocation4], 0  ;;  %s541_s21 = smov [#allocation5]   ;;  %s542_s23 = smov [#allocation8]  }
   0x5   :  { %s33_s22 = sshll.u32 %s541_s21, 4  ;;  %s55_s24 = sshll.u32 %s542_s23, 4  ;;  %s34_s22 = int_to_ptr.vmem [resolvable:$true] %s33_s22  ;;  %s587_s24 = int_to_ptr.vmem [resolvable:$true] %s55_s24 }
   0x6   :  { %s377_s27 = scalar_lea.hbm %s695_s1, 1024 }
   0x7   :  { %p378_p0 = scmp.ne.s32.totalorder %s695_s1, %s377_s27  ;;  %p381_p1 = scmp.lt.u32.totalorder %s377_s27, %s695_s1 }
   0x9   :  { %p383_p2 = pnand %p381_p1, %p378_p0 }
   0xb   :  { %386 = shalt.err (!%p383_p2)
}
   0xc   :  { %s387_s8 = scalar_lea.vmem %s34_s22, 1024  ;;  %p392_p4 = scmp.lt.s32.totalorder %s34_s22, %s34_s22 }
   0xd   :  { %p388_p3 = scmp.ne.s32.totalorder %s34_s22, %s387_s8  ;;  %p393_p5 = scmp.lt.s32.totalorder %s387_s8, %s387_s8 }
   0xf   :  { %p394_p6 = por %p393_p5, %p392_p4 }
  0x11   :  { %p395_p7 = pnand %p394_p6, %p388_p3 }
  0x13   :  { %398 = shalt.err (!%p395_p7)
}
  0x14   :  { %s543_s9 = smov 64   ;;  %s544_s10 = smov 4  }
  0x15   :  { %39 = dma.hbm_to_vmem [thread:$0]  %s695_s1, 1024, %s34_s22, [#allocation6], %s543_s9, %s543_s9, %s544_s10  }
  0x16   :  { %s399_s15 = scalar_lea.hbm %s697_s3, 128 }
  0x17   :  { %p400_p8 = scmp.ne.s32.totalorder %s697_s3, %s399_s15  ;;  %p403_p9 = scmp.lt.u32.totalorder %s399_s15, %s697_s3 }
  0x19   :  { %p405_p10 = pnand %p403_p9, %p400_p8 }
  0x1b   :  { %408 = shalt.err (!%p405_p10)
}
  0x1c   :  { %s409_s20 = scalar_lea.vmem %s587_s24, 128  ;;  %p414_p12 = scmp.lt.s32.totalorder %s587_s24, %s587_s24 }
  0x1d   :  { %p410_p11 = scmp.ne.s32.totalorder %s587_s24, %s409_s20  ;;  %p415_p13 = scmp.lt.s32.totalorder %s409_s20, %s409_s20 }
  0x1f   :  { %p416_p0 = por %p415_p13, %p414_p12 }
  0x21   :  { %p417_p1 = pnand %p416_p0, %p410_p11 }
  0x23   :  { %420 = shalt.err (!%p417_p1)
}
  0x24   :  { %61 = dma.hbm_to_vmem [thread:$0]  %s697_s3, 128, %s587_s24, [#allocation9], %s543_s9, %s543_s9, %s544_s10  }
  0x25   :  { %s545_s22 = smov [#allocation2]   ;;  %s546_s25 = smov [#allocation7]  }
  0x26   :  { %s21_s23 = sshll.u32 %s545_s22, 4  ;;  %s46_s26 = sshll.u32 %s546_s25, 4  ;;  %s22_s23 = int_to_ptr.vmem [resolvable:$true] %s21_s23  ;;  %s47_s26 = int_to_ptr.vmem [resolvable:$true] %s46_s26 }
  0x27   :  { %s421_s29 = scalar_lea.hbm %s694_s0, 128 }
  0x28   :  { %p422_p2 = scmp.ne.s32.totalorder %s694_s0, %s421_s29  ;;  %p425_p3 = scmp.lt.u32.totalorder %s421_s29, %s694_s0 }
  0x2a   :  { %p427_p4 = pnand %p425_p3, %p422_p2 }
  0x2c   :  { %430 = shalt.err (!%p427_p4)
}
  0x2d   :  { %s431_s3 = scalar_lea.vmem %s22_s23, 128  ;;  %p436_p6 = scmp.lt.s32.totalorder %s22_s23, %s22_s23 }
  0x2e   :  { %p432_p5 = scmp.ne.s32.totalorder %s22_s23, %s431_s3  ;;  %p437_p7 = scmp.lt.s32.totalorder %s431_s3, %s431_s3 }
  0x30   :  { %p438_p8 = por %p437_p7, %p436_p6 }
  0x32   :  { %p439_p9 = pnand %p438_p8, %p432_p5 }
  0x34   :  { %442 = shalt.err (!%p439_p9)
}
  0x35   :  { %27 = dma.hbm_to_vmem [thread:$0]  %s694_s0, 128, %s22_s23, [#allocation3], %s543_s9, %s543_s9, %s544_s10  }
  0x36   :  { %s443_s15 = scalar_lea.hbm %s696_s2, 16 }
  0x37   :  { %p444_p10 = scmp.ne.s32.totalorder %s696_s2, %s443_s15  ;;  %p447_p11 = scmp.lt.u32.totalorder %s443_s15, %s696_s2 }
  0x39   :  { %p449_p12 = pnand %p447_p11, %p444_p10 }
  0x3b   :  { %452 = shalt.err (!%p449_p12)
}
  0x3c   :  { %s453_s20 = scalar_lea.vmem %s47_s26, 16  ;;  %s457_s1 = scalar_lea.vmem %s47_s26, 32 }
  0x3d   :  { %p454_p13 = scmp.ne.s32.totalorder %s47_s26, %s453_s20  ;;  %p458_p0 = scmp.lt.s32.totalorder %s47_s26, %s47_s26 }
  0x3e   :  { %p459_p1 = scmp.lt.s32.totalorder %s457_s1, %s453_s20 }
  0x40   :  { %p460_p2 = por %p459_p1, %p458_p0 }
  0x42   :  { %p461_p3 = pnand %p460_p2, %p454_p13 }
  0x44   :  { %464 = shalt.err (!%p461_p3)
}
  0x45   :  { %49 = dma.hbm_to_vmem [thread:$0]  %s696_s2, 16, %s47_s26, [#allocation6]  }
  0x46   :  { %s547_s22 = smov [#allocation10]   ;;  %s548_s25 = smov [#allocation11]  }
  0x47   :  { %s68_s23 = sshll.u32 %s547_s22, 4  ;;  %s78_s27 = sshll.u32 %s548_s25, 4  ;;  %s69_s23 = int_to_ptr.vmem [resolvable:$true] %s68_s23  ;;  %s79_s27 = int_to_ptr.vmem [resolvable:$true] %s78_s27 }
  0x48   :  { %s465_s30 = scalar_lea.hbm %s698_s4, 16 }
  0x49   :  { %p466_p4 = scmp.ne.s32.totalorder %s698_s4, %s465_s30  ;;  %p469_p5 = scmp.lt.u32.totalorder %s465_s30, %s698_s4 }
  0x4b   :  { %p471_p6 = pnand %p469_p5, %p466_p4 }
  0x4d   :  { %474 = shalt.err (!%p471_p6)
}
  0x4e   :  { %s475_s2 = scalar_lea.vmem %s69_s23, 16  ;;  %s479_s26 = scalar_lea.vmem %s69_s23, 32 }
  0x4f   :  { %p476_p7 = scmp.ne.s32.totalorder %s69_s23, %s475_s2  ;;  %p480_p8 = scmp.lt.s32.totalorder %s69_s23, %s69_s23 }
  0x50   :  { %p481_p9 = scmp.lt.s32.totalorder %s479_s26, %s475_s2 }
  0x52   :  { %p482_p10 = por %p481_p9, %p480_p8 }
  0x54   :  { %p483_p11 = pnand %p482_p10, %p476_p7 }
  0x56   :  { %486 = shalt.err (!%p483_p11)
}
  0x57   :  { %71 = dma.hbm_to_vmem [thread:$0]  %s698_s4, 16, %s69_s23, [#allocation9]  }
  0x58   :  { %s487_s15 = scalar_lea.hbm %s699_s5, 16 }
  0x59   :  { %p488_p12 = scmp.ne.s32.totalorder %s699_s5, %s487_s15  ;;  %p491_p13 = scmp.lt.u32.totalorder %s487_s15, %s699_s5 }
  0x5b   :  { %p493_p0 = pnand %p491_p13, %p488_p12 }
  0x5d   :  { %496 = shalt.err (!%p493_p0)
}
  0x5e   :  { %s497_s20 = scalar_lea.vmem %s79_s27, 16  ;;  %s501_s1 = scalar_lea.vmem %s79_s27, 32 }
  0x5f   :  { %p498_p1 = scmp.ne.s32.totalorder %s79_s27, %s497_s20  ;;  %p502_p2 = scmp.lt.s32.totalorder %s79_s27, %s79_s27 }
  0x60   :  { %p503_p3 = scmp.lt.s32.totalorder %s501_s1, %s497_s20 }
  0x62   :  { %p504_p4 = por %p503_p3, %p502_p2 }
  0x64   :  { %p505_p5 = pnand %p504_p4, %p498_p1 }
  0x66   :  { %508 = shalt.err (!%p505_p5)
}
  0x67   :  { %81 = dma.hbm_to_vmem [thread:$0]  %s699_s5, 16, %s79_s27, [#allocation12]  }
  0x68   :  { %531 = dma.done.wait [#allocation3], 128  }
  0x69   :  { %532 = vsyncadd [#allocation3], 4294967168 }
  0x6a   :  { %533 = dma.done.wait [#allocation6], 1040  }
  0x6b   :  { %534 = vsyncadd [#allocation6], 4294966256 }
  0x6c   :  { %535 = dma.done.wait [#allocation9], 144  }
  0x6d   :  { %536 = vsyncadd [#allocation9], 4294967152 }
  0x6e   :  { %537 = dma.done.wait [#allocation12], 16  }
  0x6f   :  { %538 = vsyncadd [#allocation12], 4294967280  ;;  %v549_v0 = vmov 0.0   ;;  %vm550_vm0 = vmmov 0   ;;  %v364_v1 = vld [vmem:[#allocation5] sm:$0xff]   ;;  %v365_v2 = vld [vmem:[#allocation5 + $0x8] sm:$0xff]  }
  0x70   :  { %333 = vmatprep.subr.bf16.mxu0 %v549_v0  ;;  %349 = vmatprep.mubr.msk.bf16.mxu0 %vm550_vm0, %v549_v0  ;;  %v366_v3 = vld [vmem:[#allocation5 + $0x10] sm:$0xff]   ;;  %v367_v4 = vld [vmem:[#allocation5 + $0x18] sm:$0xff]   ;;  %v368_v5 = vld [vmem:[#allocation5 + $0x20] sm:$0xff]   ;;  %vm227_vm1 = vcmask 261120   ;;  %vm281_vm2 = vcmask 257024   ;;  %s551_s5 = smov [#allocation13]  }
  0x71   :  { %334 = vmatpush3.bf16.msra.mxu0 %v364_v1  ;;  %v369_v6 = vld [vmem:[#allocation5 + $0x28] sm:$0xff]   ;;  %v370_v7 = vld [vmem:[#allocation5 + $0x30] sm:$0xff]   ;;  %v371_v8 = vld [vmem:[#allocation5 + $0x38] sm:$0xff]   ;;  %s289_s21 = sshll.u32 %s551_s5, 4  ;;  %s290_s21 = int_to_ptr.vmem [resolvable:$true] %s289_s21 }
  0x72   :  { %335 = vmatprep.subr.bf16.mxu0 %v549_v0  ;;  %v372_v9 = vld [vmem:[#allocation2] sm:$0xff]   ;;  %v321_v10 = vld [vmem:[#allocation8] sm:$0xff]   ;;  %v304_v11 = vld [vmem:[#allocation7] ss:$0 sm:$0xff]  ;;  %s509_s22 = scalar_lea.vmem %s290_s21, 128  ;;  %p514_p7 = scmp.lt.s32.totalorder %s290_s21, %s290_s21 }
  0x73   :  { %v322_v12 = vunpack.c.l.bf16 %v321_v10  ;;  %v323_v16 = vunpack.c.h.bf16 %v321_v10  ;;  %v314_v41 = vld [vmem:[#allocation10] ss:$0 sm:$0xff]  ;;  %v315_v43 = vld [vmem:[#allocation11] ss:$0 sm:$0xff]  ;;  %p510_p6 = scmp.ne.s32.totalorder %s290_s21, %s509_s22  ;;  %p515_p8 = scmp.lt.s32.totalorder %s509_s22, %s509_s22 }
  0x75   :  { %336 = vmatpush3.bf16.msra.mxu0 %v365_v2  ;;  %p516_p9 = por %p515_p8, %p514_p7 }
  0x76   :  { %337 = vmatprep.subr.bf16.mxu0 %v549_v0 }
  0x77   :  { %p517_p10 = pnand %p516_p9, %p510_p6 }
  0x79   :  { %338 = vmatpush3.bf16.msra.mxu0 %v366_v3 }
  0x7a   :  { %339 = vmatprep.subr.bf16.mxu0 %v549_v0 }
  0x7d   :  { %340 = vmatpush3.bf16.msra.mxu0 %v367_v4 }
  0x7e   :  { %341 = vmatprep.subr.bf16.mxu0 %v549_v0 }
  0x81   :  { %342 = vmatpush3.bf16.msra.mxu0 %v368_v5 }
  0x82   :  { %343 = vmatprep.subr.bf16.mxu0 %v549_v0 }
  0x85   :  { %344 = vmatpush3.bf16.msra.mxu0 %v369_v6 }
  0x86   :  { %345 = vmatprep.subr.bf16.mxu0 %v549_v0 }
  0x89   :  { %346 = vmatpush3.bf16.msra.mxu0 %v370_v7 }
  0x8a   :  { %347 = vmatprep.subr.bf16.mxu0 %v549_v0 }
  0x8d   :  { %348 = vmatpush3.bf16.msra.mxu0 %v371_v8 }
  0x90   :  { %350 = vmatmul.mubr.bf16.vlgmr.msra.gmra.mrb[0].mxu0 %v372_v9 }
 0x163   :  { %v214_v13 = vpop.f32.mrb[0].mxu0 }
 0x164   :  { %v215_v14 = vadd.f32 %v304_v11, %v214_v13  ;;  %v351_v15 = vpop.f32.mrb[1].mxu0 }
 0x165   :  { %v217_v17 = vpop.f32.mrb[2].mxu0 }
 0x166   :  { %v218_v18 = vadd.f32 %v304_v11, %v217_v17  ;;  %v352_v19 = vpop.f32.mrb[3].mxu0  ;;  %v225_v20 = vadd.f32 %v322_v12, %v215_v14 }
 0x168   :  { %v228_v21 = vsel %vm227_vm1, %v225_v20, 0.0  ;;  %v226_v22 = vadd.f32 %v323_v16, %v218_v18 }
 0x169   :  { %229 = vadd.xlane.f32.xlu0 %v228_v21 }
 0x16a   :  { %v231_v23 = vsel %vm227_vm1, %v226_v22, 0.0 }
 0x16d   :  { %232 = vadd.xlane.f32.xlu0 %v231_v23 }
 0x1f6   :  { %v230_v24 = vpop.xlane.xlu0 %229 }
 0x1f7   :  { %v235_v25 = vmul.f32 0.03125, %v230_v24 }
 0x1f9   :  { %v237_v26 = vsub.f32 %v225_v20, %v235_v25 }
 0x1fa   :  { %v233_v27 = vpop.xlane.xlu0 %232 }
 0x1fb   :  { %v236_v28 = vmul.f32 0.03125, %v233_v27  ;;  %v239_v29 = vmul.f32 %v237_v26, %v237_v26 }
 0x1fd   :  { %v238_v30 = vsub.f32 %v226_v22, %v236_v28  ;;  %v241_v31 = vsel %vm227_vm1, %v239_v29, 0.0 }
 0x1fe   :  { %242 = vadd.xlane.f32.xlu1 %v241_v31 }
 0x1ff   :  { %v240_v32 = vmul.f32 %v238_v30, %v238_v30 }
 0x201   :  { %v244_v33 = vsel %vm227_vm1, %v240_v32, 0.0 }
 0x202   :  { %245 = vadd.xlane.f32.xlu1 %v244_v33 }
 0x28b   :  { %v243_v34 = vpop.xlane.xlu1 %242 }
 0x28c   :  { %v247_v35 = vmul.f32 0.03125, %v243_v34 }
 0x28e   :  { %v249_v36 = vadd.f32 1e-05, %v247_v35 }
 0x28f   :  { %v246_v37 = vpop.xlane.xlu1 %245 }
 0x290   :  { %373 = vrsqrt.f32 %v249_v36  ;;  %v248_v38 = vmul.f32 0.03125, %v246_v37 }
 0x292   :  { %v250_v39 = vadd.f32 1e-05, %v248_v38 }
 0x294   :  { %375 = vrsqrt.f32 %v250_v39 }
 0x29a   :  { %v374_v40 = vpop.eup %373 }
 0x29b   :  { %v253_v42 = vmul.f32 %v374_v40, %v237_v26 }
 0x29d   :  { %v262_v44 = vmul.f32 %v314_v41, %v253_v42 }
 0x29e   :  { %v376_v45 = vpop.eup %375 }
 0x29f   :  { %v254_v46 = vmul.f32 %v376_v45, %v238_v30  ;;  %v271_v47 = vadd.f32 %v315_v43, %v262_v44 }
 0x2a1   :  { %v263_v48 = vmul.f32 %v314_v41, %v254_v46  ;;  %v318_v49 = vpack.c.bf16 %v271_v47, %v271_v47 }
 0x2a3   :  { %v272_v50 = vadd.f32 %v315_v43, %v263_v48  ;;  %282 = vst.msk [vmem:[#allocation13] sm:$0xf] %vm281_vm2, %v318_v49 }
 0x2a5   :  { %v319_v51 = vpack.c.bf16 %v272_v50, %v272_v50 }
 0x2a7   :  { %283 = vst.msk [vmem:[#allocation13 + $0x4] sm:$0xf] %vm281_vm2, %v319_v51 }
 0x2a8   :  { %520 = shalt.err (!%p517_p10)
}
 0x2a9   :  { %s521_s27 = scalar_lea.hbm %s700_s6, 128 }
 0x2aa   :  { %p522_p11 = scmp.ne.s32.totalorder %s700_s6, %s521_s27  ;;  %p525_p12 = scmp.lt.u32.totalorder %s521_s27, %s700_s6 }
 0x2ac   :  { %p527_p13 = pnand %p525_p12, %p522_p11 }
 0x2ae   :  { %530 = shalt.err (!%p527_p13)
}
 0x2af   :  { %295 = dma.vmem_to_hbm [thread:$0]  %s290_s21, 128, %s700_s6, [#allocation4], %s543_s9, %s543_s9, %s544_s10  }
 0x2b0   :  { %539 = dma.done.wait [#allocation4], 128  }
 0x2b1   :  { %540 = vsyncadd [#allocation4], 4294967168 }
 0x2b2   :  { %299 = vsyncpa [#allocation3], 1 }
 0x2b3   :  { %300 = vsyncpa [#allocation6], 1 }
 0x2b4   :  { %301 = vsyncpa [#allocation9], 1 }
 0x2b5   :  { %302 = vsyncpa [#allocation12], 1 }
 0x2b6   :  { %303 = vsyncpa [#allocation4], 1 }

// kernel: _lambda_.27
= control target key start
LH: loop header
LB: loop body
LE: loop exit
PB: predicated region body
PF: predicated region fallthrough
CT: control target
= control target key end

     0   :  { %8 = vsyncpa [#allocation3], 0  ;;  %s348_s0 = inlined_call_operand.hbm [shape: bf16[16,12], index: 0, kind: input, shape index: {}]   ;;  %s349_s1 = inlined_call_operand.hbm [shape: bf16[12,128], index: 1, kind: input, shape index: {}]   ;;  %s350_s2 = inlined_call_operand.hbm [shape: f32[1,128], index: 2, kind: input, shape index: {}]   ;;  %s351_s3 = inlined_call_operand.hbm [shape: f32[16,128], index: 3, kind: output, shape index: {}]  }
   0x1   :  { %9 = vsyncpa [#allocation6], 0 }
   0x2   :  { %10 = vsyncpa [#allocation4], 0  ;;  %s263_s12 = smov [#allocation5]   ;;  %s264_s14 = smov [#allocation2]  }
   0x3   :  { %s28_s13 = sshll.u32 %s263_s12, 4  ;;  %s16_s15 = sshll.u32 %s264_s14, 4  ;;  %s29_s13 = int_to_ptr.vmem [resolvable:$true] %s28_s13  ;;  %s293_s15 = int_to_ptr.vmem [resolvable:$true] %s16_s15 }
   0x4   :  { %s169_s18 = scalar_lea.hbm %s349_s1, 128 }
   0x5   :  { %p170_p0 = scmp.ne.s32.totalorder %s349_s1, %s169_s18  ;;  %p173_p1 = scmp.lt.u32.totalorder %s169_s18, %s349_s1 }
   0x7   :  { %p175_p2 = pnand %p173_p1, %p170_p0 }
   0x9   :  { %178 = shalt.err (!%p175_p2)
}
   0xa   :  { %s179_s23 = scalar_lea.vmem %s29_s13, 128  ;;  %p184_p4 = scmp.lt.s32.totalorder %s29_s13, %s29_s13 }
   0xb   :  { %p180_p3 = scmp.ne.s32.totalorder %s29_s13, %s179_s23  ;;  %p185_p5 = scmp.lt.s32.totalorder %s179_s23, %s179_s23 }
   0xd   :  { %p186_p6 = por %p185_p5, %p184_p4 }
   0xf   :  { %p187_p7 = pnand %p186_p6, %p180_p3 }
  0x11   :  { %190 = shalt.err (!%p187_p7)
}
  0x12   :  { %s265_s24 = smov 64   ;;  %s266_s25 = smov 4  }
  0x13   :  { %34 = dma.hbm_to_vmem [thread:$0]  %s349_s1, 128, %s29_s13, [#allocation6], %s265_s24, %s265_s24, %s266_s25  }
  0x14   :  { %s191_s30 = scalar_lea.hbm %s348_s0, 128 }
  0x15   :  { %p192_p8 = scmp.ne.s32.totalorder %s348_s0, %s191_s30  ;;  %p195_p9 = scmp.lt.u32.totalorder %s191_s30, %s348_s0 }
  0x17   :  { %p197_p10 = pnand %p195_p9, %p192_p8 }
  0x19   :  { %200 = shalt.err (!%p197_p10)
}
  0x1a   :  { %s201_s8 = scalar_lea.vmem %s293_s15, 128  ;;  %p206_p12 = scmp.lt.s32.totalorder %s293_s15, %s293_s15 }
  0x1b   :  { %p202_p11 = scmp.ne.s32.totalorder %s293_s15, %s201_s8  ;;  %p207_p13 = scmp.lt.s32.totalorder %s201_s8, %s201_s8 }
  0x1d   :  { %p208_p0 = por %p207_p13, %p206_p12 }
  0x1f   :  { %p209_p1 = pnand %p208_p0, %p202_p11 }
  0x21   :  { %212 = shalt.err (!%p209_p1)
}
  0x22   :  { %22 = dma.hbm_to_vmem [thread:$0]  %s348_s0, 128, %s293_s15, [#allocation3], %s265_s24, %s265_s24, %s266_s25  }
  0x23   :  { %s267_s10 = smov [#allocation7]   ;;  %s213_s14 = scalar_lea.hbm %s350_s2, 16 }
  0x24   :  { %s41_s11 = sshll.u32 %s267_s10, 4  ;;  %p214_p2 = scmp.ne.s32.totalorder %s350_s2, %s213_s14  ;;  %s42_s11 = int_to_ptr.vmem [resolvable:$true] %s41_s11 }
  0x25   :  { %p217_p3 = scmp.lt.u32.totalorder %s213_s14, %s350_s2 }
  0x27   :  { %p219_p4 = pnand %p217_p3, %p214_p2 }
  0x29   :  { %222 = shalt.err (!%p219_p4)
}
  0x2a   :  { %s223_s20 = scalar_lea.vmem %s42_s11, 16  ;;  %s227_s0 = scalar_lea.vmem %s42_s11, 32 }
  0x2b   :  { %p224_p5 = scmp.ne.s32.totalorder %s42_s11, %s223_s20  ;;  %p228_p6 = scmp.lt.s32.totalorder %s42_s11, %s42_s11 }
  0x2c   :  { %p229_p7 = scmp.lt.s32.totalorder %s227_s0, %s223_s20 }
  0x2e   :  { %p230_p8 = por %p229_p7, %p228_p6 }
  0x30   :  { %p231_p9 = pnand %p230_p8, %p224_p5 }
  0x32   :  { %234 = shalt.err (!%p231_p9)
}
  0x33   :  { %44 = dma.hbm_to_vmem [thread:$0]  %s350_s2, 16, %s42_s11, [#allocation6]  }
  0x34   :  { %257 = dma.done.wait [#allocation3], 128  }
  0x35   :  { %258 = vsyncadd [#allocation3], 4294967168 }
  0x36   :  { %259 = dma.done.wait [#allocation6], 144  }
  0x37   :  { %260 = vsyncadd [#allocation6], 4294967152  ;;  %v268_v0 = vmov 0.0   ;;  %vm269_vm0 = vmmov 0   ;;  %vm80_vm1 = vcmask 1045504   ;;  %v168_v3 = vld [vmem:[#allocation2] sm:$0xff]  }
  0x38   :  { %151 = vmatprep.subr.bf16.mxu0 %v268_v0  ;;  %153 = vmatprep.mubr.msk.bf16.mxu0 %vm269_vm0, %v268_v0  ;;  %v167_v1 = vld [vmem:[#allocation5] sm:$0x3f]   ;;  %vm76_vm2 = vcmask 97280   ;;  %v145_v4 = vld [vmem:[#allocation7] ss:$0 sm:$0xff]  ;;  %s270_s22 = smov [#allocation8]  }
  0x39   :  { %v82_v2 = vsel %vm80_vm1, %v167_v1, 0  ;;  %s132_s23 = sshll.u32 %s270_s22, 4  ;;  %s133_s23 = int_to_ptr.vmem [resolvable:$true] %s132_s23 }
  0x3a   :  { %152 = vmatpush3.bf16.msra.mxu0 %v82_v2  ;;  %s235_s2 = scalar_lea.vmem %s133_s23, 256  ;;  %p240_p11 = scmp.lt.s32.totalorder %s133_s23, %s133_s23 }
  0x3b   :  { %p236_p10 = scmp.ne.s32.totalorder %s133_s23, %s235_s2  ;;  %p241_p12 = scmp.lt.s32.totalorder %s235_s2, %s235_s2 }
  0x3d   :  { %154 = vmatmul.mubr.msk.bf16.vlgmr.msra.gmra.mrb[0].mxu0 %vm76_vm2, %v168_v3  ;;  %p242_p13 = por %p241_p12, %p240_p11 }
  0x3f   :  { %p243_p0 = pnand %p242_p13, %p236_p10 }
 0x110   :  { %v118_v5 = vpop.f32.mrb[0].mxu0 }
 0x111   :  { %v119_v6 = vadd.f32 %v145_v4, %v118_v5  ;;  %v155_v7 = vpop.f32.mrb[1].mxu0 }
 0x112   :  { %v121_v8 = vpop.f32.mrb[2].mxu0 }
 0x113   :  { %125 = vst [vmem:[#allocation8] sm:$0xff] %v119_v6  ;;  %v122_v9 = vadd.f32 %v145_v4, %v121_v8  ;;  %v156_v10 = vpop.f32.mrb[3].mxu0 }
 0x115   :  { %126 = vst [vmem:[#allocation8 + $0x8] sm:$0xff] %v122_v9 }
 0x116   :  { %246 = shalt.err (!%p243_p0)
}
 0x117   :  { %s247_s26 = scalar_lea.hbm %s351_s3, 256 }
 0x118   :  { %p248_p1 = scmp.ne.s32.totalorder %s351_s3, %s247_s26  ;;  %p251_p2 = scmp.lt.u32.totalorder %s247_s26, %s351_s3 }
 0x11a   :  { %p253_p3 = pnand %p251_p2, %p248_p1 }
 0x11c   :  { %256 = shalt.err (!%p253_p3)
}
 0x11d   :  { %s271_s4 = smov 128   ;;  %s272_s5 = smov 8  }
 0x11e   :  { %138 = dma.vmem_to_hbm [thread:$0]  %s133_s23, 256, %s351_s3, [#allocation4], %s271_s4, %s271_s4, %s272_s5  }
 0x11f   :  { %261 = dma.done.wait [#allocation4], 256  }
 0x120   :  { %262 = vsyncadd [#allocation4], 4294967040 }
 0x121   :  { %142 = vsyncpa [#allocation3], 1 }
 0x122   :  { %143 = vsyncpa [#allocation6], 1 }
 0x123   :  { %144 = vsyncpa [#allocation4], 1 }

// kernel: _lambda_.26
= control target key start
LH: loop header
LB: loop body
LE: loop exit
PB: predicated region body
PF: predicated region fallthrough
CT: control target
= control target key end

     0   :  { %8 = vsyncpa [#allocation3], 0  ;;  %s398_s0 = inlined_call_operand.hbm [shape: bf16[16,24], index: 0, kind: input, shape index: {}]   ;;  %s399_s1 = inlined_call_operand.hbm [shape: bf16[24,12], index: 1, kind: input, shape index: {}]   ;;  %s400_s2 = inlined_call_operand.hbm [shape: f32[1,12], index: 2, kind: input, shape index: {}]   ;;  %s401_s3 = inlined_call_operand.hbm [shape: bf16[16,12], index: 3, kind: output, shape index: {}]  }
   0x1   :  { %9 = vsyncpa [#allocation6], 0 }
   0x2   :  { %10 = vsyncpa [#allocation4], 0  ;;  %s306_s12 = smov [#allocation5]   ;;  %s307_s14 = smov [#allocation2]  }
   0x3   :  { %s28_s13 = sshll.u32 %s306_s12, 4  ;;  %s16_s15 = sshll.u32 %s307_s14, 4  ;;  %s29_s13 = int_to_ptr.vmem [resolvable:$true] %s28_s13  ;;  %s334_s15 = int_to_ptr.vmem [resolvable:$true] %s16_s15 }
   0x4   :  { %s212_s18 = scalar_lea.hbm %s399_s1, 192 }
   0x5   :  { %p213_p0 = scmp.ne.s32.totalorder %s399_s1, %s212_s18  ;;  %p216_p1 = scmp.lt.u32.totalorder %s212_s18, %s399_s1 }
   0x7   :  { %p218_p2 = pnand %p216_p1, %p213_p0 }
   0x9   :  { %221 = shalt.err (!%p218_p2)
}
   0xa   :  { %s222_s23 = scalar_lea.vmem %s29_s13, 192  ;;  %p227_p4 = scmp.lt.s32.totalorder %s29_s13, %s29_s13 }
   0xb   :  { %p223_p3 = scmp.ne.s32.totalorder %s29_s13, %s222_s23  ;;  %p228_p5 = scmp.lt.s32.totalorder %s222_s23, %s222_s23 }
   0xd   :  { %p229_p6 = por %p228_p5, %p227_p4 }
   0xf   :  { %p230_p7 = pnand %p229_p6, %p223_p3 }
  0x11   :  { %233 = shalt.err (!%p230_p7)
}
  0x12   :  { %s308_s24 = smov 64   ;;  %s309_s25 = smov 4  }
  0x13   :  { %34 = dma.hbm_to_vmem [thread:$0]  %s399_s1, 192, %s29_s13, [#allocation6], %s308_s24, %s308_s24, %s309_s25  }
  0x14   :  { %s234_s30 = scalar_lea.hbm %s398_s0, 128 }
  0x15   :  { %p235_p8 = scmp.ne.s32.totalorder %s398_s0, %s234_s30  ;;  %p238_p9 = scmp.lt.u32.totalorder %s234_s30, %s398_s0 }
  0x17   :  { %p240_p10 = pnand %p238_p9, %p235_p8 }
  0x19   :  { %243 = shalt.err (!%p240_p10)
}
  0x1a   :  { %s244_s8 = scalar_lea.vmem %s334_s15, 128  ;;  %p249_p12 = scmp.lt.s32.totalorder %s334_s15, %s334_s15 }
  0x1b   :  { %p245_p11 = scmp.ne.s32.totalorder %s334_s15, %s244_s8  ;;  %p250_p13 = scmp.lt.s32.totalorder %s244_s8, %s244_s8 }
  0x1d   :  { %p251_p0 = por %p250_p13, %p249_p12 }
  0x1f   :  { %p252_p1 = pnand %p251_p0, %p245_p11 }
  0x21   :  { %255 = shalt.err (!%p252_p1)
}
  0x22   :  { %22 = dma.hbm_to_vmem [thread:$0]  %s398_s0, 128, %s334_s15, [#allocation3], %s308_s24, %s308_s24, %s309_s25  }
  0x23   :  { %s310_s10 = smov [#allocation7]   ;;  %s256_s14 = scalar_lea.hbm %s400_s2, 16 }
  0x24   :  { %s41_s11 = sshll.u32 %s310_s10, 4  ;;  %p257_p2 = scmp.ne.s32.totalorder %s400_s2, %s256_s14  ;;  %s42_s11 = int_to_ptr.vmem [resolvable:$true] %s41_s11 }
  0x25   :  { %p260_p3 = scmp.lt.u32.totalorder %s256_s14, %s400_s2 }
  0x27   :  { %p262_p4 = pnand %p260_p3, %p257_p2 }
  0x29   :  { %265 = shalt.err (!%p262_p4)
}
  0x2a   :  { %s266_s20 = scalar_lea.vmem %s42_s11, 16  ;;  %s270_s0 = scalar_lea.vmem %s42_s11, 32 }
  0x2b   :  { %p267_p5 = scmp.ne.s32.totalorder %s42_s11, %s266_s20  ;;  %p271_p6 = scmp.lt.s32.totalorder %s42_s11, %s42_s11 }
  0x2c   :  { %p272_p7 = scmp.lt.s32.totalorder %s270_s0, %s266_s20 }
  0x2e   :  { %p273_p8 = por %p272_p7, %p271_p6 }
  0x30   :  { %p274_p9 = pnand %p273_p8, %p267_p5 }
  0x32   :  { %277 = shalt.err (!%p274_p9)
}
  0x33   :  { %44 = dma.hbm_to_vmem [thread:$0]  %s400_s2, 16, %s42_s11, [#allocation6]  }
  0x34   :  { %300 = dma.done.wait [#allocation3], 128  }
  0x35   :  { %301 = vsyncadd [#allocation3], 4294967168 }
  0x36   :  { %302 = dma.done.wait [#allocation6], 208  }
  0x37   :  { %303 = vsyncadd [#allocation6], 4294967088  ;;  %v311_v0 = vmov 0.0   ;;  %vm312_vm0 = vmmov 0   ;;  %v205_v1 = vld [vmem:[#allocation5] sm:$0xff]   ;;  %vm85_vm1 = vcmask 1043456  }
  0x38   :  { %189 = vmatprep.subr.bf16.mxu0 %v311_v0  ;;  %193 = vmatprep.mubr.msk.bf16.mxu0 %vm312_vm0, %v311_v0  ;;  %v206_v2 = vld [vmem:[#allocation5 + $0x8] ss:$0 sps:$4 sm:$0xff]   ;;  %v207_v4 = vld [vmem:[#allocation2] sm:$0xff]   ;;  %vm81_vm2 = vcmask 195584   ;;  %v177_v5 = vld [vmem:[#allocation7] ss:$0 sm:$0xff] }
  0x39   :  { %190 = vmatpush3.bf16.msra.mxu0 %v205_v1  ;;  %v87_v3 = vsel %vm85_vm1, %v206_v2, 0  ;;  %vm156_vm3 = vcmask 93184   ;;  %s313_s2 = smov [#allocation8]  }
  0x3a   :  { %191 = vmatprep.subr.bf16.mxu0 %v311_v0  ;;  %s164_s22 = sshll.u32 %s313_s2, 4  ;;  %s165_s22 = int_to_ptr.vmem [resolvable:$true] %s164_s22 }
  0x3b   :  { %s278_s23 = scalar_lea.vmem %s165_s22, 128  ;;  %p283_p11 = scmp.lt.s32.totalorder %s165_s22, %s165_s22 }
  0x3c   :  { %p279_p10 = scmp.ne.s32.totalorder %s165_s22, %s278_s23  ;;  %p284_p12 = scmp.lt.s32.totalorder %s278_s23, %s278_s23 }
  0x3d   :  { %192 = vmatpush3.bf16.msra.mxu0 %v87_v3 }
  0x3e   :  { %p285_p13 = por %p284_p12, %p283_p11 }
  0x40   :  { %194 = vmatmul.mubr.msk.bf16.vlgmr.msra.gmra.mrb[0].mxu0 %vm81_vm2, %v207_v4  ;;  %p286_p0 = pnand %p285_p13, %p279_p10 }
 0x113   :  { %v123_v6 = vpop.f32.mrb[0].mxu0 }
 0x114   :  { %v124_v7 = vadd.f32 %v177_v5, %v123_v6  ;;  %v195_v8 = vpop.f32.mrb[1].mxu0 }
 0x115   :  { %v126_v9 = vpop.f32.mrb[2].mxu0 }
 0x116   :  { %v130_v10 = vmul.f32 %v124_v7, %v124_v7  ;;  %v127_v11 = vadd.f32 %v177_v5, %v126_v9  ;;  %v196_v12 = vpop.f32.mrb[3].mxu0 }
 0x118   :  { %v132_v13 = vmul.f32 %v130_v10, %v124_v7  ;;  %v131_v14 = vmul.f32 %v127_v11, %v127_v11 }
 0x11a   :  { %v134_v15 = vmul.f32 0.044715, %v132_v13  ;;  %v133_v16 = vmul.f32 %v131_v14, %v127_v11 }
 0x11c   :  { %v136_v17 = vadd.f32 %v134_v15, %v124_v7  ;;  %v135_v18 = vmul.f32 0.044715, %v133_v16 }
 0x11e   :  { %v138_v19 = vmul.f32 0.7978846, %v136_v17  ;;  %v137_v20 = vadd.f32 %v135_v18, %v127_v11 }
 0x120   :  { %208 = vtanh.f32 %v138_v19  ;;  %v139_v21 = vmul.f32 0.7978846, %v137_v20 }
 0x122   :  { %210 = vtanh.f32 %v139_v21 }
 0x12a   :  { %v209_v22 = vpop.eup %208 }
 0x12b   :  { %v142_v23 = vadd.f32 1.0, %v209_v22 }
 0x12c   :  { %v211_v24 = vpop.eup %210 }
 0x12d   :  { %v143_v25 = vadd.f32 1.0, %v211_v24  ;;  %v144_v26 = vmul.f32 0.5, %v142_v23 }
 0x12f   :  { %v145_v27 = vmul.f32 0.5, %v143_v25  ;;  %v146_v28 = vmul.f32 %v144_v26, %v124_v7 }
 0x131   :  { %v147_v29 = vmul.f32 %v145_v27, %v127_v11  ;;  %v184_v30 = vpack.c.bf16 %v146_v28, %v146_v28 }
 0x133   :  { %v185_v31 = vpack.c.bf16 %v147_v29, %v147_v29  ;;  %157 = vst.msk [vmem:[#allocation8] sm:$0xf] %vm156_vm3, %v184_v30 }
 0x135   :  { %158 = vst.msk [vmem:[#allocation8 + $0x4] sm:$0xf] %vm156_vm3, %v185_v31 }
 0x136   :  { %289 = shalt.err (!%p286_p0)
}
 0x137   :  { %s290_s28 = scalar_lea.hbm %s401_s3, 128 }
 0x138   :  { %p291_p1 = scmp.ne.s32.totalorder %s401_s3, %s290_s28  ;;  %p294_p2 = scmp.lt.u32.totalorder %s290_s28, %s401_s3 }
 0x13a   :  { %p296_p3 = pnand %p294_p2, %p291_p1 }
 0x13c   :  { %299 = shalt.err (!%p296_p3)
}
 0x13d   :  { %170 = dma.vmem_to_hbm [thread:$0]  %s165_s22, 128, %s401_s3, [#allocation4], %s308_s24, %s308_s24, %s309_s25  }
 0x13e   :  { %304 = dma.done.wait [#allocation4], 128  }
 0x13f   :  { %305 = vsyncadd [#allocation4], 4294967168 }
 0x140   :  { %174 = vsyncpa [#allocation3], 1 }
 0x141   :  { %175 = vsyncpa [#allocation6], 1 }
 0x142   :  { %176 = vsyncpa [#allocation4], 1 }

// kernel: _lambda_.25
= control target key start
LH: loop header
LB: loop body
LE: loop exit
PB: predicated region body
PF: predicated region fallthrough
CT: control target
= control target key end

     0   :  { %11 = vsyncpa [#allocation3], 0  ;;  %s700_s0 = inlined_call_operand.hbm [shape: bf16[16,32], index: 0, kind: input, shape index: {}]   ;;  %s701_s1 = inlined_call_operand.hbm [shape: bf16[16,16], index: 1, kind: input, shape index: {}]   ;;  %s702_s2 = inlined_call_operand.hbm [shape: bf16[16,1], index: 2, kind: input, shape index: {}]   ;;  %s703_s3 = inlined_call_operand.hbm [shape: bf16[32,24], index: 3, kind: input, shape index: {}]   ;;  %s704_s4 = inlined_call_operand.hbm [shape: bf16[16,24], index: 4, kind: input, shape index: {}]   ;;  %s705_s5 = inlined_call_operand.hbm [shape: f32[1,24], index: 5, kind: input, shape index: {}]   ;;  %s706_s6 = inlined_call_operand.hbm [shape: bf16[16,24], index: 6, kind: output, shape index: {}]  }
   0x1   :  { %12 = vsyncpa [#allocation6], 0 }
   0x2   :  { %13 = vsyncpa [#allocation9], 0 }
   0x3   :  { %14 = vsyncpa [#allocation12], 0 }
   0x4   :  { %15 = vsyncpa [#allocation4], 0  ;;  %s536_s21 = smov [#allocation5]   ;;  %s537_s23 = smov [#allocation8]  }
   0x5   :  { %s33_s22 = sshll.u32 %s536_s21, 4  ;;  %s57_s24 = sshll.u32 %s537_s23, 4  ;;  %s34_s22 = int_to_ptr.vmem [resolvable:$true] %s33_s22  ;;  %s584_s24 = int_to_ptr.vmem [resolvable:$true] %s57_s24 }
   0x6   :  { %s372_s27 = scalar_lea.hbm %s701_s1, 128 }
   0x7   :  { %p373_p0 = scmp.ne.s32.totalorder %s701_s1, %s372_s27  ;;  %p376_p1 = scmp.lt.u32.totalorder %s372_s27, %s701_s1 }
   0x9   :  { %p378_p2 = pnand %p376_p1, %p373_p0 }
   0xb   :  { %381 = shalt.err (!%p378_p2)
}
   0xc   :  { %s382_s8 = scalar_lea.vmem %s34_s22, 128  ;;  %p387_p4 = scmp.lt.s32.totalorder %s34_s22, %s34_s22 }
   0xd   :  { %p383_p3 = scmp.ne.s32.totalorder %s34_s22, %s382_s8  ;;  %p388_p5 = scmp.lt.s32.totalorder %s382_s8, %s382_s8 }
   0xf   :  { %p389_p6 = por %p388_p5, %p387_p4 }
  0x11   :  { %p390_p7 = pnand %p389_p6, %p383_p3 }
  0x13   :  { %393 = shalt.err (!%p390_p7)
}
  0x14   :  { %s538_s9 = smov 64   ;;  %s539_s10 = smov 4  }
  0x15   :  { %39 = dma.hbm_to_vmem [thread:$0]  %s701_s1, 128, %s34_s22, [#allocation6], %s538_s9, %s538_s9, %s539_s10  }
  0x16   :  { %s394_s15 = scalar_lea.hbm %s703_s3, 256 }
  0x17   :  { %p395_p8 = scmp.ne.s32.totalorder %s703_s3, %s394_s15  ;;  %p398_p9 = scmp.lt.u32.totalorder %s394_s15, %s703_s3 }
  0x19   :  { %p400_p10 = pnand %p398_p9, %p395_p8 }
  0x1b   :  { %403 = shalt.err (!%p400_p10)
}
  0x1c   :  { %s404_s20 = scalar_lea.vmem %s584_s24, 256  ;;  %p409_p12 = scmp.lt.s32.totalorder %s584_s24, %s584_s24 }
  0x1d   :  { %p405_p11 = scmp.ne.s32.totalorder %s584_s24, %s404_s20  ;;  %p410_p13 = scmp.lt.s32.totalorder %s404_s20, %s404_s20 }
  0x1f   :  { %p411_p0 = por %p410_p13, %p409_p12 }
  0x21   :  { %p412_p1 = pnand %p411_p0, %p405_p11 }
  0x23   :  { %415 = shalt.err (!%p412_p1)
}
  0x24   :  { %63 = dma.hbm_to_vmem [thread:$0]  %s703_s3, 256, %s584_s24, [#allocation9], %s538_s9, %s538_s9, %s539_s10  }
  0x25   :  { %s540_s22 = smov [#allocation2]   ;;  %s541_s25 = smov [#allocation7]  }
  0x26   :  { %s21_s23 = sshll.u32 %s540_s22, 4  ;;  %s45_s26 = sshll.u32 %s541_s25, 4  ;;  %s22_s23 = int_to_ptr.vmem [resolvable:$true] %s21_s23  ;;  %s621_s26 = int_to_ptr.vmem [resolvable:$true] %s45_s26 }
  0x27   :  { %s416_s29 = scalar_lea.hbm %s700_s0, 128 }
  0x28   :  { %p417_p2 = scmp.ne.s32.totalorder %s700_s0, %s416_s29  ;;  %p420_p3 = scmp.lt.u32.totalorder %s416_s29, %s700_s0 }
  0x2a   :  { %p422_p4 = pnand %p420_p3, %p417_p2 }
  0x2c   :  { %425 = shalt.err (!%p422_p4)
}
  0x2d   :  { %s426_s3 = scalar_lea.vmem %s22_s23, 128  ;;  %p431_p6 = scmp.lt.s32.totalorder %s22_s23, %s22_s23 }
  0x2e   :  { %p427_p5 = scmp.ne.s32.totalorder %s22_s23, %s426_s3  ;;  %p432_p7 = scmp.lt.s32.totalorder %s426_s3, %s426_s3 }
  0x30   :  { %p433_p8 = por %p432_p7, %p431_p6 }
  0x32   :  { %p434_p9 = pnand %p433_p8, %p427_p5 }
  0x34   :  { %437 = shalt.err (!%p434_p9)
}
  0x35   :  { %27 = dma.hbm_to_vmem [thread:$0]  %s700_s0, 128, %s22_s23, [#allocation3], %s538_s9, %s538_s9, %s539_s10  }
  0x36   :  { %s438_s15 = scalar_lea.hbm %s702_s2, 128 }
  0x37   :  { %p439_p10 = scmp.ne.s32.totalorder %s702_s2, %s438_s15  ;;  %p442_p11 = scmp.lt.u32.totalorder %s438_s15, %s702_s2 }
  0x39   :  { %p444_p12 = pnand %p442_p11, %p439_p10 }
  0x3b   :  { %447 = shalt.err (!%p444_p12)
}
  0x3c   :  { %s448_s20 = scalar_lea.vmem %s621_s26, 128  ;;  %p453_p0 = scmp.lt.s32.totalorder %s621_s26, %s621_s26 }
  0x3d   :  { %p449_p13 = scmp.ne.s32.totalorder %s621_s26, %s448_s20  ;;  %p454_p1 = scmp.lt.s32.totalorder %s448_s20, %s448_s20 }
  0x3f   :  { %p455_p2 = por %p454_p1, %p453_p0 }
  0x41   :  { %p456_p3 = pnand %p455_p2, %p449_p13 }
  0x43   :  { %459 = shalt.err (!%p456_p3)
}
  0x44   :  { %51 = dma.hbm_to_vmem [thread:$0]  %s702_s2, 128, %s621_s26, [#allocation6], %s538_s9, %s538_s9, %s539_s10  }
  0x45   :  { %s542_s21 = smov [#allocation10]   ;;  %s543_s23 = smov [#allocation11]  }
  0x46   :  { %s69_s22 = sshll.u32 %s542_s21, 4  ;;  %s82_s25 = sshll.u32 %s543_s23, 4  ;;  %s70_s22 = int_to_ptr.vmem [resolvable:$true] %s69_s22  ;;  %s83_s25 = int_to_ptr.vmem [resolvable:$true] %s82_s25 }
  0x47   :  { %s460_s29 = scalar_lea.hbm %s704_s4, 128 }
  0x48   :  { %p461_p4 = scmp.ne.s32.totalorder %s704_s4, %s460_s29  ;;  %p464_p5 = scmp.lt.u32.totalorder %s460_s29, %s704_s4 }
  0x4a   :  { %p466_p6 = pnand %p464_p5, %p461_p4 }
  0x4c   :  { %469 = shalt.err (!%p466_p6)
}
  0x4d   :  { %s470_s2 = scalar_lea.vmem %s70_s22, 128  ;;  %p475_p8 = scmp.lt.s32.totalorder %s70_s22, %s70_s22 }
  0x4e   :  { %p471_p7 = scmp.ne.s32.totalorder %s70_s22, %s470_s2  ;;  %p476_p9 = scmp.lt.s32.totalorder %s470_s2, %s470_s2 }
  0x50   :  { %p477_p10 = por %p476_p9, %p475_p8 }
  0x52   :  { %p478_p11 = pnand %p477_p10, %p471_p7 }
  0x54   :  { %481 = shalt.err (!%p478_p11)
}
  0x55   :  { %75 = dma.hbm_to_vmem [thread:$0]  %s704_s4, 128, %s70_s22, [#allocation9], %s538_s9, %s538_s9, %s539_s10  }
  0x56   :  { %s482_s13 = scalar_lea.hbm %s705_s5, 16 }
  0x57   :  { %p483_p12 = scmp.ne.s32.totalorder %s705_s5, %s482_s13  ;;  %p486_p13 = scmp.lt.u32.totalorder %s482_s13, %s705_s5 }
  0x59   :  { %p488_p0 = pnand %p486_p13, %p483_p12 }
  0x5b   :  { %491 = shalt.err (!%p488_p0)
}
  0x5c   :  { %s492_s18 = scalar_lea.vmem %s83_s25, 16  ;;  %s496_s19 = scalar_lea.vmem %s83_s25, 32 }
  0x5d   :  { %p493_p1 = scmp.ne.s32.totalorder %s83_s25, %s492_s18  ;;  %p497_p2 = scmp.lt.s32.totalorder %s83_s25, %s83_s25 }
  0x5e   :  { %p498_p3 = scmp.lt.s32.totalorder %s496_s19, %s492_s18 }
  0x60   :  { %p499_p4 = por %p498_p3, %p497_p2 }
  0x62   :  { %p500_p5 = pnand %p499_p4, %p493_p1 }
  0x64   :  { %503 = shalt.err (!%p500_p5)
}
  0x65   :  { %85 = dma.hbm_to_vmem [thread:$0]  %s705_s5, 16, %s83_s25, [#allocation12]  }
  0x66   :  { %526 = dma.done.wait [#allocation3], 128  }
  0x67   :  { %527 = vsyncadd [#allocation3], 4294967168 }
  0x68   :  { %528 = dma.done.wait [#allocation6], 256  }
  0x69   :  { %529 = vsyncadd [#allocation6], 4294967040 }
  0x6a   :  { %530 = dma.done.wait [#allocation9], 384  }
  0x6b   :  { %531 = vsyncadd [#allocation9], 4294966912 }
  0x6c   :  { %532 = dma.done.wait [#allocation12], 16  }
  0x6d   :  { %533 = vsyncadd [#allocation12], 4294967280  ;;  %v544_v0 = vmov 0   ;;  %v545_v1 = vmov 0.0   ;;  %v113_v2 = vld [vmem:[#allocation7] sm:$0xf]  ;;  %v123_v10 = vlaneseq }
  0x6e   :  { %363 = vset.pattern.permute.xlu0 %v544_v0  ;;  %342 = vmatprep.subr.bf16.mxu1 %v545_v1  ;;  %v114_v3 = vld [vmem:[#allocation7 + $0x4] sm:$0xf]  ;;  %v364_v4 = vld [vmem:[#allocation8] sm:$0xff]   ;;  %v365_v5 = vld [vmem:[#allocation8 + $0x8] sm:$0xff]   ;;  %vm546_vm0 = vmmov 0   ;;  %vm216_vm1 = vcmask 261120  }
  0x6f   :  { %336 = vmatprep.subr.bf16.mxu0 %v545_v1  ;;  %117 = vperm.xlu0 %363, %v113_v2   ;;  %v366_v6 = vld [vmem:[#allocation10] sm:$0xff]   ;;  %v367_v7 = vld [vmem:[#allocation2] sm:$0xff]   ;;  %v547_v8 = vmov 839922192   ;;  %v124_v12 = vshrl.u32 %v123_v10, 7  ;;  %vm154_vm2 = vcmask 130048  }
  0x70   :  { %343 = vmatpush3.bf16.msra.mxu1 %v364_v4  ;;  %346 = vmatprep.mubr.msk.bf16.mxu1 %vm546_vm0, %v545_v1  ;;  %v121_v9 = vunpack.c.l.s4 %v547_v8  ;;  %v111_v16 = vld [vmem:[#allocation5] sm:$0xf]  ;;  %v112_v18 = vld [vmem:[#allocation5 + $0x4] sm:$0xf]  ;;  %v326_v28 = vld [vmem:[#allocation11] ss:$0 sm:$0xff] }
  0x71   :  { %344 = vmatprep.subr.bf16.mxu1 %v545_v1  ;;  %337 = vmatpush3.bf16.msra.mxu0 %v366_v6  ;;  %vm296_vm3 = vcmask 191488   ;;  %s548_s5 = smov [#allocation13]  }
  0x72   :  { %338 = vmatprep.mubr.msk.bf16.mxu0 %vm546_vm0, %v545_v1  ;;  %v122_v11 = vunpack.c.0.s8 %v121_v9  ;;  %s304_s0 = sshll.u32 %s548_s5, 4  ;;  %s305_s0 = int_to_ptr.vmem [resolvable:$true] %s304_s0 }
  0x73   :  { %129 = vperm.xlu0 %363, %v114_v3   ;;  %s504_s1 = scalar_lea.vmem %s305_s0, 128  ;;  %p509_p7 = scmp.lt.s32.totalorder %s305_s0, %s305_s0 }
  0x74   :  { %345 = vmatpush3.bf16.msra.mxu1 %v365_v5  ;;  %v125_v13 = vsub.s32 %v122_v11, %v124_v12  ;;  %p505_p6 = scmp.ne.s32.totalorder %s305_s0, %s504_s1  ;;  %p510_p8 = scmp.lt.s32.totalorder %s504_s1, %s504_s1 }
  0x76   :  { %p511_p9 = por %p510_p8, %p509_p7 }
  0x77   :  { %347 = vmatmul.mubr.msk.bf16.vlgmr.msra.gmra.mrb[0].mxu1 %vm216_vm1, %v367_v7 }
  0x78   :  { %p512_p10 = pnand %p511_p9, %p505_p6 }
  0xee   :  { %v118_v14 = vpop.permute.xlu0 %117 }
  0xef   :  { %v126_v15 = vrot.slane %v118_v14, %v125_v13 }
  0xf1   :  { %v139_v20 = vmul.bf16 %v126_v15, %v111_v16 }
  0xf2   :  { %v130_v17 = vpop.permute.xlu0 %129 }
  0xf3   :  { %v138_v19 = vrot.slane %v130_v17, %v125_v13 }
  0xf5   :  { %v140_v21 = vmul.bf16 %v138_v19, %v112_v18 }
  0xf7   :  { %v319_v22 = vcombine.low %v139_v20, %v140_v21 }
  0xf9   :  { %339 = vmatmul.mubr.msk.bf16.vlgmr.msra.gmra.mrb[0].mxu0 %vm154_vm2, %v319_v22 }
 0x14a   :  { %v254_v23 = vpop.f32.mrb[0].mxu1 }
 0x14b   :  { %v348_v24 = vpop.f32.mrb[1].mxu1 }
 0x14c   :  { %v257_v25 = vpop.f32.mrb[2].mxu1 }
 0x14d   :  { %v349_v26 = vpop.f32.mrb[3].mxu1 }
 0x1cc   :  { %v192_v27 = vpop.f32.mrb[0].mxu0 }
 0x1cd   :  { %v255_v29 = vadd.f32 %v254_v23, %v192_v27  ;;  %v340_v30 = vpop.f32.mrb[1].mxu0 }
 0x1ce   :  { %v195_v31 = vpop.f32.mrb[2].mxu0 }
 0x1cf   :  { %v268_v32 = vadd.f32 %v326_v28, %v255_v29  ;;  %v258_v33 = vadd.f32 %v257_v25, %v195_v31  ;;  %v341_v34 = vpop.f32.mrb[3].mxu0 }
 0x1d1   :  { %v270_v35 = vmul.f32 %v268_v32, %v268_v32  ;;  %v269_v36 = vadd.f32 %v326_v28, %v258_v33 }
 0x1d3   :  { %v272_v37 = vmul.f32 %v270_v35, %v268_v32  ;;  %v271_v38 = vmul.f32 %v269_v36, %v269_v36 }
 0x1d5   :  { %v274_v39 = vmul.f32 0.044715, %v272_v37  ;;  %v273_v40 = vmul.f32 %v271_v38, %v269_v36 }
 0x1d7   :  { %v276_v41 = vadd.f32 %v274_v39, %v268_v32  ;;  %v275_v42 = vmul.f32 0.044715, %v273_v40 }
 0x1d9   :  { %v278_v43 = vmul.f32 0.7978846, %v276_v41  ;;  %v277_v44 = vadd.f32 %v275_v42, %v269_v36 }
 0x1db   :  { %368 = vtanh.f32 %v278_v43  ;;  %v279_v45 = vmul.f32 0.7978846, %v277_v44 }
 0x1dd   :  { %370 = vtanh.f32 %v279_v45 }
 0x1e5   :  { %v369_v46 = vpop.eup %368 }
 0x1e6   :  { %v282_v47 = vadd.f32 1.0, %v369_v46 }
 0x1e7   :  { %v371_v48 = vpop.eup %370 }
 0x1e8   :  { %v283_v49 = vadd.f32 1.0, %v371_v48  ;;  %v284_v50 = vmul.f32 0.5, %v282_v47 }
 0x1ea   :  { %v285_v51 = vmul.f32 0.5, %v283_v49  ;;  %v286_v52 = vmul.f32 %v284_v50, %v268_v32 }
 0x1ec   :  { %v287_v53 = vmul.f32 %v285_v51, %v269_v36  ;;  %v329_v54 = vpack.c.bf16 %v286_v52, %v286_v52 }
 0x1ee   :  { %v330_v55 = vpack.c.bf16 %v287_v53, %v287_v53  ;;  %297 = vst.msk [vmem:[#allocation13] sm:$0xf] %vm296_vm3, %v329_v54 }
 0x1f0   :  { %298 = vst.msk [vmem:[#allocation13 + $0x4] sm:$0xf] %vm296_vm3, %v330_v55 }
 0x1f1   :  { %515 = shalt.err (!%p512_p10)
}
 0x1f2   :  { %s516_s23 = scalar_lea.hbm %s706_s6, 128 }
 0x1f3   :  { %p517_p11 = scmp.ne.s32.totalorder %s706_s6, %s516_s23  ;;  %p520_p12 = scmp.lt.u32.totalorder %s516_s23, %s706_s6 }
 0x1f5   :  { %p522_p13 = pnand %p520_p12, %p517_p11 }
 0x1f7   :  { %525 = shalt.err (!%p522_p13)
}
 0x1f8   :  { %310 = dma.vmem_to_hbm [thread:$0]  %s305_s0, 128, %s706_s6, [#allocation4], %s538_s9, %s538_s9, %s539_s10  }
 0x1f9   :  { %534 = dma.done.wait [#allocation4], 128  }
 0x1fa   :  { %535 = vsyncadd [#allocation4], 4294967168 }
 0x1fb   :  { %314 = vsyncpa [#allocation3], 1 }
 0x1fc   :  { %315 = vsyncpa [#allocation6], 1 }
 0x1fd   :  { %316 = vsyncpa [#allocation9], 1 }
 0x1fe   :  { %317 = vsyncpa [#allocation12], 1 }
 0x1ff   :  { %318 = vsyncpa [#allocation4], 1 }

</bundles_post_ra>
